<compile_context>
chip_gen: v7x
topology: tpu7x:2x2x1
jax: 0.10.0
libtpu: 0.0.40
codegen_flags: <defaults>
</compile_context>

<pallas_src>
import functools

import jax
import jax.numpy as jnp
from jax import lax
from jax.experimental import pallas as pl
from jax.experimental.pallas import tpu as pltpu


# ----------------------------- Pallas kernels ------------------------------

def _fc_kernel(x_ref, w_ref, b_ref, o_ref):
    # x: [B, HW, C] (channel-last)  ->  o = mean_HW(x) @ W_pad + b_pad   [B, 128]
    pooled = jnp.mean(x_ref[...], axis=1)                               # [B, C]
    o_ref[...] = jnp.dot(pooled, w_ref[...],
                         preferred_element_type=jnp.float32) + b_ref[...]


def _cca_query_kernel(spt_ref, qry_ref, w_ref, scale_ref, shift_ref, sim_ref, *,
                      temperature, temperature_attn):
    # One grid step == one query image.  Everything is VMEM-resident.
    #   spt_ref   : [way, HW, C]   channel-last support features (replicated)
    #   qry_ref   : [1,   HW, C]   this step's query
    #   w_ref     : [C, D=128]     cca_1x1 conv weight (Cout zero-padded 64->128)
    #   scale/shift : [1, D]       folded eval-mode BN affine (zero on padding)
    #   sim_ref   : [1, way, 1]    cosine similarity / temperature
    spt = spt_ref[...]
    qry = qry_ref[0]
    way, hw, c = spt.shape

    # normalize_feature: subtract per-position channel mean (lane reduce, C=640).
    sptn = spt - jnp.mean(spt, axis=-1, keepdims=True)                  # [way, HW, C]
    qryn = qry - jnp.mean(qry, axis=-1, keepdims=True)                  # [HW, C]

    # ---- cca_1x1 embedding: ONE batched matmul over all (way+1)*HW rows ----
    emb_in = jnp.concatenate([sptn.reshape(way * hw, c), qryn], axis=0)  # [75, C]
    y = jnp.dot(emb_in, w_ref[...], preferred_element_type=jnp.float32)  # [75, D]
    y = y * scale_ref[...] + shift_ref[...]                              # BN (eval)
    y = jnp.maximum(y, 0.0)                                              # ReLU
    # F.normalize(p=2, dim=channel, eps=1e-8); padded channels stay exactly 0.
    inv_n = lax.rsqrt(jnp.maximum(jnp.sum(y * y, axis=-1, keepdims=True), 1e-16))
    emb = y * inv_n                                                      # [75, D]

    # ---- 4-D correlation: two lane-major matmuls (bf16 operands, f32 acc) ---
    emb_s = emb[:way * hw].astype(jnp.bfloat16)                          # [way*HW, D]
    emb_q = emb[way * hw:].astype(jnp.bfloat16)                          # [HW, D]
    contract_d = (((1,), (1,)), ((), ()))
    # corr_sq[n*HW+ij, kl]  (query-spatial kl on lanes -> cq branch)
    corr_sq = lax.dot_general(emb_s, emb_q, dimension_numbers=contract_d,
                              preferred_element_type=jnp.float32)        # [way*HW, HW]
    # corr_qs[kl, n*HW+ij]  (support-spatial ij on lanes -> cs branch)
    corr_qs = lax.dot_general(emb_q, emb_s, dimension_numbers=contract_d,
                              preferred_element_type=jnp.float32)        # [HW, way*HW]

    inv_ta = 1.0 / temperature_attn

    def gnorm_softmax(x):
        # gaussian_normalize (torch.var ddof=1, eps=1e-5) over the last axis,
        # then softmax(x / temperature_attn) over the same (lane) axis.
        m = jnp.mean(x, axis=-1, keepdims=True)
        d = x - m
        var = jnp.sum(d * d, axis=-1, keepdims=True) * (1.0 / (hw - 1))
        z = d * lax.rsqrt(var + 1e-5) * inv_ta
        z = z - jnp.max(z, axis=-1, keepdims=True)
        e = jnp.exp(z)
        return e * pl.reciprocal(jnp.sum(e, axis=-1, keepdims=True), approx=True)

    # cq branch: normalize/softmax over kl (already on lanes).
    cq = gnorm_softmax(corr_sq.reshape(way, hw, hw))                     # [way, HWs, HWq]
    attn_q = jnp.sum(cq, axis=1)                                         # [way, HWq]
    # cs branch: normalize/softmax over ij (on lanes of corr_qs); split per way.
    cs_in = jnp.stack([corr_qs[:, n * hw:(n + 1) * hw] for n in range(way)],
                      axis=0)                                            # [way, HWq, HWs]
    cs = gnorm_softmax(cs_in)
    attn_s = jnp.sum(cs, axis=1)                                         # [way, HWs]

    # ---- attended spatial pooling as MXU contractions (no broadcast temp) ---
    sap = jnp.einsum("nqs,nsc->nqc", attn_s[:, None, :], sptn,
                     preferred_element_type=jnp.float32)[:, 0, :] * (1.0 / hw)
    qap = jnp.dot(attn_q, qryn, preferred_element_type=jnp.float32) * (1.0 / hw)

    # cosine similarity over channels, then / temperature
    num = jnp.sum(sap * qap, axis=-1, keepdims=True)                     # [way, 1]
    n1 = jnp.sqrt(jnp.sum(sap * sap, axis=-1, keepdims=True))
    n2 = jnp.sqrt(jnp.sum(qap * qap, axis=-1, keepdims=True))
    den = jnp.maximum(n1, 1e-8) * jnp.maximum(n2, 1e-8)
    sim_ref[0] = num / den * (1.0 / temperature)


# ------------------------------- wrappers ----------------------------------

def fc_forward(x_nchw, w_fc, b_fc, n_pad=128):
    b, c, h, w = x_nchw.shape
    n = w_fc.shape[1]
    hw = h * w
    x3 = x_nchw.reshape(b, c, hw).transpose(0, 2, 1)                     # [B, HW, C]
    w_p = jnp.pad(w_fc, ((0, 0), (0, n_pad - n)))
    b_p = jnp.pad(b_fc.reshape(1, -1), ((0, 0), (0, n_pad - n)))
    out = pl.pallas_call(
        _fc_kernel,
        out_shape=jax.ShapeDtypeStruct((b, n_pad), jnp.float32),
        cost_estimate=pl.CostEstimate(
            flops=2 * b * c * n_pad + b * hw * c,
            transcendentals=0,
            bytes_accessed=(x3.size + w_p.size + b * n_pad) * 4),
    )(x3, w_p, b_p)
    return out[:, :n]


def renet_cca(params, args, spt, qry, d_pad=128):
    """mode='cca' (eval).  spt: [1, way*shot, C, H, W], qry: [Q, C, H, W]."""
    spt = spt[0]                                                         # .squeeze(0)
    way_shot, c, h, w = spt.shape
    q = qry.shape[0]
    hw = h * w
    d = params["w1x1"].shape[1]

    # Channel-last, lane-dense layouts (wrapper-side layout plumbing only).
    spt3 = spt.reshape(way_shot, c, hw).transpose(0, 2, 1)               # [way, HW, C]
    qry3 = qry.reshape(q, c, hw).transpose(0, 2, 1)                      # [Q,  HW, C]

    # Zero-pad cca_1x1 Cout 64 -> 128 for lane-dense embed math.  Padded
    # channels have w = scale = shift = 0 so they stay exactly 0 after BN+ReLU
    # and do not perturb the L2 norm or the correlation.
    pad = ((0, 0), (0, d_pad - d))
    w_p = jnp.pad(params["w1x1"], pad)
    scale_p = jnp.pad(params["bn_scale"], pad)
    shift_p = jnp.pad(params["bn_shift"], pad)

    kern = functools.partial(_cca_query_kernel,
                             temperature=args["temperature"],
                             temperature_attn=args["temperature_attn"])
    flops = q * 2 * ((way_shot + 1) * hw * c * d_pad          # embed matmul
                     + 2 * way_shot * hw * d_pad * hw         # correlations
                     + 2 * way_shot * hw * c)                 # attended pooling
    out = pl.pallas_call(
        kern,
        grid=(q,),
        in_specs=[
            pl.BlockSpec((way_shot, hw, c), lambda qi: (0, 0, 0)),   # replicated
            pl.BlockSpec((1, hw, c), lambda qi: (qi, 0, 0)),         # per-query
            pl.BlockSpec((c, d_pad), lambda qi: (0, 0)),             # replicated
            pl.BlockSpec((1, d_pad), lambda qi: (0, 0)),
            pl.BlockSpec((1, d_pad), lambda qi: (0, 0)),
        ],
        out_specs=pl.BlockSpec((1, way_shot, 1), lambda qi: (qi, 0, 0)),
        out_shape=jax.ShapeDtypeStruct((q, way_shot, 1), jnp.float32),
        compiler_params=pltpu.CompilerParams(
            dimension_semantics=("parallel",)),                      # v7x: 2 TCs
        cost_estimate=pl.CostEstimate(
            flops=flops,
            transcendentals=q * 2 * way_shot * hw * hw,
            bytes_accessed=(spt3.size + qry3.size + w_p.size
                            + 2 * d_pad + q * way_shot) * 4),
    )(spt3, qry3, w_p, scale_p, shift_p)
    return out[:, :, 0]                                                  # [Q, way]


# ---------------------------- pure-JAX reference ---------------------------

def _ref_fc(x, w_fc, b_fc):
    return x.mean(axis=(-1, -2)) @ w_fc + b_fc


def _ref_cca(params, args, spt5, qry):
    spt = spt5[0]
    nf = lambda x: x - x.mean(axis=1, keepdims=True)
    sptn, qryn = nf(spt), nf(qry)

    def cca1x1(x):
        y = jnp.einsum("nchw,cd->ndhw", x, params["w1x1"])
        y = y * params["bn_scale"].reshape(1, -1, 1, 1) + \
            params["bn_shift"].reshape(1, -1, 1, 1)
        y = jnp.maximum(y, 0.0)
        nrm = jnp.sqrt(jnp.sum(y * y, axis=1, keepdims=True))
        return y / jnp.maximum(nrm, 1e-8)

    se, qe = cca1x1(sptn), cca1x1(qryn)
    corr = jnp.einsum("ncij,qckl->qnijkl", se, qe)
    q, way, h, w = qe.shape[0], se.shape[0], spt.shape[2], spt.shape[3]
    hw = h * w

    def gnorm(x, axis):
        m = x.mean(axis=axis, keepdims=True)
        v = jnp.var(x, axis=axis, keepdims=True, ddof=1)
        return (x - m) / jnp.sqrt(v + 1e-5)

    cs = jax.nn.softmax(gnorm(corr.reshape(q, way, hw, h, w), 2)
                        / args["temperature_attn"], axis=2).reshape(q, way, h, w, h, w)
    cq = jax.nn.softmax(gnorm(corr.reshape(q, way, h, w, hw), 4)
                        / args["temperature_attn"], axis=4).reshape(q, way, h, w, h, w)
    attn_s = cs.sum(axis=(4, 5))
    attn_q = cq.sum(axis=(2, 3))
    sap = (attn_s[:, :, None] * sptn[None]).mean(axis=(-1, -2))
    qap = (attn_q[:, :, None] * qryn[:, None]).mean(axis=(-1, -2))
    num = jnp.sum(sap * qap, axis=-1)
    den = jnp.maximum(jnp.linalg.norm(sap, axis=-1) *
                      jnp.linalg.norm(qap, axis=-1), 1e-8)
    return num / den / args["temperature"]


# ---------------------------------- main ------------------------------------

if __name__ == "__main__":
    # small shapes consistent with the module: encoder_dim=640 (fixed by RENet),
    # 5x5 spatial map (ResNet-12 output), 2-way 1-shot, 3 query images.
    C, H, W = 640, 5, 5
    args = dict(way=2, shot=1, num_class=16,
                temperature=0.2, temperature_attn=5.0)
    num_qry = 3

    key = jax.random.PRNGKey(0)
    ks = jax.random.split(key, 10)

    # deterministic synthetic parameters (module __init__ shapes), eval-mode BN
    gamma = 1.0 + 0.1 * jax.random.normal(ks[0], (64,), jnp.float32)
    beta = 0.1 * jax.random.normal(ks[1], (64,), jnp.float32)
    rmean = 0.1 * jax.random.normal(ks[2], (64,), jnp.float32)
    rvar = 1.0 + 0.2 * jnp.abs(jax.random.normal(ks[3], (64,), jnp.float32))
    scale = gamma / jnp.sqrt(rvar + 1e-5)
    shift = beta - rmean * scale
    params = dict(
        w1x1=0.05 * jax.random.normal(ks[4], (C, 64), jnp.float32),   # Conv2d(640,64,1)
        bn_scale=scale.reshape(1, 64),
        bn_shift=shift.reshape(1, 64),
        w_fc=0.05 * jax.random.normal(ks[5], (C, args["num_class"]), jnp.float32),
        b_fc=0.01 * jax.random.normal(ks[6], (args["num_class"],), jnp.float32),
    )

    # inputs (NCHW, as PyTorch)
    spt = jax.random.normal(ks[7], (1, args["way"] * args["shot"], C, H, W),
                            jnp.float32)
    qry = jax.random.normal(ks[8], (num_qry, C, H, W), jnp.float32)
    x_fc = jax.random.normal(ks[9], (num_qry, C, H, W), jnp.float32)

    # jit the wrappers so parameter padding / layout transposes fuse into a
    # single dispatch around the Pallas calls.
    cca_fn = jax.jit(functools.partial(renet_cca, params, args))
    fc_fn = jax.jit(fc_forward)

    # mode='cca'
    sim = jax.block_until_ready(cca_fn(spt, qry))
    # mode='fc'
    logits = jax.block_until_ready(fc_fn(x_fc, params["w_fc"], params["b_fc"]))

    # sanity-check against a pure-JAX reference
    with jax.default_matmul_precision("highest"):
        sim_ref = _ref_cca(params, args, spt, qry)
        logits_ref = _ref_fc(x_fc, params["w_fc"], params["b_fc"])
    assert bool(jnp.all(jnp.isfinite(sim))) and bool(jnp.all(jnp.isfinite(logits)))
    assert bool(jnp.allclose(sim, sim_ref, rtol=3e-2, atol=3e-2)), \
        f"cca mismatch: {jnp.max(jnp.abs(sim - sim_ref))}"
    assert bool(jnp.allclose(logits, logits_ref, rtol=3e-2, atol=3e-2)), \
        f"fc mismatch: {jnp.max(jnp.abs(logits - logits_ref))}"

    print("KERNEL_OK")
</pallas_src>

<mosaic_0001>
module attributes {stable_mosaic.version = 11 : i64} {
  func.func @_cca_query_kernel(%arg0: i32, %arg1: memref<2x25x640xf32, #tpu.memory_space<vmem>>, %arg2: memref<1x25x640xf32, #tpu.memory_space<vmem>>, %arg3: memref<640x128xf32, #tpu.memory_space<vmem>>, %arg4: memref<1x128xf32, #tpu.memory_space<vmem>>, %arg5: memref<1x128xf32, #tpu.memory_space<vmem>>, %arg6: memref<1x2x1xf32, #tpu.memory_space<vmem>>) attributes {dimension_semantics = [#tpu.dimension_semantics<parallel>], iteration_bounds = array<i64: 3>, scalar_prefetch = 0 : i64, scratch_operands = 0 : i64, tpu.core_type = #tpu.core_type<tc>, window_params = [{pipeline_mode = #tpu.pipeline_mode<synchronous>, transform_indices = @transform_0, window_bounds = array<i64: 2, 25, 640>}, {transform_indices = @transform_1, window_bounds = array<i64: 1, 25, 640>}, {pipeline_mode = #tpu.pipeline_mode<synchronous>, transform_indices = @transform_2, window_bounds = array<i64: 640, 128>}, {pipeline_mode = #tpu.pipeline_mode<synchronous>, transform_indices = @transform_3, window_bounds = array<i64: 1, 128>}, {pipeline_mode = #tpu.pipeline_mode<synchronous>, transform_indices = @transform_4, window_bounds = array<i64: 1, 128>}, {transform_indices = @transform_5, window_bounds = array<i64: 1, 2, 1>}]} {
    %c0 = arith.constant 0 : index
    %c0_0 = arith.constant 0 : index
    %c0_1 = arith.constant 0 : index
    %0 = vector.load %arg1[%c0, %c0_0, %c0_1] : memref<2x25x640xf32, #tpu.memory_space<vmem>>, vector<2x25x640xf32>
    %c0_2 = arith.constant 0 : index
    %c0_3 = arith.constant 0 : index
    %c0_4 = arith.constant 0 : index
    %1 = vector.load %arg2[%c0_2, %c0_3, %c0_4] : memref<1x25x640xf32, #tpu.memory_space<vmem>>, vector<1x25x640xf32>
    %2 = vector.shape_cast %1 : vector<1x25x640xf32> to vector<25x640xf32>
    %cst = arith.constant dense<0.000000e+00> : vector<2x25xf32>
    %3 = vector.multi_reduction <add>, %0, %cst [2] : vector<2x25x640xf32> to vector<2x25xf32>
    %4 = vector.shape_cast %3 : vector<2x25xf32> to vector<2x25x1xf32>
    %cst_5 = arith.constant 6.400000e+02 : f32
    %5 = vector.broadcast %cst_5 : f32 to vector<2x25x1xf32>
    %6 = arith.divf %4, %5 : vector<2x25x1xf32>
    %7 = vector.broadcast %6 : vector<2x25x1xf32> to vector<2x25x640xf32>
    %8 = arith.subf %0, %7 : vector<2x25x640xf32>
    %cst_6 = arith.constant dense<0.000000e+00> : vector<25xf32>
    %9 = vector.multi_reduction <add>, %2, %cst_6 [1] : vector<25x640xf32> to vector<25xf32>
    %10 = vector.shape_cast %9 : vector<25xf32> to vector<25x1xf32>
    %cst_7 = arith.constant 6.400000e+02 : f32
    %11 = vector.broadcast %cst_7 : f32 to vector<25x1xf32>
    %12 = arith.divf %10, %11 : vector<25x1xf32>
    %13 = vector.broadcast %12 : vector<25x1xf32> to vector<25x640xf32>
    %14 = arith.subf %2, %13 : vector<25x640xf32>
    %15 = vector.shape_cast %8 : vector<2x25x640xf32> to vector<50x640xf32>
    %16 = tpu.concatenate %15, %14 in 0 : vector<50x640xf32>, vector<25x640xf32> -> vector<75x640xf32>
    %c0_8 = arith.constant 0 : index
    %c0_9 = arith.constant 0 : index
    %17 = vector.load %arg3[%c0_8, %c0_9] : memref<640x128xf32, #tpu.memory_space<vmem>>, vector<640x128xf32>
    %cst_10 = arith.constant dense<0.000000e+00> : vector<75x128xf32>
    %18 = tpu.matmul %16, %17, %cst_10 {dimension_numbers = #tpu.dot_dimension_numbers<[1], [0], [0], [1], [0, 0, 1, 1], [], []>} : vector<75x640xf32>, vector<640x128xf32>, vector<75x128xf32> -> vector<75x128xf32>
    %c0_11 = arith.constant 0 : index
    %c0_12 = arith.constant 0 : index
    %19 = vector.load %arg4[%c0_11, %c0_12] : memref<1x128xf32, #tpu.memory_space<vmem>>, vector<1x128xf32>
    %20 = vector.broadcast %19 : vector<1x128xf32> to vector<75x128xf32>
    %21 = arith.mulf %18, %20 : vector<75x128xf32>
    %c0_13 = arith.constant 0 : index
    %c0_14 = arith.constant 0 : index
    %22 = vector.load %arg5[%c0_13, %c0_14] : memref<1x128xf32, #tpu.memory_space<vmem>>, vector<1x128xf32>
    %23 = vector.broadcast %22 : vector<1x128xf32> to vector<75x128xf32>
    %24 = arith.addf %21, %23 : vector<75x128xf32>
    %cst_15 = arith.constant 0.000000e+00 : f32
    %25 = vector.broadcast %cst_15 : f32 to vector<75x128xf32>
    %26 = arith.maximumf %24, %25 : vector<75x128xf32>
    %27 = arith.mulf %26, %26 : vector<75x128xf32>
    %cst_16 = arith.constant dense<0.000000e+00> : vector<75xf32>
    %28 = vector.multi_reduction <add>, %27, %cst_16 [1] : vector<75x128xf32> to vector<75xf32>
    %29 = vector.shape_cast %28 : vector<75xf32> to vector<75x1xf32>
    %cst_17 = arith.constant 1.000000e-16 : f32
    %30 = vector.broadcast %cst_17 : f32 to vector<75x1xf32>
    %31 = arith.maximumf %29, %30 : vector<75x1xf32>
    %32 = math.rsqrt %31 : vector<75x1xf32>
    %33 = vector.broadcast %32 : vector<75x1xf32> to vector<75x128xf32>
    %34 = arith.mulf %26, %33 : vector<75x128xf32>
    %35 = vector.extract_strided_slice %34 {offsets = [0, 0], sizes = [50, 128], strides = [1, 1]} : vector<75x128xf32> to vector<50x128xf32>
    %36 = arith.truncf %35 : vector<50x128xf32> to vector<50x128xbf16>
    %37 = vector.extract_strided_slice %34 {offsets = [50, 0], sizes = [25, 128], strides = [1, 1]} : vector<75x128xf32> to vector<25x128xf32>
    %38 = arith.truncf %37 : vector<25x128xf32> to vector<25x128xbf16>
    %cst_18 = arith.constant dense<0.000000e+00> : vector<50x25xf32>
    %39 = tpu.matmul %36, %38, %cst_18 {dimension_numbers = #tpu.dot_dimension_numbers<[1], [1], [0], [0], [0, 0, 1, 0], [], []>} : vector<50x128xbf16>, vector<25x128xbf16>, vector<50x25xf32> -> vector<50x25xf32>
    %cst_19 = arith.constant dense<0.000000e+00> : vector<25x50xf32>
    %40 = tpu.matmul %38, %36, %cst_19 {dimension_numbers = #tpu.dot_dimension_numbers<[1], [1], [0], [0], [0, 0, 1, 0], [], []>} : vector<25x128xbf16>, vector<50x128xbf16>, vector<25x50xf32> -> vector<25x50xf32>
    %41 = vector.shape_cast %39 : vector<50x25xf32> to vector<2x25x25xf32>
    %cst_20 = arith.constant dense<0.000000e+00> : vector<2x25xf32>
    %42 = vector.multi_reduction <add>, %41, %cst_20 [2] : vector<2x25x25xf32> to vector<2x25xf32>
    %43 = vector.shape_cast %42 : vector<2x25xf32> to vector<2x25x1xf32>
    %cst_21 = arith.constant 2.500000e+01 : f32
    %44 = vector.broadcast %cst_21 : f32 to vector<2x25x1xf32>
    %45 = arith.divf %43, %44 : vector<2x25x1xf32>
    %46 = vector.broadcast %45 : vector<2x25x1xf32> to vector<2x25x25xf32>
    %47 = arith.subf %41, %46 : vector<2x25x25xf32>
    %48 = arith.mulf %47, %47 : vector<2x25x25xf32>
    %cst_22 = arith.constant dense<0.000000e+00> : vector<2x25xf32>
    %49 = vector.multi_reduction <add>, %48, %cst_22 [2] : vector<2x25x25xf32> to vector<2x25xf32>
    %50 = vector.shape_cast %49 : vector<2x25xf32> to vector<2x25x1xf32>
    %cst_23 = arith.constant 0.0416666679 : f32
    %51 = vector.broadcast %cst_23 : f32 to vector<2x25x1xf32>
    %52 = arith.mulf %50, %51 : vector<2x25x1xf32>
    %cst_24 = arith.constant 9.99999974E-6 : f32
    %53 = vector.broadcast %cst_24 : f32 to vector<2x25x1xf32>
    %54 = arith.addf %52, %53 : vector<2x25x1xf32>
    %55 = math.rsqrt %54 : vector<2x25x1xf32>
    %56 = vector.broadcast %55 : vector<2x25x1xf32> to vector<2x25x25xf32>
    %57 = arith.mulf %47, %56 : vector<2x25x25xf32>
    %cst_25 = arith.constant 2.000000e-01 : f32
    %58 = vector.broadcast %cst_25 : f32 to vector<2x25x25xf32>
    %59 = arith.mulf %57, %58 : vector<2x25x25xf32>
    %cst_26 = arith.constant dense<0xFF800000> : vector<2x25xf32>
    %60 = vector.multi_reduction <maximumf>, %59, %cst_26 [2] : vector<2x25x25xf32> to vector<2x25xf32>
    %61 = vector.shape_cast %60 : vector<2x25xf32> to vector<2x25x1xf32>
    %62 = vector.broadcast %61 : vector<2x25x1xf32> to vector<2x25x25xf32>
    %63 = arith.subf %59, %62 : vector<2x25x25xf32>
    %64 = math.exp %63 : vector<2x25x25xf32>
    %cst_27 = arith.constant dense<0.000000e+00> : vector<2x25xf32>
    %65 = vector.multi_reduction <add>, %64, %cst_27 [2] : vector<2x25x25xf32> to vector<2x25xf32>
    %66 = vector.shape_cast %65 : vector<2x25xf32> to vector<2x25x1xf32>
    %67 = tpu.reciprocal %66 {approx = true} : vector<2x25x1xf32> -> vector<2x25x1xf32>
    %68 = vector.broadcast %67 : vector<2x25x1xf32> to vector<2x25x25xf32>
    %69 = arith.mulf %64, %68 : vector<2x25x25xf32>
    %cst_28 = arith.constant dense<0.000000e+00> : vector<2x25xf32>
    %70 = vector.multi_reduction <add>, %69, %cst_28 [1] : vector<2x25x25xf32> to vector<2x25xf32>
    %71 = vector.extract_strided_slice %40 {offsets = [0, 0], sizes = [25, 25], strides = [1, 1]} : vector<25x50xf32> to vector<25x25xf32>
    %72 = vector.extract_strided_slice %40 {offsets = [0, 25], sizes = [25, 25], strides = [1, 1]} : vector<25x50xf32> to vector<25x25xf32>
    %73 = vector.shape_cast %71 : vector<25x25xf32> to vector<1x25x25xf32>
    %74 = vector.shape_cast %72 : vector<25x25xf32> to vector<1x25x25xf32>
    %75 = tpu.concatenate %73, %74 in 0 : vector<1x25x25xf32>, vector<1x25x25xf32> -> vector<2x25x25xf32>
    %cst_29 = arith.constant dense<0.000000e+00> : vector<2x25xf32>
    %76 = vector.multi_reduction <add>, %75, %cst_29 [2] : vector<2x25x25xf32> to vector<2x25xf32>
    %77 = vector.shape_cast %76 : vector<2x25xf32> to vector<2x25x1xf32>
    %cst_30 = arith.constant 2.500000e+01 : f32
    %78 = vector.broadcast %cst_30 : f32 to vector<2x25x1xf32>
    %79 = arith.divf %77, %78 : vector<2x25x1xf32>
    %80 = vector.broadcast %79 : vector<2x25x1xf32> to vector<2x25x25xf32>
    %81 = arith.subf %75, %80 : vector<2x25x25xf32>
    %82 = arith.mulf %81, %81 : vector<2x25x25xf32>
    %cst_31 = arith.constant dense<0.000000e+00> : vector<2x25xf32>
    %83 = vector.multi_reduction <add>, %82, %cst_31 [2] : vector<2x25x25xf32> to vector<2x25xf32>
    %84 = vector.shape_cast %83 : vector<2x25xf32> to vector<2x25x1xf32>
    %cst_32 = arith.constant 0.0416666679 : f32
    %85 = vector.broadcast %cst_32 : f32 to vector<2x25x1xf32>
    %86 = arith.mulf %84, %85 : vector<2x25x1xf32>
    %cst_33 = arith.constant 9.99999974E-6 : f32
    %87 = vector.broadcast %cst_33 : f32 to vector<2x25x1xf32>
    %88 = arith.addf %86, %87 : vector<2x25x1xf32>
    %89 = math.rsqrt %88 : vector<2x25x1xf32>
    %90 = vector.broadcast %89 : vector<2x25x1xf32> to vector<2x25x25xf32>
    %91 = arith.mulf %81, %90 : vector<2x25x25xf32>
    %cst_34 = arith.constant 2.000000e-01 : f32
    %92 = vector.broadcast %cst_34 : f32 to vector<2x25x25xf32>
    %93 = arith.mulf %91, %92 : vector<2x25x25xf32>
    %cst_35 = arith.constant dense<0xFF800000> : vector<2x25xf32>
    %94 = vector.multi_reduction <maximumf>, %93, %cst_35 [2] : vector<2x25x25xf32> to vector<2x25xf32>
    %95 = vector.shape_cast %94 : vector<2x25xf32> to vector<2x25x1xf32>
    %96 = vector.broadcast %95 : vector<2x25x1xf32> to vector<2x25x25xf32>
    %97 = arith.subf %93, %96 : vector<2x25x25xf32>
    %98 = math.exp %97 : vector<2x25x25xf32>
    %cst_36 = arith.constant dense<0.000000e+00> : vector<2x25xf32>
    %99 = vector.multi_reduction <add>, %98, %cst_36 [2] : vector<2x25x25xf32> to vector<2x25xf32>
    %100 = vector.shape_cast %99 : vector<2x25xf32> to vector<2x25x1xf32>
    %101 = tpu.reciprocal %100 {approx = true} : vector<2x25x1xf32> -> vector<2x25x1xf32>
    %102 = vector.broadcast %101 : vector<2x25x1xf32> to vector<2x25x25xf32>
    %103 = arith.mulf %98, %102 : vector<2x25x25xf32>
    %cst_37 = arith.constant dense<0.000000e+00> : vector<2x25xf32>
    %104 = vector.multi_reduction <add>, %103, %cst_37 [1] : vector<2x25x25xf32> to vector<2x25xf32>
    %105 = vector.shape_cast %104 : vector<2x25xf32> to vector<2x1x25xf32>
    "tpu.trace_start"() <{level = 10 : i32, message = "nqs,nsc->nqc"}> : () -> ()
    %cst_38 = arith.constant dense<0.000000e+00> : vector<2x1x640xf32>
    %106 = tpu.matmul %105, %8, %cst_38 {dimension_numbers = #tpu.dot_dimension_numbers<[2], [1], [1], [2], [0, 0, 0, 1, 1, 2], [0], [0]>} : vector<2x1x25xf32>, vector<2x25x640xf32>, vector<2x1x640xf32> -> vector<2x1x640xf32>
    "tpu.trace_stop"() : () -> ()
    %107 = vector.shape_cast %106 : vector<2x1x640xf32> to vector<2x640xf32>
    %cst_39 = arith.constant 4.000000e-02 : f32
    %108 = vector.broadcast %cst_39 : f32 to vector<2x640xf32>
    %109 = arith.mulf %107, %108 : vector<2x640xf32>
    %cst_40 = arith.constant dense<0.000000e+00> : vector<2x640xf32>
    %110 = tpu.matmul %70, %14, %cst_40 {dimension_numbers = #tpu.dot_dimension_numbers<[1], [0], [0], [1], [0, 0, 1, 1], [], []>} : vector<2x25xf32>, vector<25x640xf32>, vector<2x640xf32> -> vector<2x640xf32>
    %cst_41 = arith.constant 4.000000e-02 : f32
    %111 = vector.broadcast %cst_41 : f32 to vector<2x640xf32>
    %112 = arith.mulf %110, %111 : vector<2x640xf32>
    %113 = arith.mulf %109, %112 : vector<2x640xf32>
    %cst_42 = arith.constant dense<0.000000e+00> : vector<2xf32>
    %114 = vector.multi_reduction <add>, %113, %cst_42 [1] : vector<2x640xf32> to vector<2xf32>
    %115 = vector.shape_cast %114 : vector<2xf32> to vector<2x1xf32>
    %116 = arith.mulf %109, %109 : vector<2x640xf32>
    %cst_43 = arith.constant dense<0.000000e+00> : vector<2xf32>
    %117 = vector.multi_reduction <add>, %116, %cst_43 [1] : vector<2x640xf32> to vector<2xf32>
    %118 = vector.shape_cast %117 : vector<2xf32> to vector<2x1xf32>
    %119 = math.sqrt %118 : vector<2x1xf32>
    %120 = arith.mulf %112, %112 : vector<2x640xf32>
    %cst_44 = arith.constant dense<0.000000e+00> : vector<2xf32>
    %121 = vector.multi_reduction <add>, %120, %cst_44 [1] : vector<2x640xf32> to vector<2xf32>
    %122 = vector.shape_cast %121 : vector<2xf32> to vector<2x1xf32>
    %123 = math.sqrt %122 : vector<2x1xf32>
    %cst_45 = arith.constant 9.99999993E-9 : f32
    %124 = vector.broadcast %cst_45 : f32 to vector<2x1xf32>
    %125 = arith.maximumf %119, %124 : vector<2x1xf32>
    %cst_46 = arith.constant 9.99999993E-9 : f32
    %126 = vector.broadcast %cst_46 : f32 to vector<2x1xf32>
    %127 = arith.maximumf %123, %126 : vector<2x1xf32>
    %128 = arith.mulf %125, %127 : vector<2x1xf32>
    %129 = arith.divf %115, %128 : vector<2x1xf32>
    %cst_47 = arith.constant 5.000000e+00 : f32
    %130 = vector.broadcast %cst_47 : f32 to vector<2x1xf32>
    %131 = arith.mulf %129, %130 : vector<2x1xf32>
    %c0_48 = arith.constant 0 : index
    %c0_49 = arith.constant 0 : index
    %c0_50 = arith.constant 0 : index
    %132 = vector.load %arg6[%c0_48, %c0_49, %c0_50] : memref<1x2x1xf32, #tpu.memory_space<vmem>>, vector<1x2x1xf32>
    %133 = vector.shape_cast %132 : vector<1x2x1xf32> to vector<2x1xf32>
    %134 = vector.shape_cast %131 : vector<2x1xf32> to vector<1x2x1xf32>
    tpu.vector_store %arg6[%c0_48, %c0_49, %c0_50], %134 {strides = array<i32>} : memref<1x2x1xf32, #tpu.memory_space<vmem>>, vector<1x2x1xf32>,
    return
  }
  func.func @transform_0(%arg0: i32) -> (i32, i32, i32) {
    %c0_i32 = arith.constant 0 : i32
    %c0_i32_0 = arith.constant 0 : i32
    %c0_i32_1 = arith.constant 0 : i32
    %c0_i32_2 = arith.constant 0 : i32
    return %c0_i32, %c0_i32_0, %c0_i32_1 : i32, i32, i32
  }
  func.func @transform_1(%arg0: i32) -> (i32, i32, i32) {
    %c0_i32 = arith.constant 0 : i32
    %c0_i32_0 = arith.constant 0 : i32
    %c0_i32_1 = arith.constant 0 : i32
    return %arg0, %c0_i32, %c0_i32_0 : i32, i32, i32
  }
  func.func @transform_2(%arg0: i32) -> (i32, i32) {
    %c0_i32 = arith.constant 0 : i32
    %c0_i32_0 = arith.constant 0 : i32
    %c0_i32_1 = arith.constant 0 : i32
    return %c0_i32, %c0_i32_0 : i32, i32
  }
  func.func @transform_3(%arg0: i32) -> (i32, i32) {
    %c0_i32 = arith.constant 0 : i32
    %c0_i32_0 = arith.constant 0 : i32
    %c0_i32_1 = arith.constant 0 : i32
    return %c0_i32, %c0_i32_0 : i32, i32
  }
  func.func @transform_4(%arg0: i32) -> (i32, i32) {
    %c0_i32 = arith.constant 0 : i32
    %c0_i32_0 = arith.constant 0 : i32
    %c0_i32_1 = arith.constant 0 : i32
    return %c0_i32, %c0_i32_0 : i32, i32
  }
  func.func @transform_5(%arg0: i32) -> (i32, i32, i32) {
    %c0_i32 = arith.constant 0 : i32
    %c0_i32_0 = arith.constant 0 : i32
    %c0_i32_1 = arith.constant 0 : i32
    return %arg0, %c0_i32, %c0_i32_0 : i32, i32, i32
  }
}

</mosaic_0001>

<bundles_post_ra>
// kernel: renet_cca.1
= control target key start
LH: loop header
LB: loop body
LE: loop exit
PB: predicated region body
PF: predicated region fallthrough
CT: control target
= control target key end

     0   :  { %s8573_s18 = smov 0   ;;  %s12048_s0 = inlined_call_operand.vmem [shape: f32[2,25,640], index: 0, kind: input, shape index: {}]   ;;  %s12049_s1 = inlined_call_operand.vmem [shape: f32[3,25,640], index: 1, kind: input, shape index: {}]   ;;  %s12050_s2 = inlined_call_operand.vmem [shape: f32[640,128], index: 2, kind: input, shape index: {}]   ;;  %s12051_s3 = inlined_call_operand.vmem [shape: f32[1,128], index: 3, kind: input, shape index: {}]   ;;  %s12052_s4 = inlined_call_operand.vmem [shape: f32[1,128], index: 4, kind: input, shape index: {}]   ;;  %s12053_s5 = inlined_call_operand.vmem [shape: f32[3,2,1], index: 5, kind: output, shape index: {}]  }
   0x1 LB: > { %s7739_s19 = sadd.s32 4294967295, %s8535_s18   ;;  %p7743_p0 = scmp.ge.s32.totalorder %s8535_s18, 1  ;;  %s8535_s18 = sphi %s8573_s18, %s15_s18  }
   0x2   : > { %p187_p1 = scmp.lt.s32.totalorder %s8535_s18, 4 }
   0x4   : > { %p188_p2 = pnand %p7743_p0, %p187_p1 }
   0x6   : > { %191 = sbr.rel (%p188_p2) target bundleno = 2181 (0x885), region = 40 }
   0xd   : > { %v8584_v0 = vld [vmem:[%s12048_s0 + $0x50] sm:$0xff]  ;;  %v8589_v1 = vld [vmem:[%s12048_s0 + $0x58] sm:$0xff]  ;;  %v8594_v2 = vld [vmem:[%s12048_s0 + $0x60] sm:$0xff]  ;;  %p214_p3 = scmp.lt.s32.totalorder %s7739_s19, 2  ;;  %vm302_vm0 = vcmask 1040384   ;;  %vm2062_vm1 = vcmask 1041408  }
   0xe   : > { %v296_v3 = vadd.f32 %v8589_v1, %v8584_v0  ;;  %v8601_v4 = vld [vmem:[%s12048_s0] sm:$0xff]  ;;  %v8606_v5 = vld [vmem:[%s12048_s0 + $0x68] sm:$0xff]  ;;  %v8616_v7 = vld [vmem:[%s12048_s0 + $0x10] sm:$0xff]  ;;  %vm2620_vm2 = vcmask 1042432   ;;  %vm2662_vm3 = vcmask 1046528   ;;  %vm8538_vm4 = vmmov 1  }
   0xf   : > { %v8611_v6 = vld [vmem:[%s12048_s0 + $0x8] sm:$0xff]  ;;  %v8621_v8 = vld [vmem:[%s12048_s0 + $0x70] sm:$0xff]  ;;  %v8629_v11 = vld [vmem:[%s12048_s0 + $0xa0] sm:$0xff]  ;;  %s12654_s19 = smov (!%p214_p3, %s7739_s19), 2  ;;  %s8539_s22 = smov 103   ;;  %vm3484_vm6 = vcmask 203776  }
  0x10   : > { %v297_v9 = vadd.f32 %v296_v3, %v8594_v2  ;;  %v284_v10 = vadd.f32 %v8611_v6, %v8601_v4  ;;  %v8634_v12 = vld [vmem:[%s12048_s0 + $0xa8] sm:$0xff]  ;;  %v8641_v13 = vld [vmem:[%s12048_s0 + $0x18] sm:$0xff]  ;;  %v8646_v14 = vld [vmem:[%s12048_s0 + $0xb0] sm:$0xff]  ;;  %s8288_s16 = smul.u32 160, %s12654_s19  ;;  %vm3494_vm7 = vcmask 196608   ;;  %vm8542_vm8 = vmmov 0  }
  0x11   : > { %v8651_v15 = vld [vmem:[%s12048_s0 + $0xb8] sm:$0xff]  ;;  %v314_v16 = vadd.f32 %v8634_v12, %v8629_v11  ;;  %v8660_v19 = vld [vmem:[%s12048_s0 + $0x28] sm:$0xff]  ;;  %v8665_v20 = vld [vmem:[%s12048_s0 + $0x30] sm:$0xff]  ;;  %vm7305_vm9 = vcmask 1041409   ;;  %s7745_s24 = sshll.u32 %s12654_s19, 1  ;;  %vm7684_vm14 = vcmask 1024  }
  0x12   : > { %v298_v17 = vadd.f32 %v297_v9, %v8606_v5  ;;  %v285_v18 = vadd.f32 %v284_v10, %v8616_v7  ;;  %v8670_v21 = vld [vmem:[%s12048_s0 + $0x38] sm:$0xff]  ;;  %v8675_v22 = vld [vmem:[%s12048_s0 + $0x20] sm:$0xff]  ;;  %v290_v25 = vadd.f32 %v8665_v20, %v8660_v19  ;;  %v8688_v26 = vld [vmem:[%s12048_s0 + $0xc8] sm:$0xff]  ;;  %s8787_s23 = scalar_lea.vmem %s12049_s1, %s8288_s16  ;;  %s222_s27 = scalar_lea.vmem %s12053_s5, %s7745_s24 }
  0x13   : > { %v8680_v23 = vld [vmem:[%s12048_s0 + $0xc0] sm:$0xff]  ;;  %v315_v24 = vadd.f32 %v314_v16, %v8646_v14  ;;  %v8700_v30 = vld [vmem:[%s12048_s0 + $0xd0] sm:$0xff]  ;;  %v8705_v31 = vld [vmem:[%s12048_s0 + $0xd8] sm:$0xff] }
  0x14   : > { %v299_v27 = vadd.f32 %v298_v17, %v8621_v8  ;;  %v286_v28 = vadd.f32 %v285_v18, %v8641_v13  ;;  %v8695_v29 = vld [vmem:[%s12048_s0 + $0x40] sm:$0xff]  ;;  %v8712_v33 = vld [vmem:[%s12048_s0 + $0x48] sm:$0xff]  ;;  %v291_v34 = vadd.f32 %v290_v25, %v8670_v21  ;;  %v320_v35 = vadd.f32 %v8700_v30, %v8688_v26  ;;  %v8720_v36 = vld [vmem:[%s12048_s0 + $0x78] sm:$0x1] }
  0x15   : > { %v316_v32 = vadd.f32 %v315_v24, %v8651_v15  ;;  %v8725_v37 = vld [vmem:[%s12048_s0 + $0x80] sm:$0x1]  ;;  %v8736_v40 = vld [vmem:[%s12048_s0 + $0x88] sm:$0x1]  ;;  %v8741_v41 = vld [vmem:[%s12048_s0 + $0x90] sm:$0x1] }
  0x16   : > { %300 = vadd.xlane.f32.xlu1 %v299_v27  ;;  %v287_v38 = vadd.f32 %v286_v28, %v8675_v22  ;;  %v8731_v39 = vld [vmem:[%s12048_s0 + $0xe0] sm:$0xff]  ;;  %v292_v43 = vadd.f32 %v291_v34, %v8695_v29  ;;  %v321_v44 = vadd.f32 %v320_v35, %v8705_v31  ;;  %v8749_v45 = vld [vmem:[%s12048_s0 + $0x98] sm:$0x1]  ;;  %v303_v46 = vsel %vm302_vm0, %v8720_v36, 0.0  ;;  %v8756_v47 = vld [vmem:[%s12048_s0 + $0xf0] sm:$0xff] }
  0x17   : > { %v317_v42 = vadd.f32 %v316_v32, %v8680_v23  ;;  %v8761_v48 = vld [vmem:[%s12048_s0 + $0xf8] sm:$0xff]  ;;  %v8766_v49 = vld [vmem:[%s12048_s0 + $0xe8] sm:$0xff]  ;;  %v304_v50 = vsel %vm302_vm0, %v8725_v37, 0.0  ;;  %v306_v51 = vsel %vm302_vm0, %v8736_v40, 0.0  ;;  %v308_v52 = vsel %vm302_vm0, %v8741_v41, 0.0  ;;  %v8777_v53 = vld [vmem:[%s12048_s0 + $0x100] sm:$0xff] }
  0x18   : > { %288 = vadd.xlane.f32.xlu0 %v287_v38  ;;  %v8782_v54 = vld [vmem:[%s12048_s0 + $0x108] sm:$0xff]  ;;  %v293_v55 = vadd.f32 %v292_v43, %v8712_v33  ;;  %v322_v56 = vadd.f32 %v321_v44, %v8731_v39  ;;  %v305_v57 = vadd.f32 %v304_v50, %v303_v46  ;;  %v326_v58 = vadd.f32 %v8761_v48, %v8756_v47  ;;  %v8796_v59 = vld [vmem:[%s12048_s0 + $0x118] sm:$0x1]  ;;  %v8801_v60 = vld [vmem:[%s12048_s0 + $0x120] sm:$0x1] }
  0x19   : > { %12239 = vst [vmem:[#allocation2_spill] sm:$0xff] %v8801_v60  ;;  %v8806_v61 = vld [vmem:[%s12048_s0 + $0x128] sm:$0x1]  ;;  %v8811_v62 = vld [vmem:[%s12048_s0 + $0x130] sm:$0x1]  ;;  %v332_v3 = vsel %vm302_vm0, %v8796_v59, 0.0  ;;  %vm10024_vm5 = vmpackc.low %vm302_vm0, %vm8538_vm4 }
  0x1a   : > { %12240 = vst [vmem:[#allocation3_spill] sm:$0xff] %v8806_v61  ;;  %318 = vadd.xlane.f32.xlu1 %v317_v42  ;;  %12241 = vst [vmem:[#allocation4_spill] sm:$0xff] %v8811_v62  ;;  %v8816_v63 = vld [vmem:[%s12048_s0 + $0x138] sm:$0x1]  ;;  %v333_v9 = vsel %vm302_vm0, %v8801_v60, 0.0  ;;  %v323_v10 = vadd.f32 %v322_v56, %v8766_v49  ;;  %v307_v16 = vadd.f32 %v306_v51, %v305_v57  ;;  %v264_v24 = vld [vmem:[%s8787_s23] sm:$0xff] }
  0x1b   : > { %12242 = vst [vmem:[#allocation5_spill] sm:$0xff] %v8816_v63  ;;  %v327_v17 = vadd.f32 %v326_v58, %v8777_v53  ;;  %v334_v18 = vadd.f32 %v333_v9, %v332_v3  ;;  %v265_v25 = vld [vmem:[%s8787_s23 + $0x8] sm:$0xff]  ;;  %v266_v27 = vld [vmem:[%s8787_s23 + $0x10] sm:$0xff]  ;;  %v310_v28 = vsel %vm302_vm0, %v8749_v45, 0.0  ;;  %v335_v34 = vsel %vm302_vm0, %v8806_v61, 0.0  ;;  %v267_v50 = vld [vmem:[%s8787_s23 + $0x18] sm:$0xff] }
  0x1c   : > { %294 = vadd.xlane.f32.xlu0 %v293_v55  ;;  %v8832_v32 = vld [vmem:[%s12048_s0 + $0x110] sm:$0xff]  ;;  %v337_v35 = vsel %vm302_vm0, %v8811_v62, 0.0  ;;  %v392_v38 = vadd.f32 %v265_v25, %v264_v24  ;;  %v269_v42 = vld [vmem:[%s8787_s23 + $0x28] sm:$0xff]  ;;  %v309_v43 = vadd.f32 %v308_v52, %v307_v16  ;;  %v271_v55 = vld [vmem:[%s8787_s23 + $0x38] sm:$0xff]  ;;  %v339_v56 = vsel %vm302_vm0, %v8816_v63, 0.0 }
  0x1d   : > { %v328_v44 = vadd.f32 %v327_v17, %v8782_v54  ;;  %v336_v46 = vadd.f32 %v335_v34, %v334_v18  ;;  %v270_v51 = vld [vmem:[%s8787_s23 + $0x30] sm:$0xff]  ;;  %v275_v52 = vld [vmem:[%s8787_s23 + $0x58] sm:$0xff]  ;;  %v272_v17 = vld [vmem:[%s8787_s23 + $0x40] sm:$0xff] }
  0x1e   : > { %324 = vadd.xlane.f32.xlu1 %v323_v10  ;;  %v393_v57 = vadd.f32 %v392_v38, %v266_v27  ;;  %v398_v58 = vadd.f32 %v270_v51, %v269_v42  ;;  %v274_v3 = vld [vmem:[%s8787_s23 + $0x50] sm:$0xff]  ;;  %v311_v9 = vadd.f32 %v310_v28, %v309_v43  ;;  %v273_v18 = vld [vmem:[%s8787_s23 + $0x48] sm:$0xff]  ;;  %v276_v24 = vld [vmem:[%s8787_s23 + $0x60] sm:$0xff] }
  0x1f   : > { %v338_v16 = vadd.f32 %v337_v35, %v336_v46  ;;  %v404_v25 = vadd.f32 %v275_v52, %v274_v3  ;;  %v329_v10 = vadd.f32 %v328_v44, %v8832_v32  ;;  %v268_v34 = vld [vmem:[%s8787_s23 + $0x20] sm:$0xff]  ;;  %v277_v61 = vld [vmem:[%s8787_s23 + $0x68] sm:$0xff]  ;;  %v279_v27 = vld [vmem:[%s8787_s23 + $0x78] sm:$0x1] }
  0x20   : > { %v394_v62 = vadd.f32 %v393_v57, %v267_v50  ;;  %v399_v63 = vadd.f32 %v398_v58, %v271_v55  ;;  %v280_v38 = vld [vmem:[%s8787_s23 + $0x80] sm:$0x1]  ;;  %v281_v42 = vld [vmem:[%s8787_s23 + $0x88] sm:$0x1]  ;;  %312 = vadd.xlane.f32.xlu0 %v311_v9  ;;  %v282_v28 = vld [vmem:[%s8787_s23 + $0x90] sm:$0x1] }
  0x21   : > { %v340_v51 = vadd.f32 %v339_v56, %v338_v16  ;;  %v405_v60 = vadd.f32 %v404_v25, %v276_v24  ;;  %v283_v35 = vld [vmem:[%s8787_s23 + $0x98] sm:$0x1]  ;;  %v410_v43 = vsel %vm302_vm0, %v279_v27, 0.0  ;;  %v411_v46 = vsel %vm302_vm0, %v280_v38, 0.0  ;;  %v2139_v50 = vld [vmem:[%s12050_s2 + $0x80] sm:$0xff]  ;;  %v2140_v55 = vld [vmem:[%s12050_s2 + $0x88] sm:$0xff] }
  0x22   : > { %v400_v3 = vadd.f32 %v399_v63, %v272_v17  ;;  %v412_v52 = vadd.f32 %v411_v46, %v410_v43  ;;  %v413_v44 = vsel %vm302_vm0, %v281_v42, 0.0  ;;  %v2171_v56 = vld [vmem:[%s12050_s2 + $0x180] sm:$0xff]  ;;  %v415_v57 = vsel %vm302_vm0, %v282_v28, 0.0  ;;  %v2172_v63 = vld [vmem:[%s12050_s2 + $0x188] sm:$0xff]  ;;  %v278_v24 = vld [vmem:[%s8787_s23 + $0x70] sm:$0xff] }
  0x23   : > { %341 = vadd.xlane.f32.xlu1 %v340_v51  ;;  %v8111_v58 = vpack.c.bf16 %v2140_v55, %v2139_v50  ;;  %v2123_v9 = vld [vmem:[%s12050_s2] sm:$0xff]  ;;  %v2124_v16 = vld [vmem:[%s12050_s2 + $0x8] sm:$0xff]  ;;  %v8143_v27 = vpack.c.bf16 %v2172_v63, %v2171_v56  ;;  %v2141_v28 = vld [vmem:[%s12050_s2 + $0x90] sm:$0xff]  ;;  %v395_v43 = vadd.f32 %v394_v62, %v268_v34  ;;  %v406_v46 = vadd.f32 %v405_v60, %v277_v61 }
  0x24   : > { %v401_v17 = vadd.f32 %v400_v3, %v273_v18  ;;  %v414_v25 = vadd.f32 %v413_v44, %v412_v52  ;;  %v8113_v38 = vpack.c.bf16 %v2124_v16, %v2123_v9  ;;  %v2155_v42 = vld [vmem:[%s12050_s2 + $0x100] sm:$0xff]  ;;  %v2156_v51 = vld [vmem:[%s12050_s2 + $0x108] sm:$0xff]  ;;  %330 = vadd.xlane.f32.xlu0 %v329_v10  ;;  %v417_v18 = vsel %vm302_vm0, %v283_v35, 0.0  ;;  %v2142_v52 = vld [vmem:[%s12050_s2 + $0x98] sm:$0xff] }
  0x25   : > { %8112 = vmatprep.subr.bf16.mxu0 %v8111_v58  ;;  %v8145_v3 = vpack.c.bf16 %v2156_v51, %v2155_v42  ;;  %v2173_v44 = vld [vmem:[%s12050_s2 + $0x190] sm:$0xff]  ;;  %v2174_v50 = vld [vmem:[%s12050_s2 + $0x198] sm:$0xff]  ;;  %8144 = vmatprep.subr.bf16.mxu1 %v8143_v27  ;;  %v8115_v60 = vpack.c.bf16 %v2142_v52, %v2141_v28  ;;  %v2144_v58 = vld [vmem:[%s12050_s2 + $0xa8] sm:$0xff] }
  0x26   : > { %v416_v55 = vadd.f32 %v415_v57, %v414_v25  ;;  %8114 = vmatpush3.bf16.msra.mxu0 %v8113_v38  ;;  %v8147_v61 = vpack.c.bf16 %v2174_v50, %v2173_v44  ;;  %v2125_v62 = vld [vmem:[%s12050_s2 + $0x10] sm:$0xff]  ;;  %v2126_v10 = vld [vmem:[%s12050_s2 + $0x18] sm:$0xff]  ;;  %v2143_v57 = vld [vmem:[%s12050_s2 + $0xa0] sm:$0xff]  ;;  %v407_v38 = vadd.f32 %v406_v46, %v278_v24 }
  0x27   : > { %v2157_v34 = vld [vmem:[%s12050_s2 + $0x110] sm:$0xff]  ;;  %402 = vadd.xlane.f32.xlu1 %v401_v17  ;;  %8146 = vmatpush3.bf16.msra.mxu1 %v8145_v3  ;;  %v8117_v35 = vpack.c.bf16 %v2126_v10, %v2125_v62  ;;  %v2158_v56 = vld [vmem:[%s12050_s2 + $0x118] sm:$0xff]  ;;  %v8119_v16 = vpack.c.bf16 %v2144_v58, %v2143_v57  ;;  %v2175_v17 = vld [vmem:[%s12050_s2 + $0x1a0] sm:$0xff] }
  0x28   : > { %v418_v63 = vadd.f32 %v417_v18, %v416_v55  ;;  %8116 = vmatprep.subr.bf16.mxu0 %v8115_v60  ;;  %8148 = vmatprep.subr.bf16.mxu1 %v8147_v61  ;;  %v8149_v9 = vpack.c.bf16 %v2158_v56, %v2157_v34  ;;  %v2176_v25 = vld [vmem:[%s12050_s2 + $0x1a8] sm:$0xff]  ;;  %v2127_v27 = vld [vmem:[%s12050_s2 + $0x20] sm:$0xff]  ;;  %v2146_v24 = vld [vmem:[%s12050_s2 + $0xb8] sm:$0xff] }
  0x29   : > { %396 = vadd.xlane.f32.xlu0 %v395_v43  ;;  %v8151_v42 = vpack.c.bf16 %v2176_v25, %v2175_v17  ;;  %v2128_v51 = vld [vmem:[%s12050_s2 + $0x28] sm:$0xff]  ;;  %v2159_v28 = vld [vmem:[%s12050_s2 + $0x120] sm:$0xff]  ;;  %v2145_v43 = vld [vmem:[%s12050_s2 + $0xb0] sm:$0xff] }
  0x2a   : > { %v2160_v18 = vld [vmem:[%s12050_s2 + $0x128] sm:$0xff]  ;;  %8118 = vmatpush3.bf16.msra.mxu0 %v8117_v35  ;;  %v8121_v3 = vpack.c.bf16 %v2128_v51, %v2127_v27  ;;  %v2177_v46 = vld [vmem:[%s12050_s2 + $0x1b0] sm:$0xff]  ;;  %v8123_v44 = vpack.c.bf16 %v2146_v24, %v2145_v43  ;;  %v2178_v50 = vld [vmem:[%s12050_s2 + $0x1b8] sm:$0xff] }
  0x2b   : > { %419 = vadd.xlane.f32.xlu1 %v418_v63  ;;  %8150 = vmatpush3.bf16.msra.mxu1 %v8149_v9  ;;  %v8153_v52 = vpack.c.bf16 %v2160_v18, %v2159_v28  ;;  %v2129_v55 = vld [vmem:[%s12050_s2 + $0x30] sm:$0xff]  ;;  %v2130_v60 = vld [vmem:[%s12050_s2 + $0x38] sm:$0xff]  ;;  %v8155_v61 = vpack.c.bf16 %v2178_v50, %v2177_v46  ;;  %v2147_v35 = vld [vmem:[%s12050_s2 + $0xc0] sm:$0xff] }
  0x2c   : > { %8120 = vmatprep.subr.bf16.mxu0 %v8119_v16  ;;  %8152 = vmatprep.subr.bf16.mxu1 %v8151_v42  ;;  %v2161_v62 = vld [vmem:[%s12050_s2 + $0x130] sm:$0xff]  ;;  %v2162_v10 = vld [vmem:[%s12050_s2 + $0x138] sm:$0xff]  ;;  %v8125_v34 = vpack.c.bf16 %v2130_v60, %v2129_v55  ;;  %v2148_v56 = vld [vmem:[%s12050_s2 + $0xc8] sm:$0xff] }
  0x2d   : > { %408 = vadd.xlane.f32.xlu0 %v407_v38  ;;  %v2179_v57 = vld [vmem:[%s12050_s2 + $0x1c0] sm:$0xff]  ;;  %v8157_v58 = vpack.c.bf16 %v2162_v10, %v2161_v62  ;;  %v8127_v63 = vpack.c.bf16 %v2148_v56, %v2147_v35  ;;  %v2180_v9 = vld [vmem:[%s12050_s2 + $0x1c8] sm:$0xff]  ;;  %v2149_v28 = vld [vmem:[%s12050_s2 + $0xd0] sm:$0xff] }
  0x2e   : > { %8122 = vmatpush3.bf16.msra.mxu0 %v8121_v3  ;;  %v8159_v16 = vpack.c.bf16 %v2180_v9, %v2179_v57  ;;  %v2131_v17 = vld [vmem:[%s12050_s2 + $0x40] sm:$0xff]  ;;  %v2132_v25 = vld [vmem:[%s12050_s2 + $0x48] sm:$0xff]  ;;  %v2150_v18 = vld [vmem:[%s12050_s2 + $0xd8] sm:$0xff] }
  0x2f   : > { %8154 = vmatpush3.bf16.msra.mxu1 %v8153_v52  ;;  %8124 = vmatprep.subr.bf16.mxu0 %v8123_v44  ;;  %v2163_v27 = vld [vmem:[%s12050_s2 + $0x140] sm:$0xff]  ;;  %v8129_v38 = vpack.c.bf16 %v2132_v25, %v2131_v17  ;;  %v2164_v42 = vld [vmem:[%s12050_s2 + $0x148] sm:$0xff]  ;;  %v2181_v3 = vld [vmem:[%s12050_s2 + $0x1d0] sm:$0xff]  ;;  %v8131_v43 = vpack.c.bf16 %v2150_v18, %v2149_v28 }
  0x30   : > { %8156 = vmatprep.subr.bf16.mxu1 %v8155_v61  ;;  %v8161_v51 = vpack.c.bf16 %v2164_v42, %v2163_v27  ;;  %v2182_v24 = vld [vmem:[%s12050_s2 + $0x1d8] sm:$0xff]  ;;  %v2133_v46 = vld [vmem:[%s12050_s2 + $0x50] sm:$0xff]  ;;  %v2151_v62 = vld [vmem:[%s12050_s2 + $0xe0] sm:$0xff] }
  0x31   : > { %v2134_v52 = vld [vmem:[%s12050_s2 + $0x58] sm:$0xff]  ;;  %v8163_v44 = vpack.c.bf16 %v2182_v24, %v2181_v3  ;;  %v2165_v55 = vld [vmem:[%s12050_s2 + $0x150] sm:$0xff]  ;;  %v2152_v10 = vld [vmem:[%s12050_s2 + $0xe8] sm:$0xff] }
  0x32   : > { %8126 = vmatpush3.bf16.msra.mxu0 %v8125_v34  ;;  %v8133_v50 = vpack.c.bf16 %v2134_v52, %v2133_v46  ;;  %v2166_v60 = vld [vmem:[%s12050_s2 + $0x158] sm:$0xff]  ;;  %v2183_v34 = vld [vmem:[%s12050_s2 + $0x1e0] sm:$0xff]  ;;  %v8135_v35 = vpack.c.bf16 %v2152_v10, %v2151_v62  ;;  %v2184_v56 = vld [vmem:[%s12050_s2 + $0x1e8] sm:$0xff]  ;;  %v493_v10 = vlaneseq }
  0x33   : > { %8158 = vmatpush3.bf16.msra.mxu1 %v8157_v58  ;;  %8128 = vmatprep.subr.bf16.mxu0 %v8127_v63  ;;  %v8165_v61 = vpack.c.bf16 %v2166_v60, %v2165_v55  ;;  %v2135_v57 = vld [vmem:[%s12050_s2 + $0x60] sm:$0xff]  ;;  %v2136_v58 = vld [vmem:[%s12050_s2 + $0x68] sm:$0xff]  ;;  %v8167_v63 = vpack.c.bf16 %v2184_v56, %v2183_v34  ;;  %v2153_v27 = vld [vmem:[%s12050_s2 + $0xf0] sm:$0xff] }
  0x34   : > { %8160 = vmatprep.subr.bf16.mxu1 %v8159_v16  ;;  %v8137_v9 = vpack.c.bf16 %v2136_v58, %v2135_v57  ;;  %v2167_v16 = vld [vmem:[%s12050_s2 + $0x160] sm:$0xff]  ;;  %v2168_v17 = vld [vmem:[%s12050_s2 + $0x168] sm:$0xff]  ;;  %v2185_v42 = vld [vmem:[%s12050_s2 + $0x1f0] sm:$0xff]  ;;  %v9068_v56 = vshrl.u32 %v493_v10, 7 }
  0x35   : > { %v8169_v25 = vpack.c.bf16 %v2168_v17, %v2167_v16  ;;  %v2186_v28 = vld [vmem:[%s12050_s2 + $0x1f8] sm:$0xff]  ;;  %v2137_v18 = vld [vmem:[%s12050_s2 + $0x70] sm:$0xff]  ;;  %v2188_v55 = vld [vmem:[%s12050_s2 + $0x208] sm:$0xff] }
  0x36   : > { %8130 = vmatpush3.bf16.msra.mxu0 %v8129_v38  ;;  %v2154_v38 = vld [vmem:[%s12050_s2 + $0xf8] sm:$0xff]  ;;  %v2169_v46 = vld [vmem:[%s12050_s2 + $0x170] sm:$0xff]  ;;  %12243 = vst [vmem:[#allocation6_spill] sm:$0xff] %v9068_v56  ;;  %v2191_v58 = vld [vmem:[%s12050_s2 + $0x220] sm:$0xff] }
  0x37   : > { %8162 = vmatpush3.bf16.msra.mxu1 %v8161_v51  ;;  %8132 = vmatprep.subr.bf16.mxu0 %v8131_v43  ;;  %v8139_v51 = vpack.c.bf16 %v2154_v38, %v2153_v27  ;;  %v2138_v3 = vld [vmem:[%s12050_s2 + $0x78] sm:$0xff]  ;;  %v8171_v43 = vpack.c.bf16 %v2186_v28, %v2185_v42  ;;  %v2189_v34 = vld [vmem:[%s12050_s2 + $0x210] sm:$0xff]  ;;  %v2195_v17 = vld [vmem:[%s12050_s2 + $0x240] sm:$0xff] }
  0x38   : > { %8164 = vmatprep.subr.bf16.mxu1 %v8163_v44  ;;  %v8141_v24 = vpack.c.bf16 %v2138_v3, %v2137_v18  ;;  %v2170_v52 = vld [vmem:[%s12050_s2 + $0x178] sm:$0xff]  ;;  %v2197_v27 = vld [vmem:[%s12050_s2 + $0x250] sm:$0xff] }
  0x39   : > { %v8173_v44 = vpack.c.bf16 %v2170_v52, %v2169_v46  ;;  %v2190_v57 = vld [vmem:[%s12050_s2 + $0x218] sm:$0xff] }
  0x3a   : > { %8134 = vmatpush3.bf16.msra.mxu0 %v8133_v50  ;;  %v2187_v50 = vld [vmem:[%s12050_s2 + $0x200] sm:$0xff]  ;;  %v2194_v16 = vld [vmem:[%s12050_s2 + $0x238] sm:$0xff]  ;;  %v9103_v3 = vpack.c.bf16 %v2190_v57, %v2189_v34 }
  0x3b   : > { %8166 = vmatpush3.bf16.msra.mxu1 %v8165_v61  ;;  %8136 = vmatprep.subr.bf16.mxu0 %v8135_v35  ;;  %v9062_v60 = vpack.c.bf16 %v2188_v55, %v2187_v50  ;;  %v8537_v61 = vmov 1966171168   ;;  %v2198_v38 = vld [vmem:[%s12050_s2 + $0x258] sm:$0xff] }
  0x3c   : > { %8168 = vmatprep.subr.bf16.mxu1 %v8167_v63  ;;  %v491_v62 = vunpack.c.l.s4 %v8537_v61  ;;  %v2192_v63 = vld [vmem:[%s12050_s2 + $0x228] sm:$0xff]  ;;  %v2202_v46 = vld [vmem:[%s12050_s2 + $0x278] sm:$0xff]  ;;  %v9120_v61 = vpack.c.bf16 %v2198_v38, %v2197_v27 }
  0x3e   : > { %8138 = vmatpush3.bf16.msra.mxu0 %v8137_v9  ;;  %v492_v35 = vunpack.c.0.s8 %v491_v62  ;;  %v2193_v9 = vld [vmem:[%s12050_s2 + $0x230] sm:$0xff] }
  0x3f   : > { %8170 = vmatpush3.bf16.msra.mxu1 %v8169_v25  ;;  %8140 = vmatprep.subr.bf16.mxu0 %v8139_v51  ;;  %v2196_v25 = vld [vmem:[%s12050_s2 + $0x248] sm:$0xff]  ;;  %v2199_v51 = vld [vmem:[%s12050_s2 + $0x260] sm:$0xff]  ;;  %v9116_v50 = vpack.c.bf16 %v2194_v16, %v2193_v9 }
  0x40   : > { %8172 = vmatprep.subr.bf16.mxu1 %v8171_v43  ;;  %v9101_v18 = vsub.s32 %v492_v35, %v9068_v56  ;;  %v2200_v43 = vld [vmem:[%s12050_s2 + $0x268] sm:$0xff]  ;;  %v9118_v55 = vpack.c.bf16 %v2196_v25, %v2195_v17 }
  0x41   : > { %v9137_v9 = vpack.c.bf16 %v2200_v43, %v2199_v51 }
  0x42   : > { %8142 = vmatpush3.bf16.msra.mxu0 %v8141_v24  ;;  %v2201_v24 = vld [vmem:[%s12050_s2 + $0x270] sm:$0xff] }
  0x43   : > { %8174 = vmatpush3.bf16.msra.mxu1 %v8173_v44  ;;  %8176 = vmatprep.subr.bf16.mxu0 %v9062_v60  ;;  %v9114_v44 = vpack.c.bf16 %v2192_v63, %v2191_v58  ;;  %v9139_v16 = vpack.c.bf16 %v2202_v46, %v2201_v24 }
  0xa3   : > { %v301_v42 = vpop.xlane.xlu1 %300 }
  0xa4   : > { %v346_v28 = vmul.f32 0.0015625, %v301_v42 }
  0xa5   : > { %v289_v52 = vpop.xlane.xlu0 %288 }
  0xa6   : > { %v9123_v62 = vsub.f32 %v8584_v0, %v346_v28  ;;  %v9126_v10 = vsub.f32 %v8589_v1, %v346_v28  ;;  %v9129_v34 = vsub.f32 %v8594_v2, %v346_v28  ;;  %v9132_v35 = vsub.f32 %v8606_v5, %v346_v28 }
  0xa7   : > { %v9135_v57 = vsub.f32 %v8621_v8, %v346_v28  ;;  %v344_v58 = vmul.f32 0.0015625, %v289_v52  ;;  %v319_v63 = vpop.xlane.xlu1 %318 }
  0xa8   : > { %12244 = vst [vmem:[#allocation7_spill] sm:$0xff] %v9123_v62  ;;  %12245 = vst [vmem:[#allocation8_spill] sm:$0xff] %v9126_v10  ;;  %v719_v0 = vcombine.low %v9123_v62, %v9126_v10  ;;  %v720_v1 = vcombine.high %v9123_v62, %v9126_v10  ;;  %v348_v28 = vmul.f32 0.0015625, %v319_v63 }
  0xa9   : > { %12246 = vst [vmem:[#allocation9_spill] sm:$0xff] %v9129_v34  ;;  %12247 = vst [vmem:[#allocation10_spill] sm:$0xff] %v9132_v35  ;;  %v9152_v17 = vsub.f32 %v8601_v4, %v344_v58  ;;  %v9155_v25 = vsub.f32 %v8611_v6, %v344_v58  ;;  %v9158_v27 = vsub.f32 %v8616_v7, %v344_v58  ;;  %v295_v38 = vpop.xlane.xlu0 %294 }
  0xaa   : > { %12248 = vst [vmem:[#allocation11_spill] sm:$0xff] %v9135_v57  ;;  %v9161_v42 = vsub.f32 %v8641_v13, %v344_v58  ;;  %v9164_v51 = vsub.f32 %v8675_v22, %v344_v58  ;;  %v345_v43 = vmul.f32 0.0015625, %v295_v38  ;;  %v9171_v6 = vrot.slane %v719_v0, %v9101_v18 }
  0xab   : > { %12249 = vst [vmem:[#allocation12_spill] sm:$0xff] %v9152_v17  ;;  %12250 = vst [vmem:[#allocation13_spill] sm:$0xff] %v9155_v25  ;;  %v9174_v7 = vrot.slane %v720_v1, %v9101_v18  ;;  %v9179_v22 = vsub.f32 %v8629_v11, %v348_v28  ;;  %v9182_v46 = vsub.f32 %v8634_v12, %v348_v28  ;;  %v325_v58 = vpop.xlane.xlu1 %324 }
  0xac   : > { %12251 = vst [vmem:[#allocation14_spill] sm:$0xff] %v9158_v27  ;;  %12252 = vst [vmem:[#allocation15_spill] sm:$0xff] %v9161_v42  ;;  %v9185_v52 = vsub.f32 %v8646_v14, %v348_v28  ;;  %v9188_v63 = vsub.f32 %v8651_v15, %v348_v28  ;;  %v9191_v0 = vsub.f32 %v8680_v23, %v348_v28 }
  0xad   : > { %12253 = vst [vmem:[#allocation16_spill] sm:$0xff] %v9164_v51  ;;  %12254 = vst [vmem:[#allocation17_spill] sm:$0xff] %v9179_v22  ;;  %v9194_v1 = vsub.f32 %v8660_v19, %v345_v43  ;;  %v9197_v38 = vsub.f32 %v8665_v20, %v345_v43  ;;  %v876_v12 = vcombine.high %v9179_v22, %v9182_v46  ;;  %v313_v23 = vpop.xlane.xlu0 %312 }
  0xae   : > { %12255 = vst [vmem:[#allocation18_spill] sm:$0xff] %v9182_v46  ;;  %12256 = vst [vmem:[#allocation19_spill] sm:$0xff] %v9185_v52  ;;  %v9204_v14 = vsub.f32 %v8670_v21, %v345_v43  ;;  %v9207_v15 = vsub.f32 %v8695_v29, %v345_v43  ;;  %v878_v20 = vcombine.high %v9185_v52, %v9188_v63  ;;  %v347_v24 = vmul.f32 0.0015625, %v313_v23 }
  0xaf   : > { %12257 = vst [vmem:[#allocation20_spill] sm:$0xff] %v9188_v63  ;;  %12258 = vst [vmem:[#allocation21_spill] sm:$0xff] %v9191_v0  ;;  %v879_v28 = vcombine.high %v9191_v0, %v9191_v0  ;;  %v9217_v8 = vrot.slane %v9191_v0, %v9101_v18  ;;  %v9220_v21 = vrot.slane %v876_v12, %v9101_v18 }
  0xb0   : > { %12259 = vst [vmem:[#allocation22_spill] sm:$0xff] %v9194_v1  ;;  %12260 = vst [vmem:[#allocation23_spill] sm:$0xff] %v9197_v38  ;;  %v9223_v29 = vsub.f32 %v8712_v33, %v345_v43  ;;  %v342_v11 = vpop.xlane.xlu1 %341  ;;  %v9230_v5 = vrot.slane %v878_v20, %v9101_v18  ;;  %v349_v20 = vmul.f32 0.0015625, %v325_v58  ;;  %v487_v12 = vcombine.low %v9158_v27, %v9161_v42 }
  0xb1   : > { %12261 = vst [vmem:[#allocation24_spill] sm:$0xff] %v9204_v14  ;;  %12262 = vst [vmem:[#allocation25_spill] sm:$0xff] %v9207_v15  ;;  %v9233_v2 = vrot.slane %v879_v28, %v9101_v18  ;;  %v331_v4 = vpop.xlane.xlu0 %330  ;;  %v351_v0 = vmul.f32 0.0015625, %v342_v11 }
  0xb2   : > { %12263 = vst [vmem:[#allocation26_spill] sm:$0xff] %v9223_v29  ;;  %v606_v13 = vcombine.high %v9223_v29, %v9223_v29  ;;  %v641_v19 = vrot.slane %v9223_v29, %v9101_v18  ;;  %v350_v28 = vmul.f32 0.0015625, %v331_v4  ;;  %v9254_v62 = vsub.f32 %v8688_v26, %v349_v20 }
  0xb3   : > { %v9257_v29 = vsub.f32 %v8700_v30, %v349_v20  ;;  %v9260_v58 = vsub.f32 %v8705_v31, %v349_v20  ;;  %v9263_v4 = vsub.f32 %v8731_v39, %v349_v20  ;;  %v9266_v11 = vsub.f32 %v8766_v49, %v349_v20 }
  0xb4   : > { %v9248_v56 = vrot.slane %v606_v13, %v9101_v18  ;;  %v653_v33 = vcombine.high %v641_v19, %v641_v19  ;;  %v9251_v43 = vrot.slane %v641_v19, %v9101_v18  ;;  %12264 = vst [vmem:[#allocation27_spill] sm:$0xff] %v9254_v62  ;;  %v9278_v30 = vsub.f32 %v8720_v36, %v347_v24 }
  0xb5   : > { %12265 = vst [vmem:[#allocation28_spill] sm:$0xff] %v9257_v29  ;;  %12266 = vst [vmem:[#allocation29_spill] sm:$0xff] %v9260_v58  ;;  %v992_v31 = vcombine.low %v9254_v62, %v9257_v29  ;;  %v993_v39 = vcombine.high %v9254_v62, %v9257_v29  ;;  %v994_v49 = vcombine.low %v9260_v58, %v9263_v4 }
  0xb6   : > { %12267 = vst [vmem:[#allocation30_spill] sm:$0xff] %v9263_v4  ;;  %12268 = vst [vmem:[#allocation31_spill] sm:$0xff] %v9266_v11  ;;  %v9272_v23 = vrot.slane %v9248_v56, %v9101_v18  ;;  %v9275_v26 = vrot.slane %v653_v33, %v9101_v18  ;;  %v995_v19 = vcombine.high %v9260_v58, %v9263_v4 }
  0xb7   : > { %12270 = vst [vmem:[#allocation33_spill] sm:$0xff] %v9278_v30  ;;  %v996_v20 = vcombine.high %v9266_v11, %v9266_v11  ;;  %v9292_v33 = vrot.slane %v9266_v11, %v9101_v18  ;;  %v9295_v36 = vsub.f32 %v8725_v37, %v347_v24  ;;  %v9298_v13 = vsub.f32 %v8736_v40, %v347_v24 }
  0xb8   : > { %12269 = vst [vmem:[#allocation32_spill] sm:$0xff] %v9272_v23  ;;  %v9301_v10 = vrot.slane %v992_v31, %v9101_v18  ;;  %v9304_v62 = vrot.slane %v993_v39, %v9101_v18  ;;  %v9307_v58 = vrot.slane %v994_v49, %v9101_v18  ;;  %v9310_v4 = vrot.slane %v995_v19, %v9101_v18 }
  0xb9   : > { %12271 = vst [vmem:[#allocation34_spill] sm:$0xff] %v9295_v36  ;;  %12272 = vst [vmem:[#allocation35_spill] sm:$0xff] %v9298_v13  ;;  %v9313_v11 = vrot.slane %v996_v20, %v9101_v18  ;;  %v9318_v40 = vsub.f32 %v8741_v41, %v347_v24  ;;  %v9321_v31 = vsub.f32 %v8749_v45, %v347_v24 }
  0xba   : > { %v836_v39 = vcombine.low %v9278_v30, %v9295_v36  ;;  %v9326_v49 = vsub.f32 %v8756_v47, %v350_v28  ;;  %v9329_v19 = vsub.f32 %v8761_v48, %v350_v28  ;;  %v9332_v20 = vsub.f32 %v8777_v53, %v350_v28 }
  0xbb   : > { %12273 = vst [vmem:[#allocation36_spill] sm:$0xff] %v9318_v40  ;;  %12274 = vst [vmem:[#allocation37_spill] sm:$0xff] %v9321_v31  ;;  %v837_v37 = vcombine.low %v9298_v13, %v9318_v40  ;;  %v9339_v45 = vsub.f32 %v8782_v54, %v350_v28  ;;  %v9342_v24 = vsub.f32 %v8832_v32, %v350_v28 }
  0xbc   : > { %12275 = vst [vmem:[#allocation38_spill] sm:$0xff] %v9326_v49  ;;  %12276 = vst [vmem:[#allocation39_spill] sm:$0xff] %v9329_v19  ;;  %v9345_v47 = vrot.slane %v836_v39, %v9101_v18  ;;  %v1109_v48 = vcombine.low %v9326_v49, %v9329_v19  ;;  %v1110_v53 = vcombine.high %v9326_v49, %v9329_v19 }
  0xbd   : > { %12277 = vst [vmem:[#allocation40_spill] sm:$0xff] %v9332_v20  ;;  %12278 = vst [vmem:[#allocation41_spill] sm:$0xff] %v9339_v45  ;;  %v9352_v13 = vsub.f32 %v8796_v59, %v351_v0  ;;  %v9355_v41 = vrot.slane %v837_v37, %v9101_v18  ;;  %v1111_v54 = vcombine.low %v9332_v20, %v9339_v45  ;;  %v12281_v37 = vld [vmem:[#allocation2_spill] sm:$0xff] }
  0xbe   : > { %12279 = vst [vmem:[#allocation42_spill] sm:$0xff] %v9342_v24  ;;  %v1112_v32 = vcombine.high %v9332_v20, %v9339_v45  ;;  %v1113_v28 = vcombine.high %v9342_v24, %v9342_v24  ;;  %v9364_v39 = vrot.slane %v1109_v48, %v9101_v18  ;;  %v9367_v40 = vrot.slane %v1110_v53, %v9101_v18  ;;  %v12283_v48 = vld [vmem:[#allocation3_spill] sm:$0xff] }
  0xbf   : > { %12280 = vst [vmem:[#allocation43_spill] sm:$0xff] %v9352_v13  ;;  %v9371_v59 = vrot.slane %v9342_v24, %v9101_v18  ;;  %v9374_v49 = vsub.f32 %v12281_v37, %v351_v0  ;;  %v9377_v30 = vrot.slane %v1111_v54, %v9101_v18  ;;  %v9386_v19 = vsub.f32 %v12283_v48, %v351_v0  ;;  %v12285_v24 = vld [vmem:[#allocation4_spill] sm:$0xff]  ;;  %v12287_v37 = vld [vmem:[#allocation5_spill] sm:$0xff] }
  0xc0   : > { %v9380_v20 = vrot.slane %v1112_v32, %v9101_v18  ;;  %v9383_v45 = vrot.slane %v1113_v28, %v9101_v18  ;;  %v9391_v36 = vsub.f32 %v12285_v24, %v351_v0  ;;  %v9394_v29 = vsub.f32 %v12287_v37, %v351_v0 }
  0xc1   : > { %12282 = vst [vmem:[#allocation2_spill] sm:$0xff] %v9374_v49  ;;  %12284 = vst [vmem:[#allocation3_spill] sm:$0xff] %v9386_v19  ;;  %v1226_v54 = vcombine.low %v9352_v13, %v9374_v49  ;;  %v488_v32 = vcombine.high %v9158_v27, %v9161_v42  ;;  %v12289_v28 = vcombine.low %v9152_v17, %v9155_v25 }
  0xc2   : > { %12286 = vst [vmem:[#allocation4_spill] sm:$0xff] %v9391_v36  ;;  %12288 = vst [vmem:[#allocation5_spill] sm:$0xff] %v9394_v29  ;;  %v12290_v53 = vcombine.high %v9152_v17, %v9155_v25  ;;  %v510_v31 = vrot.slane %v487_v12, %v9101_v18  ;;  %v1227_v0 = vcombine.low %v9386_v19, %v9391_v36 }
  0xc3   : > { %v496_v48 = vrot.slane %v12289_v28, %v9101_v18  ;;  %v9412_v37 = vrot.slane %v1226_v54, %v9101_v18  ;;  %v12291_v28 = vcombine.low %v9194_v1, %v9197_v38  ;;  %v517_v13 = vrot.slane %v488_v32, %v9101_v18 }
  0xc4   : > { %v503_v24 = vrot.slane %v12290_v53, %v9101_v18  ;;  %v12292_v12 = vcombine.high %v9194_v1, %v9197_v38  ;;  %v9426_v54 = vrot.slane %v1227_v0, %v9101_v18  ;;  %v12293_v27 = vcombine.low %v9204_v14, %v9207_v15 }
  0xc5   : > { %v613_v42 = vrot.slane %v12291_v28, %v9101_v18  ;;  %v532_v49 = vcombine.low %v496_v48, %v510_v31  ;;  %v533_v53 = vcombine.high %v496_v48, %v510_v31  ;;  %v12294_v28 = vcombine.high %v9204_v14, %v9207_v15 }
  0xc6   : > { %v620_v19 = vrot.slane %v12292_v12, %v9101_v18  ;;  %v627_v36 = vrot.slane %v12293_v27, %v9101_v18  ;;  %v12295_v31 = vcombine.low %v9129_v34, %v9132_v35  ;;  %v534_v12 = vcombine.low %v503_v24, %v517_v13 }
  0xc7   : > { %v634_v32 = vrot.slane %v12294_v28, %v9101_v18  ;;  %v535_v1 = vcombine.high %v503_v24, %v517_v13  ;;  %v544_v0 = vrot.slane %v532_v49, %v9101_v18  ;;  %v558_v17 = vrot.slane %v533_v53, %v9101_v18 }
  0xc8   : > { %v9440_v48 = vrot.slane %v12295_v31, %v9101_v18  ;;  %v649_v38 = vcombine.low %v613_v42, %v627_v36  ;;  %v650_v25 = vcombine.high %v613_v42, %v627_v36  ;;  %v551_v57 = vrot.slane %v534_v12, %v9101_v18 }
  0xc9   : > { %v651_v27 = vcombine.low %v620_v19, %v634_v32  ;;  %v652_v29 = vcombine.high %v620_v19, %v634_v32  ;;  %v565_v28 = vrot.slane %v535_v1, %v9101_v18  ;;  %v7746_v14 = vcombine.low %v544_v0, %v558_v17 }
  0xca   : > { %v7748_v15 = vcombine.high %v544_v0, %v558_v17  ;;  %v661_v23 = vrot.slane %v649_v38, %v9101_v18  ;;  %v675_v13 = vrot.slane %v650_v25, %v9101_v18 }
  0xcb   : > { %v668_v31 = vrot.slane %v651_v27, %v9101_v18  ;;  %v682_v49 = vrot.slane %v652_v29, %v9101_v18  ;;  %v7750_v24 = vcombine.low %v551_v57, %v565_v28  ;;  %v7752_v53 = vcombine.high %v551_v57, %v565_v28 }
  0xcc   : > { %v1279_v42 = vrot.slane %v7746_v14, %v9101_v18  ;;  %v1293_v36 = vrot.slane %v7748_v15, %v9101_v18  ;;  %v7754_v19 = vcombine.low %v661_v23, %v675_v13  ;;  %v7756_v32 = vcombine.high %v661_v23, %v675_v13 }
  0xcd   : > { %v7758_v12 = vcombine.low %v668_v31, %v682_v49  ;;  %v7760_v1 = vcombine.high %v668_v31, %v682_v49  ;;  %v1307_v17 = vrot.slane %v7750_v24, %v9101_v18  ;;  %v1321_v38 = vrot.slane %v7752_v53, %v9101_v18 }
  0xce   : > { %v1330_v0 = vcombine.high %v1279_v42, %v1293_v36  ;;  %v1329_v27 = vcombine.low %v1279_v42, %v1293_v36  ;;  %v1396_v25 = vrot.slane %v7754_v19, %v9101_v18  ;;  %v1410_v29 = vrot.slane %v7756_v32, %v9101_v18 }
  0xcf   : > { %v1424_v57 = vrot.slane %v7758_v12, %v9101_v18  ;;  %v1438_v14 = vrot.slane %v7760_v1, %v9101_v18  ;;  %v1333_v28 = vcombine.high %v1307_v17, %v1321_v38  ;;  %v1332_v23 = vcombine.low %v1307_v17, %v1321_v38 }
  0xd0   : > { %v1355_v15 = vrot.slane %v1330_v0, %v9101_v18  ;;  %v1341_v31 = vrot.slane %v1329_v27, %v9101_v18  ;;  %v1447_v13 = vcombine.high %v1396_v25, %v1410_v29  ;;  %v1446_v24 = vcombine.low %v1396_v25, %v1410_v29 }
  0xd1   : > { %v1450_v49 = vcombine.high %v1424_v57, %v1438_v14  ;;  %v1449_v53 = vcombine.low %v1424_v57, %v1438_v14  ;;  %v1376_v42 = vrot.slane %v1333_v28, %v9101_v18  ;;  %v1362_v36 = vrot.slane %v1332_v23, %v9101_v18 }
  0xd2   : > { %v12296_v19 = vcombine.high %v9129_v34, %v9132_v35  ;;  %v766_v12 = vcombine.low %v9171_v6, %v9440_v48  ;;  %v1472_v1 = vrot.slane %v1447_v13, %v9101_v18  ;;  %v1458_v38 = vrot.slane %v1446_v24, %v9101_v18 }
  0xd3   : > { %v1493_v17 = vrot.slane %v1450_v49, %v9101_v18  ;;  %v1479_v0 = vrot.slane %v1449_v53, %v9101_v18  ;;  %v1380_v27 = vcombine.low %v1355_v15, %v1376_v42  ;;  %v1381_v25 = vcombine.high %v1355_v15, %v1376_v42 }
  0xd4   : > { %v751_v32 = vrot.slane %v12296_v19, %v9101_v18  ;;  %v1377_v29 = vcombine.low %v1341_v31, %v1362_v36  ;;  %v1378_v57 = vcombine.high %v1341_v31, %v1362_v36  ;;  %v767_v19 = vcombine.high %v9171_v6, %v9440_v48 }
  0xd5   : > { %v1497_v14 = vcombine.low %v1472_v1, %v1493_v17  ;;  %v1498_v28 = vcombine.high %v1472_v1, %v1493_v17  ;;  %v1494_v23 = vcombine.low %v1458_v38, %v1479_v0  ;;  %v1495_v34 = vcombine.high %v1458_v38, %v1479_v0  ;;  %2267 = vmatprep.mubr.f32.mxu0 %v1380_v27 }
  0xd6   : > { %2382 = vmatprep.mubr.f32.mxu1 %v1381_v25  ;;  %v768_v13 = vcombine.low %v9174_v7, %v751_v32  ;;  %v769_v49 = vcombine.high %v9174_v7, %v751_v32  ;;  %2268 = vmatmul.mubr.f32.vlgmr.msra.gmra.mrb[0].mxu0 %v1377_v29  ;;  %v778_v24 = vrot.slane %v766_v12, %v9101_v18 }
  0xd7   : > { %2383 = vmatmul.mubr.f32.vlgmr.msra.gmra.mrb[0].mxu1 %v1378_v57  ;;  %v859_v15 = vcombine.low %v9345_v47, %v9355_v41  ;;  %v12297_v31 = vcombine.low %v9179_v22, %v9182_v46  ;;  %8178 = vmatpush3.bf16.msra.mxu0 %v9062_v60  ;;  %v792_v48 = vrot.slane %v767_v19, %v9101_v18  ;;  %v8518_v22 = vld [vmem:[%s8787_s23 + $0x68] sm:$0xff] }
  0xd8   : > { %2272 = vmatprep.mubr.f32.mxu0 %v1497_v14  ;;  %v785_v6 = vrot.slane %v768_v13, %v9101_v18  ;;  %v799_v7 = vrot.slane %v769_v49, %v9101_v18  ;;  %2387 = vmatprep.mubr.f32.mxu1 %v1498_v28  ;;  %v12298_v41 = vcombine.low %v9185_v52, %v9188_v63  ;;  %v8516_v63 = vld [vmem:[%s8787_s23 + $0x38] sm:$0xff] }
  0xd9   : > { %v886_v53 = vrot.slane %v12297_v31, %v9101_v18  ;;  %8180 = vmatprep.subr.bf16.mxu0 %v9103_v3  ;;  %v866_v42 = vrot.slane %v859_v15, %v9101_v18  ;;  %v924_v60 = vcombine.low %v9220_v21, %v9230_v5  ;;  %v7762_v36 = vcombine.low %v778_v24, %v792_v48 }
  0xda   : > { %v900_v47 = vrot.slane %v12298_v41, %v9101_v18  ;;  %v7764_v32 = vcombine.high %v778_v24, %v792_v48  ;;  %v7766_v12 = vcombine.low %v785_v6, %v799_v7  ;;  %v7768_v1 = vcombine.high %v785_v6, %v799_v7  ;;  %2273 = vmatmul.mubr.f32.gmra.mrb[2].mxu0 %v1494_v23 }
  0xdb   : > { %2388 = vmatmul.mubr.f32.gmra.mrb[2].mxu1 %v1495_v34  ;;  %v925_v0 = vcombine.high %v9220_v21, %v9230_v5  ;;  %v1513_v27 = vrot.slane %v7762_v36, %v9101_v18  ;;  %8182 = vmatpush3.bf16.msra.mxu0 %v9103_v3  ;;  %v9504_v28 = vrot.slane %v924_v60, %v9101_v18 }
  0xdc   : > { %v922_v17 = vcombine.low %v886_v53, %v900_v47  ;;  %v923_v38 = vcombine.high %v886_v53, %v900_v47  ;;  %v1527_v25 = vrot.slane %v7764_v32, %v9101_v18  ;;  %v1541_v29 = vrot.slane %v7766_v12, %v9101_v18  ;;  %8184 = vmatprep.subr.bf16.mxu0 %v9114_v44 }
  0xdd   : > { %v1555_v57 = vrot.slane %v7768_v1, %v9101_v18  ;;  %v9510_v5 = vrot.slane %v925_v0, %v9101_v18  ;;  %v9515_v3 = vrot.slane %v9217_v8, %v9101_v18  ;;  %v9519_v49 = vrot.slane %v9233_v2, %v9101_v18 }
  0xde   : > { %v934_v14 = vrot.slane %v922_v17, %v9101_v18  ;;  %v9507_v34 = vrot.slane %v923_v38, %v9101_v18  ;;  %v1564_v21 = vcombine.high %v1513_v27, %v1527_v25  ;;  %v1563_v19 = vcombine.low %v1513_v27, %v1527_v25 }
  0xdf   : > { %v1567_v23 = vcombine.high %v1541_v29, %v1555_v57  ;;  %v1566_v13 = vcombine.low %v1541_v29, %v1555_v57  ;;  %v12299_v24 = vcombine.high %v9217_v8, %v9217_v8  ;;  %8186 = vmatpush3.bf16.msra.mxu0 %v9114_v44  ;;  %v987_v47 = vcombine.high %v9504_v28, %v9519_v49 }
  0xe0   : > { %v7770_v31 = vcombine.low %v866_v42, %v934_v14  ;;  %v1589_v53 = vrot.slane %v1564_v21, %v9101_v18  ;;  %v1575_v48 = vrot.slane %v1563_v19, %v9101_v18  ;;  %v985_v41 = vcombine.high %v934_v14, %v9515_v3  ;;  %8188 = vmatprep.subr.bf16.mxu0 %v9116_v50 }
  0xe1   : > { %v9525_v15 = vrot.slane %v12299_v24, %v9101_v18  ;;  %v1610_v6 = vrot.slane %v1567_v23, %v9101_v18  ;;  %v1596_v7 = vrot.slane %v1566_v13, %v9101_v18  ;;  %v7776_v17 = vcombine.low %v9510_v5, %v987_v47 }
  0xe2   : > { %v1630_v42 = vrot.slane %v7770_v31, %v9101_v18  ;;  %v7772_v1 = vcombine.low %v9507_v34, %v985_v41  ;;  %v927_v38 = vcombine.high %v9233_v2, %v9233_v2  ;;  %v1039_v0 = vcombine.low %v9301_v10, %v9307_v58  ;;  %v397_v41 = vpop.xlane.xlu0 %396 }
  0xe3   : > { %v989_v8 = vcombine.high %v9507_v34, %v9525_v15  ;;  %v1614_v60 = vcombine.low %v1589_v53, %v1610_v6  ;;  %v1615_v36 = vcombine.high %v1589_v53, %v1610_v6  ;;  %v1611_v32 = vcombine.low %v1575_v48, %v1596_v7  ;;  %8190 = vmatpush3.bf16.msra.mxu0 %v9116_v50 }
  0xe4   : > { %v1612_v12 = vcombine.high %v1575_v48, %v1596_v7  ;;  %v1040_v27 = vcombine.high %v9301_v10, %v9307_v58  ;;  %v1041_v25 = vcombine.low %v9304_v62, %v9310_v4  ;;  %v1644_v29 = vrot.slane %v7772_v1, %v9101_v18  ;;  %8192 = vmatprep.subr.bf16.mxu0 %v9118_v55 }
  0xe5   : > { %v7774_v44 = vcombine.low %v989_v8, %v9504_v28  ;;  %2277 = vmatprep.mubr.f32.mxu0 %v1614_v60  ;;  %2392 = vmatprep.mubr.f32.mxu1 %v1615_v36  ;;  %v1672_v14 = vrot.slane %v7776_v17, %v9101_v18  ;;  %v9554_v2 = vrot.slane %v927_v38, %v9101_v18  ;;  %v403_v17 = vpop.xlane.xlu1 %402 }
  0xe6   : > { %2278 = vmatmul.mubr.f32.gmra.mrb[4].mxu0 %v1611_v32  ;;  %2393 = vmatmul.mubr.f32.gmra.mrb[4].mxu1 %v1612_v12  ;;  %v1042_v21 = vcombine.high %v9304_v62, %v9310_v4  ;;  %v9559_v23 = vrot.slane %v1039_v0, %v9101_v18  ;;  %v9562_v10 = vrot.slane %v1041_v25, %v9101_v18  ;;  %v9603_v25 = vmul.f32 0.0015625, %v397_v41 }
  0xe7   : > { %v1658_v57 = vrot.slane %v7774_v44, %v9101_v18  ;;  %v1681_v58 = vcombine.high %v1630_v42, %v1644_v29  ;;  %v1680_v13 = vcombine.low %v1630_v42, %v1644_v29  ;;  %v991_v31 = vcombine.high %v9510_v5, %v9554_v2  ;;  %8194 = vmatpush3.bf16.msra.mxu0 %v9118_v55 }
  0xe8   : > { %v9569_v53 = vrot.slane %v1040_v27, %v9101_v18  ;;  %v9572_v62 = vrot.slane %v1042_v21, %v9101_v18  ;;  %v9576_v4 = vrot.slane %v9292_v33, %v9101_v18  ;;  %v9584_v47 = vrot.slane %v9313_v11, %v9101_v18  ;;  %8196 = vmatprep.subr.bf16.mxu0 %v9120_v61 }
  0xe9   : > { %v1684_v19 = vcombine.high %v1658_v57, %v1672_v14  ;;  %v1683_v24 = vcombine.low %v1658_v57, %v1672_v14  ;;  %v1706_v50 = vrot.slane %v1681_v58, %v9101_v18  ;;  %v1692_v48 = vrot.slane %v1680_v13, %v9101_v18 }
  0xea   : > { %v12300_v8 = vcombine.high %v9292_v33, %v9292_v33  ;;  %v1102_v60 = vcombine.high %v9559_v23, %v9576_v4  ;;  %v7778_v36 = vcombine.low %v991_v31, %v9559_v23  ;;  %v1104_v38 = vcombine.high %v9562_v10, %v9584_v47 }
  0xeb   : > { %v1727_v6 = vrot.slane %v1684_v19, %v9101_v18  ;;  %v1713_v7 = vrot.slane %v1683_v24, %v9101_v18  ;;  %v1044_v55 = vcombine.high %v9313_v11, %v9313_v11  ;;  %v1156_v29 = vcombine.low %v9364_v39, %v9377_v30  ;;  %8198 = vmatpush3.bf16.msra.mxu0 %v9120_v61 }
  0xec   : > { %v9590_v42 = vrot.slane %v12300_v8, %v9101_v18  ;;  %v7780_v0 = vcombine.low %v9569_v53, %v1102_v60  ;;  %v1747_v27 = vrot.slane %v7778_v36, %v9101_v18  ;;  %v1157_v57 = vcombine.high %v9364_v39, %v9377_v30  ;;  %8200 = vmatprep.subr.bf16.mxu0 %v9137_v9 }
  0xed   : > { %v1731_v32 = vcombine.low %v1706_v50, %v1727_v6  ;;  %v1732_v12 = vcombine.high %v1706_v50, %v1727_v6  ;;  %v1728_v1 = vcombine.low %v1692_v48, %v1713_v7  ;;  %v1729_v44 = vcombine.high %v1692_v48, %v1713_v7 }
  0xee   : > { %v1106_v33 = vcombine.high %v9569_v53, %v9590_v42  ;;  %v7784_v21 = vcombine.low %v9572_v62, %v1104_v38  ;;  %v1761_v58 = vrot.slane %v7780_v0, %v9101_v18  ;;  %v9614_v19 = vmul.f32 0.0015625, %v403_v17 }
  0xef   : > { %2282 = vmatprep.mubr.f32.mxu0 %v1731_v32  ;;  %2397 = vmatprep.mubr.f32.mxu1 %v1732_v12  ;;  %v9617_v13 = vrot.slane %v1044_v55, %v9101_v18  ;;  %v1158_v11 = vcombine.low %v9367_v40, %v9380_v20  ;;  %v1159_v24 = vcombine.high %v9367_v40, %v9380_v20 }
  0xf0   : > { %2283 = vmatmul.mubr.f32.gmra.mrb[6].mxu0 %v1728_v1  ;;  %2398 = vmatmul.mubr.f32.gmra.mrb[6].mxu1 %v1729_v44  ;;  %v7782_v14 = vcombine.low %v1106_v33, %v9562_v10  ;;  %v9624_v30 = vrot.slane %v1156_v29, %v9101_v18  ;;  %v1789_v31 = vrot.slane %v7784_v21, %v9101_v18  ;;  %v8509_v33 = vld [vmem:[%s8787_s23 + $0x8] sm:$0xff] }
  0xf1   : > { %v1798_v50 = vcombine.high %v1747_v27, %v1761_v58  ;;  %v1797_v6 = vcombine.low %v1747_v27, %v1761_v58  ;;  %v1108_v48 = vcombine.high %v9572_v62, %v9617_v13  ;;  %v9633_v7 = vrot.slane %v1158_v11, %v9101_v18  ;;  %8202 = vmatpush3.bf16.msra.mxu0 %v9137_v9 }
  0xf2   : > { %v1775_v39 = vrot.slane %v7782_v14, %v9101_v18  ;;  %v9636_v40 = vrot.slane %v1157_v57, %v9101_v18  ;;  %v9639_v61 = vrot.slane %v1159_v24, %v9101_v18  ;;  %v9645_v36 = vrot.slane %v9371_v59, %v9101_v18  ;;  %8204 = vmatprep.subr.bf16.mxu0 %v9139_v16  ;;  %v409_v57 = vpop.xlane.xlu0 %408 }
  0xf3   : > { %v1823_v41 = vrot.slane %v1798_v50, %v9101_v18  ;;  %v1809_v60 = vrot.slane %v1797_v6, %v9101_v18  ;;  %v9649_v32 = vrot.slane %v9383_v45, %v9101_v18  ;;  %v12301_v12 = vcombine.high %v9371_v59, %v9371_v59 }
  0xf4   : > { %v1801_v20 = vcombine.high %v1775_v39, %v1789_v31  ;;  %v1800_v8 = vcombine.low %v1775_v39, %v1789_v31  ;;  %v7786_v44 = vcombine.low %v1108_v48, %v9624_v30  ;;  %v9663_v0 = vsub.f32 %v8509_v33, %v9603_v25  ;;  %v8510_v48 = vld [vmem:[%s8787_s23 + $0x18] sm:$0xff] }
  0xf5   : > { %v9655_v1 = vrot.slane %v12301_v12, %v9101_v18  ;;  %v1161_v27 = vcombine.high %v9383_v45, %v9383_v45  ;;  %v1219_v59 = vcombine.high %v9624_v30, %v9645_v36  ;;  %v1221_v55 = vcombine.high %v9633_v7, %v9649_v32  ;;  %8206 = vmatpush3.bf16.msra.mxu0 %v9139_v16 }
  0xf6   : > { %v1844_v17 = vrot.slane %v1801_v20, %v9101_v18  ;;  %v1830_v38 = vrot.slane %v1800_v8, %v9101_v18  ;;  %12302 = vst [vmem:[#allocation44_spill] sm:$0xff] %v9663_v0  ;;  %v1864_v29 = vrot.slane %v7786_v44, %v9101_v18  ;;  %v9682_v50 = vmul.f32 0.0015625, %v409_v57  ;;  %v8512_v57 = vld [vmem:[%s8787_s23 + $0x10] sm:$0xff] }
  0xf7   : > { %v1223_v9 = vcombine.high %v9636_v40, %v9655_v1  ;;  %v7788_v11 = vcombine.low %v9636_v40, %v1219_v59  ;;  %v7792_v39 = vcombine.low %v9639_v61, %v1221_v55  ;;  %v9679_v31 = vrot.slane %v1161_v27, %v9101_v18 }
  0xf8   : > { %v1848_v14 = vcombine.low %v1823_v41, %v1844_v17  ;;  %v1849_v21 = vcombine.high %v1823_v41, %v1844_v17  ;;  %v1845_v58 = vcombine.low %v1809_v60, %v1830_v38  ;;  %v1846_v45 = vcombine.high %v1809_v60, %v1830_v38  ;;  %v8511_v41 = vld [vmem:[%s8787_s23] sm:$0xff] }
  0xf9   : > { %v7790_v24 = vcombine.low %v1223_v9, %v9633_v7  ;;  %v1249_v6 = vcombine.low %v9412_v37, %v9426_v54  ;;  %v9688_v20 = vsub.f32 %v8510_v48, %v9603_v25  ;;  %v9692_v8 = vsub.f32 %v8511_v41, %v9603_v25 }
  0xfa   : > { %2287 = vmatprep.mubr.f32.mxu0 %v1848_v14  ;;  %2402 = vmatprep.mubr.f32.mxu1 %v1849_v21  ;;  %v1878_v16 = vrot.slane %v7788_v11, %v9101_v18  ;;  %v1906_v12 = vrot.slane %v7792_v39, %v9101_v18  ;;  %v2064_v37 = vrot.slane %v9663_v0, 6  ;;  %v1225_v54 = vcombine.high %v9639_v61, %v9679_v31  ;;  %v8513_v21 = vld [vmem:[%s8787_s23 + $0x30] sm:$0xff] }
  0xfb   : > { %12303 = vst [vmem:[#allocation45_spill] sm:$0xff] %v9688_v20  ;;  %12304 = vst [vmem:[#allocation46_spill] sm:$0xff] %v9692_v8  ;;  %2288 = vmatmul.mubr.f32.gmra.mrb[8].mxu0 %v1845_v58  ;;  %2403 = vmatmul.mubr.f32.gmra.mrb[8].mxu1 %v1846_v45  ;;  %v1892_v60 = vrot.slane %v7790_v24, %v9101_v18  ;;  %v9701_v44 = vrot.slane %v1249_v6, %v9101_v18  ;;  %v2066_v17 = vrot.slane %v9688_v20, 6  ;;  %v8514_v45 = vld [vmem:[%s8787_s23 + $0x40] sm:$0xff] }
  0xfc   : > { %v2063_v38 = vrot.slane %v9692_v8, 6  ;;  %v1915_v33 = vcombine.high %v1864_v29, %v1878_v16  ;;  %v1914_v59 = vcombine.low %v1864_v29, %v1878_v16  ;;  %v9708_v14 = vsub.f32 %v8512_v57, %v9603_v25 }
  0xfd   : > { %v1918_v27 = vcombine.high %v1892_v60, %v1906_v12  ;;  %v1917_v55 = vcombine.low %v1892_v60, %v1906_v12  ;;  %v7794_v9 = vcombine.low %v1225_v54, %v9701_v44  ;;  %v9712_v58 = vsub.f32 %v8513_v21, %v9614_v19 }
  0xfe   : > { %12305 = vst [vmem:[#allocation47_spill] sm:$0xff] %v9708_v14  ;;  %v9716_v11 = vsub.f32 %v8514_v45, %v9614_v19  ;;  %v1940_v24 = vrot.slane %v1915_v33, %v9101_v18  ;;  %v1926_v29 = vrot.slane %v1914_v59, %v9101_v18  ;;  %v2065_v41 = vrot.slane %v9708_v14, 6  ;;  %v8515_v45 = vld [vmem:[%s8787_s23 + $0x28] sm:$0xff] }
  0xff   : > { %12306 = vst [vmem:[#allocation48_spill] sm:$0xff] %v9712_v58  ;;  %v1961_v39 = vrot.slane %v1918_v27, %v9101_v18  ;;  %v1947_v6 = vrot.slane %v1917_v55, %v9101_v18  ;;  %v1975_v48 = vrot.slane %v7794_v9, %v9101_v18  ;;  %v2070_v16 = vrot.slane %v9712_v58, 6  ;;  %v420_v27 = vpop.xlane.xlu1 %419 }
 0x100   : > { %12307 = vst [vmem:[#allocation49_spill] sm:$0xff] %v9716_v11  ;;  %v2074_v60 = vrot.slane %v9716_v11, 6  ;;  %v9731_v52 = vsub.f32 %v8515_v45, %v9614_v19  ;;  %v8524_v11 = vld [vmem:[%s8787_s23 + $0x88] sm:$0x1] }
 0x101   : > { %v1965_v12 = vcombine.low %v1940_v24, %v1961_v39  ;;  %v1966_v54 = vcombine.high %v1940_v24, %v1961_v39  ;;  %v1962_v33 = vcombine.low %v1926_v29, %v1947_v6  ;;  %v1963_v57 = vcombine.high %v1926_v29, %v1947_v6  ;;  %v8517_v39 = vld [vmem:[%s8787_s23 + $0x58] sm:$0xff] }
 0x102   : > { %v1983_v21 = vcombine.high %v1975_v48, %v1975_v48  ;;  %v1990_v59 = vrot.slane %v1975_v48, %v9101_v18  ;;  %v2071_v55 = vsel %vm2062_vm1, %v2064_v37, %v2070_v16  ;;  %v2075_v9 = vsel %vm2062_vm1, %v2066_v17, %v2074_v60  ;;  %12308 = vst [vmem:[#allocation50_spill] sm:$0xff] %v9731_v52 }
 0x103   : > { %2292 = vmatprep.mubr.f32.mxu0 %v1965_v12  ;;  %2407 = vmatprep.mubr.f32.mxu1 %v1966_v54  ;;  %v9735_v24 = vsub.f32 %v8516_v63, %v9614_v19  ;;  %v9739_v29 = vsub.f32 %v8517_v39, %v9682_v50  ;;  %v9742_v48 = vmul.f32 0.0015625, %v420_v27  ;;  %v2068_v45 = vrot.slane %v9731_v52, 6 }
 0x104   : > { %2293 = vmatmul.mubr.f32.gmra.mrb[10].mxu0 %v1962_v33  ;;  %2408 = vmatmul.mubr.f32.gmra.mrb[10].mxu1 %v1963_v57  ;;  %v2004_v6 = vrot.slane %v1983_v21, %v9101_v18  ;;  %v2118_v12 = vsel %vm2062_vm1, %v1990_v59, %v2063_v38  ;;  %v2005_v54 = vcombine.high %v1990_v59, %v1990_v59  ;;  %v8519_v21 = vld [vmem:[%s8787_s23 + $0x50] sm:$0xff] }
 0x105   : > { %12309 = vst [vmem:[#allocation51_spill] sm:$0xff] %v9735_v24  ;;  %12310 = vst [vmem:[#allocation52_spill] sm:$0xff] %v9739_v29  ;;  %v2072_v35 = vrot.slane %v9735_v24, 6  ;;  %v2080_v63 = vrot.slane %v9739_v29, 6  ;;  %v9750_v39 = vsub.f32 %v8518_v22, %v9682_v50  ;;  %v9756_v59 = vsub.f32 %v8519_v21, %v9682_v50 }
 0x106   : > { %v2119_v33 = vsel %vm2062_vm1, %v2004_v6, %v2064_v37  ;;  %v2006_v57 = vcombine.high %v2004_v6, %v2004_v6  ;;  %v2120_v27 = vsel %vm2062_vm1, %v2005_v54, %v2065_v41  ;;  %v2069_v46 = vsel %vm2062_vm1, %v2063_v38, %v2068_v45  ;;  %v8520_v54 = vld [vmem:[%s8787_s23 + $0x60] sm:$0xff] }
 0x107   : > { %12311 = vst [vmem:[#allocation53_spill] sm:$0xff] %v9750_v39  ;;  %12312 = vst [vmem:[#allocation54_spill] sm:$0xff] %v9756_v59  ;;  %2297 = vmatprep.mubr.f32.mxu0 %v2119_v33  ;;  %v2073_v24 = vsel %vm2062_vm1, %v2065_v41, %v2072_v35  ;;  %v2081_v22 = vsel %vm2062_vm1, %v2070_v16, %v2080_v63  ;;  %v2084_v14 = vrot.slane %v9750_v39, 6  ;;  %v2078_v6 = vrot.slane %v9756_v59, 6  ;;  %v8521_v33 = vld [vmem:[%s8787_s23 + $0x80] sm:$0x1] }
 0x108   : > { %v2121_v37 = vsel %vm2062_vm1, %v2006_v57, %v2066_v17  ;;  %2298 = vmatmul.mubr.f32.gmra.mrb[12].mxu0 %v2118_v12  ;;  %v9766_v21 = vsub.f32 %v8520_v54, %v9682_v50  ;;  %v9770_v38 = vsub.f32 %v8521_v33, %v9742_v48  ;;  %v8522_v16 = vld [vmem:[%s8787_s23 + $0x90] sm:$0x1]  ;;  %v8523_v17 = vld [vmem:[%s8787_s23 + $0x78] sm:$0x1] }
 0x109   : > { %2412 = vmatprep.mubr.f32.mxu1 %v2121_v37  ;;  %2302 = vmatprep.mubr.f32.mxu0 %v2071_v55  ;;  %v2085_v41 = vsel %vm2062_vm1, %v2074_v60, %v2084_v14  ;;  %v9775_v39 = vsub.f32 %v8522_v16, %v9742_v48  ;;  %v9779_v12 = vsub.f32 %v8523_v17, %v9742_v48 }
 0x10a   : > { %12313 = vst [vmem:[#allocation55_spill] sm:$0xff] %v9766_v21  ;;  %12314 = vst [vmem:[#allocation56_spill] sm:$0xff] %v9770_v38  ;;  %2413 = vmatmul.mubr.f32.gmra.mrb[12].mxu1 %v2120_v27  ;;  %v2079_v57 = vsel %vm2062_vm1, %v2068_v45, %v2078_v6  ;;  %v2082_v54 = vrot.slane %v9766_v21, 6  ;;  %v2090_v33 = vrot.slane %v9770_v38, 6  ;;  %v9786_v55 = vsub.f32 %v8524_v11, %v9742_v48 }
 0x10b   : > { %12315 = vst [vmem:[#allocation57_spill] sm:$0xff] %v9775_v39  ;;  %12316 = vst [vmem:[#allocation58_spill] sm:$0xff] %v9779_v12  ;;  %2417 = vmatprep.mubr.f32.mxu1 %v2075_v9  ;;  %v2094_v60 = vrot.slane %v9775_v39, 6  ;;  %v2088_v37 = vrot.slane %v9779_v12, 6  ;;  %v524_v27 = vrot.slane %v9164_v51, %v9101_v18  ;;  %v12318_v16 = vcombine.high %v9164_v51, %v9164_v51 }
 0x10c   : > { %12317 = vst [vmem:[#allocation59_spill] sm:$0xff] %v9786_v55  ;;  %2303 = vmatmul.mubr.f32.gmra.mrb[14].mxu0 %v2069_v46  ;;  %v2083_v45 = vsel %vm2062_vm1, %v2072_v35, %v2082_v54  ;;  %v2091_v17 = vsel %vm2062_vm1, %v2080_v63, %v2090_v33  ;;  %v2092_v20 = vrot.slane %v9786_v55, 6  ;;  %v12319_v33 = vcombine.high %v9248_v56, %v9248_v56 }
 0x10d   : > { %2307 = vmatprep.mubr.f32.mxu0 %v2081_v22  ;;  %v2095_v9 = vsel %vm2062_vm1, %v2084_v14, %v2094_v60  ;;  %v2089_v39 = vsel %vm2062_vm1, %v2078_v6, %v2088_v37  ;;  %v531_v59 = vrot.slane %v12318_v16, %v9101_v18  ;;  %v536_v46 = vcombine.high %v524_v27, %v524_v27 }
 0x10e   : > { %2418 = vmatmul.mubr.f32.gmra.mrb[14].mxu1 %v2073_v24  ;;  %v2093_v35 = vsel %vm2062_vm1, %v2082_v54, %v2092_v20  ;;  %v572_v63 = vrot.slane %v524_v27, %v9101_v18  ;;  %v710_v22 = vrot.slane %v12319_v33, %v9101_v18  ;;  %v7755_v14 = vcombine.low %v9251_v43, %v9275_v26  ;;  %v12320_v20 = vld [vmem:[#allocation32_spill] sm:$0xff]  ;;  %v12321_v27 = vld [vmem:[#allocation11_spill] sm:$0xff] }
 0x10f   : > { %2422 = vmatprep.mubr.f32.mxu1 %v2085_v41  ;;  %v537_v6 = vcombine.high %v531_v59, %v531_v59  ;;  %v579_v60 = vrot.slane %v531_v59, %v9101_v18  ;;  %v586_v37 = vrot.slane %v536_v46, %v9101_v18  ;;  %v7757_v24 = vcombine.high %v9251_v43, %v9275_v26 }
 0x110   : > { %2308 = vmatmul.mubr.f32.gmra.mrb[16].mxu0 %v2079_v57  ;;  %v7759_v54 = vcombine.low %v12320_v20, %v710_v22  ;;  %v7761_v16 = vcombine.high %v12320_v20, %v710_v22  ;;  %v1403_v56 = vrot.slane %v7755_v14, %v9101_v18  ;;  %v758_v33 = vrot.slane %v12321_v27, %v9101_v18 }
 0x111   : > { %2312 = vmatprep.mubr.f32.mxu0 %v2091_v17  ;;  %v593_v41 = vrot.slane %v537_v6, %v9101_v18  ;;  %v7747_v11 = vcombine.low %v572_v63, %v586_v37  ;;  %v7749_v59 = vcombine.high %v572_v63, %v586_v37  ;;  %v1417_v46 = vrot.slane %v7757_v24, %v9101_v18 }
 0x112   : > { %2423 = vmatmul.mubr.f32.gmra.mrb[16].mxu1 %v2083_v45  ;;  %v1431_v43 = vrot.slane %v7759_v54, %v9101_v18  ;;  %v1445_v26 = vrot.slane %v7761_v16, %v9101_v18  ;;  %v12322_v57 = vcombine.high %v12321_v27, %v12321_v27  ;;  %v770_v14 = vcombine.high %v758_v33, %v758_v33 }
 0x113   : > { %2427 = vmatprep.mubr.f32.mxu1 %v2095_v9  ;;  %v7751_v20 = vcombine.low %v579_v60, %v593_v41  ;;  %v7753_v17 = vcombine.high %v579_v60, %v593_v41  ;;  %v1286_v6 = vrot.slane %v7747_v11, %v9101_v18  ;;  %v1300_v63 = vrot.slane %v7749_v59, %v9101_v18 }
 0x114   : > { %v765_v22 = vrot.slane %v12322_v57, %v9101_v18  ;;  %2313 = vmatmul.mubr.f32.gmra.mrb[18].mxu0 %v2089_v39  ;;  %v1448_v37 = vcombine.low %v1403_v56, %v1417_v46  ;;  %v1451_v45 = vcombine.low %v1431_v43, %v1445_v26  ;;  %v806_v54 = vrot.slane %v758_v33, %v9101_v18  ;;  %v12323_v33 = vld [vmem:[#allocation37_spill] sm:$0xff] }
 0x115   : > { %v1314_v16 = vrot.slane %v7751_v20, %v9101_v18  ;;  %v1328_v21 = vrot.slane %v7753_v17, %v9101_v18  ;;  %v1331_v55 = vcombine.low %v1286_v6, %v1300_v63  ;;  %v820_v60 = vrot.slane %v770_v14, %v9101_v18 }
 0x116   : > { %v771_v24 = vcombine.high %v765_v22, %v765_v22  ;;  %v813_v57 = vrot.slane %v765_v22, %v9101_v18  ;;  %2428 = vmatmul.mubr.f32.gmra.mrb[18].mxu1 %v2093_v35  ;;  %v1465_v9 = vrot.slane %v1448_v37, %v9101_v18  ;;  %v1486_v11 = vrot.slane %v1451_v45, %v9101_v18 }
 0x117   : > { %v1334_v56 = vcombine.low %v1314_v16, %v1328_v21  ;;  %v1348_v41 = vrot.slane %v1331_v55, %v9101_v18  ;;  %v12324_v59 = vrot.slane %v12323_v33, %v9101_v18  ;;  %v986_v43 = vcombine.low %v9504_v28, %v9519_v49 }
 0x118   : > { %v827_v39 = vrot.slane %v771_v24, %v9101_v18  ;;  %v1496_v35 = vcombine.low %v1465_v9, %v1486_v11  ;;  %v7763_v26 = vcombine.low %v806_v54, %v820_v60  ;;  %v7765_v22 = vcombine.high %v806_v54, %v820_v60 }
 0x119   : > { %v873_v46 = vrot.slane %v12324_v59, %v9101_v18  ;;  %v1369_v17 = vrot.slane %v1334_v56, %v9101_v18  ;;  %v988_v21 = vcombine.low %v9507_v34, %v9525_v15  ;;  %v990_v55 = vcombine.low %v9510_v5, %v9554_v2 }
 0x11a   : > { %v7767_v20 = vcombine.low %v813_v57, %v827_v39  ;;  %v7769_v14 = vcombine.high %v813_v57, %v827_v39  ;;  %v1520_v6 = vrot.slane %v7763_v26, %v9101_v18  ;;  %v1534_v63 = vrot.slane %v7765_v22, %v9101_v18 }
 0x11b   : > { %v7771_v28 = vcombine.low %v873_v46, %v9515_v3  ;;  %v1379_v45 = vcombine.low %v1348_v41, %v1369_v17  ;;  %v7773_v54 = vcombine.high %v988_v21, %v9515_v3  ;;  %v7775_v16 = vcombine.high %v9525_v15, %v986_v43 }
 0x11c   : > { %v1548_v37 = vrot.slane %v7767_v20, %v9101_v18  ;;  %v1562_v24 = vrot.slane %v7769_v14, %v9101_v18  ;;  %v1565_v57 = vcombine.low %v1520_v6, %v1534_v63  ;;  %v7777_v34 = vcombine.high %v990_v55, %v9519_v49 }
 0x11d   : > { %v1637_v5 = vrot.slane %v7771_v28, %v9101_v18  ;;  %v1101_v9 = vcombine.low %v9559_v23, %v9576_v4  ;;  %8039 = vmatprep.mubr.f32.mxu0 %v1379_v45  ;;  %v1651_v60 = vrot.slane %v7773_v54, %v9101_v18  ;;  %v1665_v39 = vrot.slane %v7775_v16, %v9101_v18 }
 0x11e   : > { %v1568_v11 = vcombine.low %v1548_v37, %v1562_v24  ;;  %v1103_v56 = vcombine.low %v9562_v10, %v9584_v47  ;;  %8040 = vmatmul.mubr.f32.vlgmr.msra.gmra.mrb[20].mxu0 %v1496_v35  ;;  %v1582_v3 = vrot.slane %v1565_v57, %v9101_v18  ;;  %v1679_v15 = vrot.slane %v7777_v34, %v9101_v18 }
 0x11f   : > { %v1105_v49 = vcombine.low %v9569_v53, %v9590_v42  ;;  %v1107_v23 = vcombine.low %v9572_v62, %v9617_v13  ;;  %v1682_v59 = vcombine.low %v1637_v5, %v1651_v60  ;;  %v7779_v46 = vcombine.high %v9554_v2, %v1101_v9  ;;  %v8526_v9 = vld [vmem:[%s8787_s23 + $0x70] sm:$0xff]  ;;  %v8527_v60 = vld [vmem:[%s8787_s23 + $0x98] sm:$0x1] }
 0x120   : > { %v1603_v41 = vrot.slane %v1568_v11, %v9101_v18  ;;  %v7783_v43 = vcombine.high %v9590_v42, %v1103_v56  ;;  %v1685_v26 = vcombine.low %v1665_v39, %v1679_v15  ;;  %v1218_v22 = vcombine.low %v9624_v30, %v9645_v36 }
 0x121   : > { %v7781_v10 = vcombine.high %v1105_v49, %v9576_v4  ;;  %v7785_v35 = vcombine.high %v1107_v23, %v9584_v47  ;;  %v1699_v53 = vrot.slane %v1682_v59, %v9101_v18  ;;  %v1754_v62 = vrot.slane %v7779_v46, %v9101_v18  ;;  %v8528_v49 = vld [vmem:[%s8787_s23 + $0x48] sm:$0xff] }
 0x122   : > { %v1613_v20 = vcombine.low %v1582_v3, %v1603_v41  ;;  %v1782_v17 = vrot.slane %v7783_v43, %v9101_v18  ;;  %v1720_v14 = vrot.slane %v1685_v26, %v9101_v18  ;;  %v1220_v4 = vcombine.low %v9633_v7, %v9649_v32 }
 0x123   : > { %v1768_v2 = vrot.slane %v7781_v10, %v9101_v18  ;;  %v1796_v42 = vrot.slane %v7785_v35, %v9101_v18  ;;  %v1222_v47 = vcombine.low %v9636_v40, %v9655_v1  ;;  %v1224_v30 = vcombine.low %v9639_v61, %v9679_v31  ;;  %v12325_v40 = vld [vmem:[#allocation5_spill] sm:$0xff] }
 0x124   : > { %8042 = vmatprep.mubr.f32.mxu0 %v1613_v20  ;;  %v7787_v21 = vcombine.high %v9617_v13, %v1218_v22  ;;  %v1730_v55 = vcombine.low %v1699_v53, %v1720_v14  ;;  %v7791_v37 = vcombine.high %v9655_v1, %v1220_v4  ;;  %v12326_v61 = vrot.slane %v12325_v40, %v9101_v18 }
 0x125   : > { %v1799_v6 = vcombine.low %v1754_v62, %v1768_v2  ;;  %v1802_v63 = vcombine.low %v1782_v17, %v1796_v42  ;;  %v7789_v28 = vcombine.high %v1222_v47, %v9645_v36  ;;  %v7793_v7 = vcombine.high %v1224_v30, %v9649_v32  ;;  %v8525_v32 = vld [vmem:[%s8787_s23 + $0x20] sm:$0xff] }
 0x126   : > { %v1871_v45 = vrot.slane %v7787_v21, %v9101_v18  ;;  %v1263_v24 = vrot.slane %v12326_v61, %v9101_v18  ;;  %8043 = vmatmul.mubr.f32.gmra.mrb[22].mxu0 %v1730_v55  ;;  %v1899_v1 = vrot.slane %v7791_v37, %v9101_v18  ;;  %v9908_v57 = vsub.f32 %v8525_v32, %v9603_v25 }
 0x127   : > { %v1816_v13 = vrot.slane %v1799_v6, %v9101_v18  ;;  %v1837_v54 = vrot.slane %v1802_v63, %v9101_v18  ;;  %v1885_v36 = vrot.slane %v7789_v28, %v9101_v18  ;;  %v1913_v16 = vrot.slane %v7793_v7, %v9101_v18 }
 0x128   : > { %12327 = vst [vmem:[#allocation32_spill] sm:$0xff] %v9908_v57  ;;  %v1264_v34 = vcombine.low %v9701_v44, %v1263_v24  ;;  %v9913_v11 = vsub.f32 %v8526_v9, %v9682_v50  ;;  %v9917_v39 = vsub.f32 %v8527_v60, %v9742_v48  ;;  %v9922_v25 = vsub.f32 %v8528_v49, %v9614_v19 }
 0x129   : > { %v1847_v5 = vcombine.low %v1816_v13, %v1837_v54  ;;  %v1916_v56 = vcombine.low %v1871_v45, %v1885_v36  ;;  %v1919_v3 = vcombine.low %v1899_v1, %v1913_v16  ;;  %v2067_v48 = vrot.slane %v9908_v57, 6 }
 0x12a   : > { %12328 = vst [vmem:[#allocation60_spill] sm:$0xff] %v9913_v11  ;;  %12329 = vst [vmem:[#allocation61_spill] sm:$0xff] %v9917_v39  ;;  %v7795_v15 = vcombine.high %v9679_v31, %v1264_v34  ;;  %v2076_v31 = vrot.slane %v9922_v25, 6  ;;  %v2086_v43 = vrot.slane %v9913_v11, 6  ;;  %v2096_v26 = vrot.slane %v9917_v39, 6 }
 0x12b   : > { %8045 = vmatprep.mubr.f32.mxu0 %v1847_v5  ;;  %12330 = vst [vmem:[#allocation62_spill] sm:$0xff] %v9922_v25  ;;  %v1933_v23 = vrot.slane %v1916_v56, %v9101_v18  ;;  %v1954_v50 = vrot.slane %v1919_v3, %v9101_v18 }
 0x12c   : > { %v1982_v41 = vrot.slane %v7795_v15, %v9101_v18  ;;  %v2077_v22 = vsel %vm2062_vm1, %v2067_v48, %v2076_v31  ;;  %v2087_v4 = vsel %vm2062_vm1, %v2076_v31, %v2086_v43  ;;  %v2097_v6 = vsel %vm2062_vm1, %v2086_v43, %v2096_v26 }
 0x12d   : > { %v1964_v59 = vcombine.low %v1933_v23, %v1954_v50 }
 0x12e   : > { %v1997_v46 = vrot.slane %v1982_v41, %v9101_v18 }
 0x12f   : > { %8046 = vmatmul.mubr.f32.gmra.mrb[24].mxu0 %v1964_v59 }
 0x130   : > { %v2122_v19 = vsel %vm2062_vm1, %v1997_v46, %v2067_v48 }
 0x131   : > { %8048 = vmatprep.mubr.f32.mxu0 %v2122_v19 }
 0x133   : > { %8049 = vmatmul.mubr.f32.gmra.mrb[26].mxu0 %v2077_v22 }
 0x134   : > { %8051 = vmatprep.mubr.f32.mxu0 %v2087_v4 }
 0x137   : > { %8052 = vmatmul.mubr.f32.gmra.mrb[28].mxu0 %v2097_v6 }
 0x1a9   : > { %v7862_v63 = vpop.f32.mrb[0].mxu0 }
 0x1aa   : > { %v7924_v37 = vpop.f32.mrb[0].mxu1  ;;  %v7863_v28 = vpop.f32.mrb[1].mxu0 }
 0x1ab   : > { %v7925_v7 = vpop.f32.mrb[1].mxu1  ;;  %v7864_v45 = vadd.f32 %v7863_v28, %v7862_v63 }
 0x1ac   : > { %v7926_v61 = vadd.f32 %v7925_v7, %v7924_v37 }
 0x1ad   : > { %v7865_v24 = vpop.f32.mrb[2].mxu0 }
 0x1ae   : > { %v7927_v13 = vpop.f32.mrb[2].mxu1  ;;  %v9952_v54 = vadd.f32 %v7926_v61, %v7864_v45  ;;  %v7866_v1 = vpop.f32.mrb[3].mxu0 }
 0x1af   : > { %v7928_v36 = vpop.f32.mrb[3].mxu1  ;;  %v7867_v16 = vadd.f32 %v7866_v1, %v7865_v24 }
 0x1b0   : > { %v7929_v32 = vadd.f32 %v7928_v36, %v7927_v13 }
 0x1b2   : > { %v2390_v34 = vadd.f32 %v7929_v32, %v7867_v16 }
 0x1b9   : > { %v7868_v5 = vpop.f32.mrb[4].mxu0  ;;  %v7930_v9 = vpop.f32.mrb[4].mxu1 }
 0x1ba   : > { %v7869_v60 = vpop.f32.mrb[5].mxu0  ;;  %v7931_v56 = vpop.f32.mrb[5].mxu1 }
 0x1bb   : > { %v7870_v3 = vadd.f32 %v7869_v60, %v7868_v5  ;;  %v7932_v15 = vadd.f32 %v7931_v56, %v7930_v9 }
 0x1bd   : > { %v9954_v49 = vadd.f32 %v7932_v15, %v7870_v3 }
 0x1c3   : > { %v7871_v23 = vpop.f32.mrb[6].mxu0  ;;  %v7933_v50 = vpop.f32.mrb[6].mxu1 }
 0x1c4   : > { %v7872_v41 = vpop.f32.mrb[7].mxu0  ;;  %v7934_v48 = vpop.f32.mrb[7].mxu1 }
 0x1c5   : > { %v7873_v59 = vadd.f32 %v7872_v41, %v7871_v23  ;;  %v7935_v46 = vadd.f32 %v7934_v48, %v7933_v50 }
 0x1c7   : > { %v2400_v31 = vadd.f32 %v7935_v46, %v7873_v59 }
 0x1ce   : > { %v7874_v19 = vpop.f32.mrb[8].mxu0  ;;  %v7936_v43 = vpop.f32.mrb[8].mxu1 }
 0x1cf   : > { %v7875_v26 = vpop.f32.mrb[9].mxu0  ;;  %v7937_v22 = vpop.f32.mrb[9].mxu1 }
 0x1d0   : > { %v7876_v4 = vadd.f32 %v7875_v26, %v7874_v19  ;;  %v7938_v6 = vadd.f32 %v7937_v22, %v7936_v43 }
 0x1d2   : > { %v9956_v63 = vadd.f32 %v7938_v6, %v7876_v4 }
 0x1d7   : > { %v7877_v37 = vpop.f32.mrb[10].mxu0  ;;  %v7939_v28 = vpop.f32.mrb[10].mxu1 }
 0x1d8   : > { %v7878_v7 = vpop.f32.mrb[11].mxu0  ;;  %v7940_v45 = vpop.f32.mrb[11].mxu1 }
 0x1d9   : > { %v7879_v61 = vadd.f32 %v7878_v7, %v7877_v37  ;;  %v7941_v24 = vadd.f32 %v7940_v45, %v7939_v28 }
 0x1db   : > { %v7880_v13 = vpop.f32.mrb[12].mxu0  ;;  %v2410_v1 = vadd.f32 %v7941_v24, %v7879_v61 }
 0x1dc   : > { %v7881_v36 = vpop.f32.mrb[13].mxu0 }
 0x1dd   : > { %v7942_v16 = vpop.f32.mrb[12].mxu1  ;;  %v7882_v32 = vadd.f32 %v7881_v36, %v7880_v13  ;;  %v7796_v36 = vld [vmem:[%s12051_s3] ss:$0 sm:$0xff] }
 0x1de   : > { %v7943_v5 = vpop.f32.mrb[13].mxu1 }
 0x1df   : > { %v7944_v9 = vadd.f32 %v7943_v5, %v7942_v16  ;;  %v7883_v60 = vpop.f32.mrb[14].mxu0 }
 0x1e0   : > { %v7884_v56 = vpop.f32.mrb[15].mxu0 }
 0x1e1   : > { %v7945_v3 = vpop.f32.mrb[14].mxu1  ;;  %v7885_v15 = vadd.f32 %v7884_v56, %v7883_v60  ;;  %v2415_v23 = vadd.f32 %v7944_v9, %v7882_v32  ;;  %v7797_v9 = vld [vmem:[%s12052_s4] ss:$0 sm:$0xff] }
 0x1e2   : > { %v7946_v50 = vpop.f32.mrb[15].mxu1 }
 0x1e3   : > { %v7947_v41 = vadd.f32 %v7946_v50, %v7945_v3  ;;  %v7886_v48 = vpop.f32.mrb[16].mxu0 }
 0x1e4   : > { %v7887_v59 = vpop.f32.mrb[17].mxu0 }
 0x1e5   : > { %v7948_v46 = vpop.f32.mrb[16].mxu1  ;;  %v7888_v19 = vadd.f32 %v7887_v59, %v7886_v48  ;;  %v2420_v43 = vadd.f32 %v7947_v41, %v7885_v15 }
 0x1e6   : > { %v7949_v26 = vpop.f32.mrb[17].mxu1 }
 0x1e7   : > { %v7950_v22 = vadd.f32 %v7949_v26, %v7948_v46  ;;  %v7889_v4 = vpop.f32.mrb[18].mxu0 }
 0x1e8   : > { %v7890_v6 = vpop.f32.mrb[19].mxu0 }
 0x1e9   : > { %v7951_v37 = vpop.f32.mrb[18].mxu1  ;;  %v7891_v28 = vadd.f32 %v7890_v6, %v7889_v4  ;;  %v2425_v7 = vadd.f32 %v7950_v22, %v7888_v19 }
 0x1ea   : > { %v7952_v45 = vpop.f32.mrb[19].mxu1 }
 0x1eb   : > { %v7953_v61 = vadd.f32 %v7952_v45, %v7951_v37 }
 0x1ed   : > { %v2430_v24 = vadd.f32 %v7953_v61, %v7891_v28 }
 0x1f1   : > { %v8041_v13 = vpop.f32.mrb[20].mxu0 }
 0x1f2   : > { %v2505_v16 = vadd.f32 %v8041_v13, %v2390_v34  ;;  %v2499_v32 = vpop.f32.mrb[21].mxu0 }
 0x1f3   : > { %v2500_v5 = vadd.f32 %v2499_v32, %v9952_v54 }
 0x1f4   : > { %v2556_v60 = vmul.f32 %v7796_v36, %v2505_v16 }
 0x1f5   : > { %v2555_v56 = vmul.f32 %v7796_v36, %v2500_v5 }
 0x1f6   : > { %v2573_v3 = vadd.f32 %v7797_v9, %v2556_v60 }
 0x1f7   : > { %v2572_v15 = vadd.f32 %v7797_v9, %v2555_v56 }
 0x1f8   : > { %v9965_v50 = vmax.f32 %v2573_v3, 0.0 }
 0x1f9   : > { %v8044_v41 = vpop.f32.mrb[22].mxu0  ;;  %v9967_v48 = vmax.f32 %v2572_v15, 0.0 }
 0x1fa   : > { %v2515_v59 = vadd.f32 %v8044_v41, %v2400_v31  ;;  %v2509_v46 = vpop.f32.mrb[23].mxu0  ;;  %v2593_v34 = vmul.f32 %v9965_v50, %v9965_v50 }
 0x1fb   : > { %v2510_v54 = vadd.f32 %v2509_v46, %v9954_v49  ;;  %v2592_v19 = vmul.f32 %v9967_v48, %v9967_v48 }
 0x1fc   : > { %v2558_v26 = vmul.f32 %v7796_v36, %v2515_v59  ;;  %2604 = vadd.xlane.f32.xlu1 %v2593_v34 }
 0x1fd   : > { %v2557_v22 = vmul.f32 %v7796_v36, %v2510_v54  ;;  %2602 = vadd.xlane.f32.xlu0 %v2592_v19 }
 0x1fe   : > { %v2575_v4 = vadd.f32 %v7797_v9, %v2558_v26 }
 0x1ff   : > { %v2574_v6 = vadd.f32 %v7797_v9, %v2557_v22 }
 0x200   : > { %v9974_v37 = vmax.f32 %v2575_v4, 0.0 }
 0x201   : > { %v9976_v28 = vmax.f32 %v2574_v6, 0.0 }
 0x202   : > { %v8047_v31 = vpop.f32.mrb[24].mxu0  ;;  %v2595_v45 = vmul.f32 %v9974_v37, %v9974_v37 }
 0x203   : > { %v2525_v61 = vadd.f32 %v8047_v31, %v2410_v1  ;;  %v2519_v13 = vpop.f32.mrb[25].mxu0  ;;  %v2594_v49 = vmul.f32 %v9976_v28, %v9976_v28 }
 0x204   : > { %v2520_v16 = vadd.f32 %v2519_v13, %v9956_v63  ;;  %2608 = vadd.xlane.f32.xlu1 %v2595_v45 }
 0x205   : > { %2606 = vadd.xlane.f32.xlu0 %v2594_v49  ;;  %v2560_v54 = vmul.f32 %v7796_v36, %v2525_v61 }
 0x206   : > { %v8050_v32 = vpop.f32.mrb[26].mxu0  ;;  %v2559_v1 = vmul.f32 %v7796_v36, %v2520_v16 }
 0x207   : > { %v2535_v5 = vadd.f32 %v8050_v32, %v2420_v43  ;;  %v2529_v60 = vpop.f32.mrb[27].mxu0  ;;  %v2577_v45 = vadd.f32 %v7797_v9, %v2560_v54 }
 0x208   : > { %v2530_v56 = vadd.f32 %v2529_v60, %v2415_v23  ;;  %v2576_v13 = vadd.f32 %v7797_v9, %v2559_v1 }
 0x209   : > { %v2562_v3 = vmul.f32 %v7796_v36, %v2535_v5  ;;  %v9999_v16 = vmax.f32 %v2577_v45, 0.0 }
 0x20a   : > { %v2561_v15 = vmul.f32 %v7796_v36, %v2530_v56  ;;  %v8053_v41 = vpop.f32.mrb[28].mxu0  ;;  %v10001_v32 = vmax.f32 %v2576_v13, 0.0 }
 0x20b   : > { %v2545_v59 = vadd.f32 %v8053_v41, %v2430_v24  ;;  %v2539_v46 = vpop.f32.mrb[29].mxu0  ;;  %v2579_v34 = vadd.f32 %v7797_v9, %v2562_v3 }
 0x20c   : > { %v2540_v19 = vadd.f32 %v2539_v46, %v2425_v7  ;;  %v2578_v26 = vadd.f32 %v7797_v9, %v2561_v15  ;;  %v2596_v60 = vmul.f32 %v10001_v32, %v10001_v32 }
 0x20d   : > { %v2564_v22 = vmul.f32 %v7796_v36, %v2545_v59  ;;  %v9983_v4 = vmax.f32 %v2579_v34, 0.0 }
 0x20e   : > { %v2563_v63 = vmul.f32 %v7796_v36, %v2540_v19  ;;  %v9985_v6 = vmax.f32 %v2578_v26, 0.0 }
 0x20f   : > { %v2581_v31 = vadd.f32 %v7797_v9, %v2564_v22  ;;  %v2599_v23 = vmul.f32 %v9983_v4, %v9983_v4 }
 0x210   : > { %v2598_v43 = vmul.f32 %v9985_v6, %v9985_v6  ;;  %v2580_v24 = vadd.f32 %v7797_v9, %v2563_v63  ;;  %v2597_v9 = vmul.f32 %v9999_v16, %v9999_v16 }
 0x211   : > { %2616 = vadd.xlane.f32.xlu1 %v2599_v23  ;;  %v9991_v61 = vmax.f32 %v2581_v31, 0.0 }
 0x212   : > { %2614 = vadd.xlane.f32.xlu0 %v2598_v43  ;;  %v9993_v7 = vmax.f32 %v2580_v24, 0.0 }
 0x213   : > { %v2601_v36 = vmul.f32 %v9991_v61, %v9991_v61 }
 0x214   : > { %v2600_v49 = vmul.f32 %v9993_v7, %v9993_v7 }
 0x215   : > { %v2621_v5 = vsel %vm2620_vm2, %v2601_v36, 0.0 }
 0x216   : > { %2622 = vadd.xlane.f32.xlu1 %v2621_v5  ;;  %2618 = vadd.xlane.f32.xlu0 %v2600_v49 }
 0x21a   : > { %2612 = vadd.xlane.f32.xlu1 %v2597_v9  ;;  %2610 = vadd.xlane.f32.xlu0 %v2596_v60 }
 0x289   : > { %v2605_v56 = vpop.xlane.xlu1 %2604 }
 0x28a   : > { %v2625_v3 = vmax.f32 %v2605_v56, 1e-16  ;;  %v2603_v15 = vpop.xlane.xlu0 %2602 }
 0x28b   : > { %v2624_v41 = vmax.f32 %v2603_v15, 1e-16 }
 0x28c   : > { %8303 = vrsqrt.f32 %v2625_v3 }
 0x28d   : > { %8305 = vrsqrt.f32 %v2624_v41 }
 0x291   : > { %v2609_v59 = vpop.xlane.xlu1 %2608 }
 0x292   : > { %v2627_v46 = vmax.f32 %v2609_v59, 1e-16  ;;  %v2607_v34 = vpop.xlane.xlu0 %2606 }
 0x293   : > { %v2626_v54 = vmax.f32 %v2607_v34, 1e-16 }
 0x294   : > { %8307 = vrsqrt.f32 %v2627_v46 }
 0x295   : > { %8309 = vrsqrt.f32 %v2626_v54 }
 0x296   : > { %v8304_v1 = vpop.eup %8303 }
 0x297   : > { %v8306_v19 = vpop.eup %8305  ;;  %v2645_v26 = vmul.f32 %v8304_v1, %v9965_v50 }
 0x298   : > { %v2644_v22 = vmul.f32 %v8306_v19, %v9967_v48 }
 0x29a   : > { %v2654_v63 = vpack.c.bf16 %v2645_v26, %v2644_v22 }
 0x29c   : > { %8058 = vmatprep.mubr.bf16.mxu1 %v2654_v63  ;;  %8066 = vmatprep.subr.bf16.mxu0 %v2654_v63 }
 0x29d   : > { %8067 = vmatpush3.bf16.xpose.msra.mxu0 %v2654_v63 }
 0x29e   : > { %v8308_v31 = vpop.eup %8307  ;;  %v2617_v23 = vpop.xlane.xlu1 %2616 }
 0x29f   : > { %v8310_v43 = vpop.eup %8309  ;;  %v2631_v24 = vmax.f32 %v2617_v23, 1e-16  ;;  %v2615_v45 = vpop.xlane.xlu0 %2614  ;;  %v2647_v13 = vmul.f32 %v8308_v31, %v9974_v37 }
 0x2a0   : > { %v2630_v36 = vmax.f32 %v2615_v45, 1e-16  ;;  %v2646_v49 = vmul.f32 %v8310_v43, %v9976_v28 }
 0x2a1   : > { %8311 = vrsqrt.f32 %v2631_v24 }
 0x2a2   : > { %8313 = vrsqrt.f32 %v2630_v36  ;;  %v2655_v5 = vpack.c.bf16 %v2647_v13, %v2646_v49  ;;  %v12339_v49 = vld [vmem:[#allocation18_spill] sm:$0xff] }
 0x2a3   : > { %v2623_v50 = vpop.xlane.xlu1 %2622  ;;  %v2619_v9 = vpop.xlane.xlu0 %2618 }
 0x2a4   : > { %v2633_v48 = vmax.f32 %v2623_v50, 1e-16  ;;  %v2632_v60 = vmax.f32 %v2619_v9, 1e-16  ;;  %8068 = vmatprep.subr.bf16.mxu0 %v2655_v5  ;;  %v12342_v9 = vld [vmem:[#allocation22_spill] sm:$0xff] }
 0x2a5   : > { %8069 = vmatpush3.bf16.xpose.msra.mxu0 %v2655_v5 }
 0x2a6   : > { %8315 = vrsqrt.f32 %v2633_v48 }
 0x2a7   : > { %8317 = vrsqrt.f32 %v2632_v60  ;;  %v2613_v56 = vpop.xlane.xlu1 %2612  ;;  %v2611_v3 = vpop.xlane.xlu0 %2610  ;;  %v12343_v60 = vmov 0 }
 0x2a8   : > { %v2629_v15 = vmax.f32 %v2613_v56, 1e-16  ;;  %v2628_v41 = vmax.f32 %v2611_v3, 1e-16  ;;  %v12344_v60 = vsel %vm10024_vm5, 4294967295, %v12343_v60  ;;  %v12346_v56 = vld [vmem:[#allocation17_spill] sm:$0xff] }
 0x2a9   : > { %v12347_v3 = vld [vmem:[#allocation27_spill] sm:$0xff] }
 0x2aa   : > { %8319 = vrsqrt.f32 %v2629_v15  ;;  %v8236_v15 = vpack.c.bf16 %v12347_v3, %v12346_v56 }
 0x2ab   : > { %v8312_v37 = vpop.eup %8311  ;;  %8321 = vrsqrt.f32 %v2628_v41  ;;  %v12348_v41 = vld [vmem:[#allocation8_spill] sm:$0xff] }
 0x2ac   : > { %v8314_v59 = vpop.eup %8313  ;;  %v2651_v46 = vmul.f32 %v8312_v37, %v9983_v4  ;;  %v12349_v37 = vld [vmem:[#allocation34_spill] sm:$0xff] }
 0x2ad   : > { %v2650_v28 = vmul.f32 %v8314_v59, %v9985_v6  ;;  %v8211_v59 = vpack.c.bf16 %v12349_v37, %v12348_v41 }
 0x2af   : > { %v2658_v26 = vpack.c.bf16 %v2651_v46, %v2650_v28  ;;  %v2657_v4 = vpack.c.bf16 %v2650_v28, %v2650_v28  ;;  %v12350_v28 = vld [vmem:[#allocation39_spill] sm:$0xff]  ;;  %v12351_v46 = vld [vmem:[#allocation2_spill] sm:$0xff] }
 0x2b0   : > { %v8316_v34 = vpop.eup %8315 }
 0x2b1   : > { %v8318_v54 = vpop.eup %8317  ;;  %v2653_v1 = vmul.f32 %v8316_v34, %v9991_v61  ;;  %v2663_v43 = vrot.slane %v2658_v26, 1  ;;  %v12337_v61 = vld [vmem:[#allocation13_spill] sm:$0xff]  ;;  %v12352_v34 = vld [vmem:[#allocation7_spill] sm:$0xff] }
 0x2b2   : > { %v2652_v19 = vmul.f32 %v8318_v54, %v9993_v7  ;;  %v12338_v7 = vld [vmem:[#allocation23_spill] sm:$0xff]  ;;  %12345 = vst [vmem:[#allocation13_spill] sm:$0xff] %v12344_v60  ;;  %v12353_v54 = vld [vmem:[#allocation33_spill] sm:$0xff] }
 0x2b3   : > { %v8207_v36 = vpack.c.bf16 %v12338_v7, %v12337_v61  ;;  %v12355_v26 = vld [vmem:[#allocation43_spill] sm:$0xff] }
 0x2b4   : > { %v8320_v22 = vpop.eup %8319  ;;  %v2659_v63 = vpack.c.bf16 %v2653_v1, %v2652_v19  ;;  %v8214_v1 = vpack.c.bf16 %v12353_v54, %v12352_v34  ;;  %v12354_v19 = vld [vmem:[#allocation38_spill] sm:$0xff] }
 0x2b5   : > { %v8322_v31 = vpop.eup %8321  ;;  %v2649_v23 = vmul.f32 %v8320_v22, %v9999_v16  ;;  %v12340_v16 = vld [vmem:[#allocation28_spill] sm:$0xff]  ;;  %v8241_v22 = vpack.c.bf16 %v12355_v26, %v12354_v19 }
 0x2b6   : > { %v2664_v24 = vrot.slane %v2659_v63, 1  ;;  %v2648_v45 = vmul.f32 %v8322_v31, %v10001_v32  ;;  %v8234_v50 = vpack.c.bf16 %v12340_v16, %v12339_v49  ;;  %v12341_v32 = vld [vmem:[#allocation12_spill] sm:$0xff]  ;;  %v12356_v63 = vld [vmem:[#allocation15_spill] sm:$0xff]  ;;  %v12357_v31 = vld [vmem:[#allocation25_spill] sm:$0xff] }
 0x2b7   : > { %v8209_v48 = vpack.c.bf16 %v12342_v9, %v12341_v32 }
 0x2b8   : > { %v2665_v6 = vsel %vm2662_vm3, %v2663_v43, %v2664_v24  ;;  %v2656_v13 = vpack.c.bf16 %v2649_v23, %v2648_v45  ;;  %v8217_v23 = vpack.c.bf16 %v12357_v31, %v12356_v63 }
 0x2b9   : > { %8054 = vmatprep.subr.bf16.mxu1 %v2665_v6  ;;  %8074 = vmatprep.mubr.bf16.mxu0 %v2665_v6 }
 0x2ba   : > { %8055 = vmatpush3.bf16.xpose.msra.mxu1 %v2665_v6  ;;  %8070 = vmatprep.subr.bf16.mxu0 %v2656_v13 }
 0x2bb   : > { %8056 = vmatprep.subr.bf16.mxu1 %v2664_v24  ;;  %8071 = vmatpush3.bf16.xpose.msra.mxu0 %v2656_v13 }
 0x2bc   : > { %8072 = vmatprep.subr.bf16.mxu0 %v2657_v4 }
 0x2c2   : > { %8057 = vmatpush3.bf16.xpose.msra.mxu1 %v2664_v24 }
 0x2c3   : > { %8073 = vmatpush3.bf16.xpose.msra.mxu0 %v2657_v4  ;;  %8208 = vmatprep.subr.bf16.mxu1 %v8207_v36 }
 0x2c4   : > { %8235 = vmatprep.subr.bf16.mxu0 %v8234_v50 }
 0x2c9   : > { %8059 = vmatmul.mubr.bf16.vlgmr.msra.gmra.mrb[20].mxu1 %v2655_v5  ;;  %v8238_v5 = vpack.c.bf16 %v12351_v46, %v12350_v28 }
 0x2ca   : > { %8062 = vmatprep.mubr.bf16.mxu1 %v2656_v13  ;;  %8075 = vmatmul.mubr.bf16.vlgmr.msra.gmra.mrb[32].mxu0 %v2664_v24 }
 0x2cb   : > { %8210 = vmatpush1.bf16.msra.mxu1 %v8209_v48  ;;  %8237 = vmatpush1.bf16.msra.mxu0 %v8236_v15 }
 0x2cc   : > { %8213 = vmatprep.subr.msk.bf16.mxu1 %vm10024_vm5, %v8211_v59  ;;  %8240 = vmatprep.subr.msk.bf16.mxu0 %vm10024_vm5, %v8238_v5 }
 0x2cf   : > { %8216 = vmatpush1.bf16.msk.msra.mxu1 %vm10024_vm5, %v8214_v1  ;;  %8243 = vmatpush1.bf16.msk.msra.mxu0 %vm10024_vm5, %v8241_v22 }
 0x2d0   : > { %8218 = vmatprep.subr.bf16.mxu1 %v8217_v23 }
 0x2d1   : > { %8063 = vmatmul.mubr.bf16.gmra.mrb[24].mxu1 %v2657_v4 }
 0x39c   : > { %v8060_v43 = vpop.f32.mrb[20].mxu1 }
 0x39d   : > { %v2886_v24 = vcombine.high %v8060_v43, %v8060_v43  ;;  %v2702_v45 = vpop.f32.mrb[21].mxu1  ;;  %v10048_v6 = vpop.f32.mrb[32].mxu0  ;;  %v2893_v4 = vrot.slane %v8060_v43, %v9101_v18 }
 0x39e   : > { %12358 = vst [vmem:[#allocation23_spill] sm:$0xff] %v10048_v6  ;;  %v2788_v13 = vcombine.high %v2702_v45, %v2702_v45  ;;  %v8061_v61 = vpop.f32.mrb[22].mxu1  ;;  %6609 = vrot.lane.b32.xlu1 %v10048_v6, %s8539_s22  ;;  %v10051_v7 = vpop.f32.mrb[33].mxu0  ;;  %v2795_v50 = vrot.slane %v2702_v45, %v9101_v18 }
 0x39f   : > { %v2935_v36 = vcombine.high %v8061_v61, %v8061_v61  ;;  %v2705_v49 = vpop.f32.mrb[23].mxu1  ;;  %6605 = vrot.lane.b32.xlu0 %v10051_v7, %s8539_s22  ;;  %v10054_v16 = vpop.f32.mrb[34].mxu0  ;;  %v2942_v32 = vrot.slane %v8061_v61, %v9101_v18  ;;  %v2900_v48 = vrot.slane %v2886_v24, %v9101_v18  ;;  %v2901_v15 = vcombine.high %v2893_v4, %v2893_v4 }
 0x3a0   : > { %12359 = vst [vmem:[#allocation18_spill] sm:$0xff] %v10054_v16  ;;  %v10059_v9 = vpop.f32.mrb[35].mxu0  ;;  %v2802_v56 = vrot.slane %v2788_v13, %v9101_v18  ;;  %v2803_v41 = vcombine.high %v2795_v50, %v2795_v50  ;;  %v2837_v26 = vcombine.high %v2705_v49, %v2705_v49  ;;  %v2844_v22 = vrot.slane %v2705_v49, %v9101_v18 }
 0x3a1   : > { %12360 = vst [vmem:[#allocation28_spill] sm:$0xff] %v10059_v9  ;;  %v2949_v3 = vrot.slane %v2935_v36, %v9101_v18  ;;  %v2950_v37 = vcombine.high %v2942_v32, %v2942_v32  ;;  %v2902_v28 = vcombine.high %v2900_v48, %v2900_v48  ;;  %v10066_v34 = vrot.slane %v2942_v32, %v9101_v18 }
 0x3a2   : > { %6607 = vrot.lane.b32.xlu1 %v10059_v9, %s8539_s22  ;;  %v2804_v46 = vcombine.high %v2802_v56, %v2802_v56  ;;  %v10077_v31 = vrot.slane %v2893_v4, %v9101_v18  ;;  %v10080_v23 = vrot.slane %v2900_v48, %v9101_v18  ;;  %v10083_v43 = vrot.slane %v2795_v50, %v9101_v18 }
 0x3a3   : > { %v2951_v5 = vcombine.high %v2949_v3, %v2949_v3  ;;  %12361 = vst [vmem:[#allocation12_spill] sm:$0xff] %v10066_v34  ;;  %v10069_v1 = vrot.slane %v2949_v3, %v9101_v18  ;;  %v10072_v19 = vrot.slane %v2950_v37, %v9101_v18  ;;  %v10087_v24 = vcombine.high %v10066_v34, %v10066_v34 }
 0x3a4   : > { %v8064_v59 = vpop.f32.mrb[24].mxu1  ;;  %v10090_v13 = vrot.slane %v2901_v15, %v9101_v18  ;;  %v2851_v49 = vrot.slane %v2837_v26, %v9101_v18  ;;  %v10101_v4 = vrot.slane %v2902_v28, %v9101_v18  ;;  %v10104_v50 = vrot.slane %v2802_v56, %v9101_v18 }
 0x3a5   : > { %v2718_v54 = vpop.f32.mrb[25].mxu1  ;;  %v10093_v61 = vrot.slane %v2951_v5, %v9101_v18  ;;  %v10097_v36 = vcombine.high %v10072_v19, %v10072_v19  ;;  %v10107_v32 = vrot.slane %v2803_v41, %v9101_v18  ;;  %v10110_v48 = vrot.slane %v2804_v46, %v9101_v18 }
 0x3a6   : > { %6611 = vrot.lane.b32.xlu1 %v10054_v16, %s8539_s22  ;;  %v8065_v63 = vpop.f32.mrb[26].mxu1  ;;  %v10114_v3 = vcombine.high %v10069_v1, %v10069_v1  ;;  %v2852_v15 = vcombine.high %v2844_v22, %v2844_v22  ;;  %v2853_v37 = vcombine.high %v2851_v49, %v2851_v49  ;;  %v10117_v5 = vrot.slane %v8064_v59, %v9101_v18 }
 0x3a7   : > { %v2721_v45 = vpop.f32.mrb[27].mxu1  ;;  %v3315_v28 = vcombine.low %v10072_v19, %v10087_v24  ;;  %v10122_v56 = vrot.slane %v2844_v22, %v9101_v18  ;;  %v2984_v41 = vcombine.high %v2718_v54, %v2718_v54  ;;  %v2991_v26 = vrot.slane %v2718_v54, %v9101_v18 }
 0x3a8   : > { %v3316_v46 = vcombine.low %v10097_v36, %v10069_v1  ;;  %v10128_v63 = vrot.slane %v2851_v49, %v9101_v18  ;;  %v10132_v44 = vcombine.high %v10093_v61, %v10093_v61  ;;  %v3033_v59 = vcombine.high %v2721_v45, %v2721_v45 }
 0x3a9   : > { %v2998_v55 = vrot.slane %v2984_v41, %v9101_v18  ;;  %v2999_v21 = vcombine.high %v2991_v26, %v2991_v26  ;;  %v10136_v22 = vrot.slane %v2991_v26, %v9101_v18  ;;  %v3040_v42 = vrot.slane %v2721_v45, %v9101_v18 }
 0x3aa   : > { %v10140_v54 = vrot.slane %v2852_v15, %v9101_v18  ;;  %v10143_v17 = vrot.slane %v2853_v37, %v9101_v18  ;;  %v3047_v49 = vrot.slane %v3033_v59, %v9101_v18  ;;  %v3154_v20 = vcombine.low %v10083_v43, %v10107_v32 }
 0x3ab   : > { %v3000_v35 = vcombine.high %v2998_v55, %v2998_v55  ;;  %v10149_v41 = vrot.slane %v2998_v55, %v9101_v18  ;;  %v10152_v26 = vrot.slane %v2999_v21, %v9101_v18  ;;  %v10156_v45 = vcombine.high %v10136_v22, %v10136_v22 }
 0x3ac   : > { %v3048_v15 = vcombine.high %v3040_v42, %v3040_v42  ;;  %v3049_v10 = vcombine.high %v3047_v49, %v3047_v49  ;;  %v10159_v37 = vrot.slane %v3040_v42, %v9101_v18  ;;  %v7798_v59 = vcombine.high %v10083_v43, %v10107_v32 }
 0x3ad   : > { %v10164_v11 = vrot.slane %v3000_v35, %v9101_v18  ;;  %v10168_v55 = vcombine.high %v10149_v41, %v10149_v41  ;;  %v10172_v21 = vcombine.high %v10152_v26, %v10152_v26  ;;  %v3318_v39 = vcombine.low %v10132_v44, %v10136_v22 }
 0x3ae   : > { %v10177_v42 = vrot.slane %v3047_v49, %v9101_v18  ;;  %v10180_v57 = vrot.slane %v3048_v15, %v9101_v18  ;;  %v10183_v35 = vrot.slane %v3049_v10, %v9101_v18  ;;  %v10187_v25 = vcombine.high %v10159_v37, %v10159_v37 }
 0x3af   : > { %v3364_v47 = vcombine.low %v10152_v26, %v10156_v45  ;;  %v10193_v30 = vcombine.high %v10164_v11, %v10164_v11  ;;  %v3156_v49 = vcombine.low %v10104_v50, %v10110_v48  ;;  %v7799_v15 = vcombine.high %v10104_v50, %v10110_v48 }
 0x3b0   : > { %12362 = vst [vmem:[#allocation22_spill] sm:$0xff] %v10177_v42  ;;  %12363 = vst [vmem:[#allocation17_spill] sm:$0xff] %v10183_v35  ;;  %v3365_v10 = vcombine.low %v10172_v21, %v10149_v41  ;;  %v10203_v14 = vcombine.high %v10177_v42, %v10177_v42  ;;  %v10207_v2 = vcombine.high %v10180_v57, %v10180_v57 }
 0x3b1   : > { %12364 = vst [vmem:[#allocation27_spill] sm:$0xff] %v10187_v25  ;;  %v10211_v53 = vcombine.high %v10183_v35, %v10183_v35  ;;  %v3367_v62 = vcombine.low %v10193_v30, %v10159_v37  ;;  %v3164_v12 = vrot.slane %v3154_v20, %v9101_v18  ;;  %v3171_v40 = vrot.slane %v7798_v59, %v9101_v18 }
 0x3b2   : > { %12365 = vst [vmem:[#allocation8_spill] sm:$0xff] %v10203_v14  ;;  %v3178_v29 = vrot.slane %v3156_v49, %v9101_v18  ;;  %v3413_v38 = vcombine.low %v10180_v57, %v10187_v25  ;;  %v3185_v8 = vrot.slane %v7799_v15, %v9101_v18  ;;  %v3317_v52 = vcombine.low %v10093_v61, %v10114_v3 }
 0x3b3   : > { %12366 = vst [vmem:[#allocation34_spill] sm:$0xff] %v10211_v53  ;;  %v3325_v0 = vrot.slane %v3315_v28, %v9101_v18  ;;  %v3186_v58 = vcombine.low %v3164_v12, %v3171_v40  ;;  %v3332_v33 = vrot.slane %v3316_v46, %v9101_v18  ;;  %v3346_v20 = vrot.slane %v3318_v39, %v9101_v18 }
 0x3b4   : > { %v3366_v59 = vcombine.low %v10164_v11, %v10168_v55  ;;  %v3414_v49 = vcombine.low %v10207_v2, %v10177_v42  ;;  %v3187_v27 = vcombine.low %v3178_v29, %v3185_v8  ;;  %v3339_v51 = vrot.slane %v3317_v52, %v9101_v18 }
 0x3b5   : > { %v3381_v15 = vrot.slane %v3365_v10, %v9101_v18  ;;  %v3347_v60 = vcombine.low %v3325_v0, %v3332_v33  ;;  %v3374_v25 = vrot.slane %v3364_v47, %v9101_v18  ;;  %v3395_v40 = vrot.slane %v3367_v62, %v9101_v18 }
 0x3b6   : > { %v3388_v12 = vrot.slane %v3366_v59, %v9101_v18  ;;  %v3194_v39 = vrot.slane %v3186_v58, %v9101_v18  ;;  %v3201_v28 = vrot.slane %v3187_v27, %v9101_v18  ;;  %v3348_v46 = vcombine.low %v3339_v51, %v3346_v20 }
 0x3b7   : > { %v3203_v42 = vcombine.low %v10122_v56, %v10140_v54  ;;  %v3396_v8 = vcombine.low %v3374_v25, %v3381_v15  ;;  %v7800_v52 = vcombine.high %v10122_v56, %v10140_v54  ;;  %v3205_v0 = vcombine.low %v10128_v63, %v10143_v17 }
 0x3b8   : > { %v3397_v29 = vcombine.low %v3388_v12, %v3395_v40  ;;  %v3202_v33 = vcombine.low %v3194_v39, %v3201_v28  ;;  %v3355_v47 = vrot.slane %v3347_v60, %v9101_v18  ;;  %v3362_v62 = vrot.slane %v3348_v46, %v9101_v18 }
 0x3b9   : > { %v7801_v58 = vcombine.high %v10128_v63, %v10143_v17  ;;  %v3213_v27 = vrot.slane %v3203_v42, %v9101_v18  ;;  %v3220_v25 = vrot.slane %v7800_v52, %v9101_v18  ;;  %v3227_v10 = vrot.slane %v3205_v0, %v9101_v18 }
 0x3ba   : > { %v3411_v51 = vrot.slane %v3397_v29, %v9101_v18  ;;  %v3485_v20 = vsel %vm3484_vm6, %v3202_v33, 0.0  ;;  %v3363_v59 = vcombine.low %v3355_v47, %v3362_v62  ;;  %v3252_v60 = vcombine.low %v10077_v31, %v10090_v13 }
 0x3bb   : > { %v3234_v15 = vrot.slane %v7801_v58, %v9101_v18  ;;  %v3404_v12 = vrot.slane %v3396_v8, %v9101_v18  ;;  %v3235_v40 = vcombine.low %v3213_v27, %v3220_v25  ;;  %v7802_v39 = vcombine.high %v10077_v31, %v10090_v13 }
 0x3bc   : > { %v3254_v42 = vcombine.low %v10080_v23, %v10101_v4  ;;  %v10262_v28 = vrot.slane %v10117_v5, %v9101_v18  ;;  %v7803_v29 = vcombine.high %v10080_v23, %v10101_v4  ;;  %v3262_v52 = vrot.slane %v3252_v60, %v9101_v18 }
 0x3bd   : > { %v3236_v46 = vcombine.low %v3227_v10, %v3234_v15  ;;  %v3498_v0 = vsel %vm3484_vm6, %v3363_v59, 0.0  ;;  %v3412_v8 = vcombine.low %v3404_v12, %v3411_v51  ;;  %v3269_v33 = vrot.slane %v7802_v39, %v9101_v18 }
 0x3be   : > { %3486 = vadd.xlane.f32.xlu0 %v3485_v20  ;;  %12367 = vst [vmem:[#allocation39_spill] sm:$0xff] %v10262_v28  ;;  %v3276_v47 = vrot.slane %v3254_v42, %v9101_v18  ;;  %v3243_v62 = vrot.slane %v3235_v40, %v9101_v18  ;;  %v3283_v27 = vrot.slane %v7803_v29, %v9101_v18 }
 0x3bf   : > { %v3250_v58 = vrot.slane %v3236_v46, %v9101_v18  ;;  %v3415_v25 = vcombine.low %v10183_v35, %v10203_v14  ;;  %v3284_v10 = vcombine.low %v3262_v52, %v3269_v33  ;;  %v3416_v20 = vcombine.low %v10211_v53, %v10262_v28 }
 0x3c0   : > { %v3423_v51 = vrot.slane %v3413_v38, %v9101_v18  ;;  %v3430_v59 = vrot.slane %v3414_v49, %v9101_v18  ;;  %v3285_v15 = vcombine.low %v3276_v47, %v3283_v27  ;;  %v3501_v42 = vsel %vm3484_vm6, %v3412_v8, 0.0 }
 0x3c1   : > { %v3251_v60 = vcombine.low %v3243_v62, %v3250_v58  ;;  %v3437_v12 = vrot.slane %v3415_v25, %v9101_v18  ;;  %v3444_v40 = vrot.slane %v3416_v20, %v9101_v18  ;;  %v3292_v46 = vrot.slane %v3284_v10, %v9101_v18 }
 0x3c2   : > { %3499 = vadd.xlane.f32.xlu0 %v3498_v0  ;;  %v3445_v39 = vcombine.low %v3423_v51, %v3430_v59  ;;  %v3299_v29 = vrot.slane %v3285_v15, %v9101_v18  ;;  %v3089_v38 = vcombine.high %v10117_v5, %v10117_v5  ;;  %v6617_v25 = vsel %vm3484_vm6, %v10051_v7, 0.0 }
 0x3c3   : > { %v3446_v52 = vcombine.low %v3437_v12, %v3444_v40  ;;  %v3488_v49 = vsel %vm3484_vm6, %v3251_v60, 0.0  ;;  %v3307_v5 = vrot.slane %v10066_v34, %v9101_v18  ;;  %v6620_v10 = vsel %vm3484_vm6, %v10059_v9, 0.0 }
 0x3c4   : > { %v3300_v0 = vcombine.low %v3292_v46, %v3299_v29  ;;  %v3453_v33 = vrot.slane %v3445_v39, %v9101_v18  ;;  %v10291_v58 = vrot.slane %v3089_v38, %v9101_v18  ;;  %v6623_v51 = vsel %vm3484_vm6, %v10048_v6, 0.0 }
 0x3c5   : > { %v3460_v47 = vrot.slane %v3446_v52, %v9101_v18  ;;  %v3314_v59 = vrot.slane %v3307_v5, %v9101_v18  ;;  %v6626_v15 = vsel %vm3494_vm7, %v10054_v16, 0.0  ;;  %v12384_v53 = vcombine.high %v10077_v31, %v10077_v31 }
 0x3c6   : > { %3502 = vadd.xlane.f32.xlu0 %v3501_v42  ;;  %v3491_v62 = vsel %vm3484_vm6, %v3300_v0, 0.0  ;;  %12368 = vst [vmem:[#allocation2_spill] sm:$0xff] %v10291_v58  ;;  %v3468_v20 = vrot.slane %v10291_v58, %v9101_v18 }
 0x3c7   : > { %v3461_v8 = vcombine.low %v3453_v33, %v3460_v47  ;;  %v3495_v12 = vsel %vm3494_vm7, %v3314_v59, 0.0  ;;  %v12373_v33 = vld [vmem:[#allocation6_spill] sm:$0xff] }
 0x3c8   : > { %v3475_v60 = vrot.slane %v3468_v20, %v9101_v18  ;;  %v10327_v47 = vsub.s32 0, %v12373_v33  ;;  %v10339_v5 = vsub.s32 4, %v12373_v33  ;;  %v10345_v20 = vsub.s32 6, %v12373_v33 }
 0x3c9   : > { %v3504_v27 = vsel %vm3484_vm6, %v3461_v8, 0.0  ;;  %v10333_v8 = vsub.s32 2, %v12373_v33 }
 0x3ca   : > { %3489 = vadd.xlane.f32.xlu1 %v3488_v49  ;;  %3492 = vadd.xlane.f32.xlu0 %v3491_v62  ;;  %v3507_v40 = vsel %vm3494_vm7, %v3475_v60, 0.0  ;;  %v10330_v62 = vsub.s32 1, %v12373_v33  ;;  %v2833_v60 = vcombine.high %v10083_v43, %v10083_v43 }
 0x3ce   : > { %3505 = vadd.xlane.f32.xlu1 %v3504_v27  ;;  %6618 = vadd.xlane.f32.xlu0 %v6617_v25  ;;  %v10336_v27 = vsub.s32 3, %v12373_v33 }
 0x3d2   : > { %6621 = vadd.xlane.f32.xlu1 %v6620_v10  ;;  %6624 = vadd.xlane.f32.xlu0 %v6623_v51  ;;  %v10342_v10 = vsub.s32 5, %v12373_v33  ;;  %v10348_v51 = vsub.s32 7, %v12373_v33 }
 0x3d6   : > { %6627 = vadd.xlane.f32.xlu1 %v6626_v15  ;;  %3496 = vadd.xlane.f32.xlu0 %v3495_v12  ;;  %v2834_v12 = vcombine.high %v10104_v50, %v10104_v50 }
 0x3da   : > { %3508 = vadd.xlane.f32.xlu1 %v3507_v40  ;;  %v2835_v40 = vcombine.high %v10107_v32, %v10107_v32 }
 0x410   : > { %v10310_v39 = vpop.permute.xlu1 %6609 }
 0x411   : > { %12369 = vst [vmem:[#allocation7_spill] sm:$0xff] %v10310_v39  ;;  %v10312_v42 = vpop.permute.xlu0 %6605  ;;  %v6635_v0 = vsel %vm3484_vm6, %v10310_v39, 0.0 }
 0x412   : > { %12370 = vst [vmem:[#allocation33_spill] sm:$0xff] %v10312_v42  ;;  %v6629_v46 = vsel %vm3484_vm6, %v10312_v42, 0.0 }
 0x413   : > { %6630 = vadd.xlane.f32.xlu0 %v6629_v46 }
 0x414   : > { %v10316_v29 = vpop.permute.xlu1 %6607 }
 0x415   : > { %12371 = vst [vmem:[#allocation38_spill] sm:$0xff] %v10316_v29  ;;  %v6632_v52 = vsel %vm3484_vm6, %v10316_v29, 0.0  ;;  %v2836_v29 = vcombine.high %v10110_v48, %v10110_v48 }
 0x416   : > { %6633 = vadd.xlane.f32.xlu1 %v6632_v52 }
 0x417   : > { %6636 = vadd.xlane.f32.xlu0 %v6635_v0 }
 0x418   : > { %v10322_v38 = vpop.permute.xlu1 %6611 }
 0x419   : > { %12372 = vst [vmem:[#allocation43_spill] sm:$0xff] %v10322_v38  ;;  %v6638_v49 = vsel %vm3494_vm7, %v10322_v38, 0.0 }
 0x41a   : > { %6639 = vadd.xlane.f32.xlu1 %v6638_v49 }
 0x44b   : > { %v3487_v25 = vpop.xlane.xlu0 %3486 }
 0x44c   : > { %v3511_v59 = vmul.f32 0.04, %v3487_v25 }
 0x44e   : > { %v3530_v46 = vrot.slane %v3511_v59, %v10327_v47  ;;  %v3534_v52 = vrot.slane %v3511_v59, %v10330_v62  ;;  %v3538_v0 = vrot.slane %v3511_v59, %v10333_v8  ;;  %v3542_v49 = vrot.slane %v3511_v59, %v10336_v27 }
 0x44f   : > { %v3500_v33 = vpop.xlane.xlu0 %3499  ;;  %v3546_v25 = vrot.slane %v3511_v59, %v10339_v5  ;;  %v3550_v15 = vrot.slane %v3511_v59, %v10342_v10  ;;  %v3554_v38 = vrot.slane %v3511_v59, %v10345_v20  ;;  %v3558_v39 = vrot.slane %v3511_v59, %v10348_v51 }
 0x450   : > { %v10369_v42 = vsub.f32 %v10083_v43, %v3530_v46  ;;  %v10372_v16 = vsub.f32 %v10107_v32, %v3534_v52  ;;  %v10374_v58 = vsub.f32 %v2833_v60, %v3538_v0  ;;  %v10376_v9 = vsub.f32 %v2835_v40, %v3542_v49 }
 0x451   : > { %v10379_v6 = vsub.f32 %v10104_v50, %v3546_v25  ;;  %v10382_v34 = vsub.f32 %v10110_v48, %v3550_v15  ;;  %v10384_v59 = vsub.f32 %v2834_v12, %v3554_v38  ;;  %v10386_v28 = vsub.f32 %v2836_v29, %v3558_v39 }
 0x452   : > { %12374 = vst [vmem:[#allocation15_spill] sm:$0xff] %v10369_v42  ;;  %12375 = vst [vmem:[#allocation25_spill] sm:$0xff] %v10372_v16  ;;  %v3827_v43 = vmul.f32 %v10369_v42, %v10369_v42  ;;  %v3828_v32 = vmul.f32 %v10372_v16, %v10372_v16  ;;  %v3829_v60 = vmul.f32 %v10374_v58, %v10374_v58  ;;  %v10394_v40 = vmul.f32 0.04, %v3500_v33 }
 0x453   : > { %12376 = vst [vmem:[#allocation6_spill] sm:$0xff] %v10374_v58  ;;  %12377 = vst [vmem:[#allocation63_spill] sm:$0xff] %v10376_v9  ;;  %v3503_v50 = vpop.xlane.xlu0 %3502  ;;  %v3830_v48 = vmul.f32 %v10376_v9, %v10376_v9  ;;  %v3831_v38 = vmul.f32 %v10379_v6, %v10379_v6  ;;  %v3832_v39 = vmul.f32 %v10382_v34, %v10382_v34 }
 0x454   : > { %12378 = vst [vmem:[#allocation64_spill] sm:$0xff] %v10379_v6  ;;  %12379 = vst [vmem:[#allocation65_spill] sm:$0xff] %v10382_v34  ;;  %v10402_v29 = vmul.f32 0.04, %v3503_v50  ;;  %v3833_v15 = vmul.f32 %v10384_v59, %v10384_v59  ;;  %v3834_v12 = vmul.f32 %v10386_v28, %v10386_v28  ;;  %v3927_v46 = vcombine.low %v3827_v43, %v3828_v32 }
 0x455   : > { %12380 = vst [vmem:[#allocation66_spill] sm:$0xff] %v10384_v59  ;;  %12381 = vst [vmem:[#allocation67_spill] sm:$0xff] %v10386_v28  ;;  %v2932_v52 = vcombine.high %v10080_v23, %v10080_v23  ;;  %v2933_v0 = vcombine.high %v10090_v13, %v10090_v13  ;;  %v3928_v49 = vcombine.low %v3829_v60, %v3830_v48 }
 0x456   : > { %v3929_v33 = vcombine.low %v3831_v38, %v3832_v39  ;;  %v2934_v25 = vcombine.high %v10101_v4, %v10101_v4  ;;  %v3930_v50 = vcombine.low %v3833_v15, %v3834_v12  ;;  %v10429_v59 = vrot.slane %v3927_v46, %v9101_v18 }
 0x457   : > { %v3490_v32 = vpop.xlane.xlu1 %3489  ;;  %v3493_v34 = vpop.xlane.xlu0 %3492  ;;  %v10436_v28 = vrot.slane %v3928_v49, %v9101_v18 }
 0x458   : > { %v3513_v39 = vmul.f32 0.04, %v3493_v34  ;;  %v10433_v6 = vmul.f32 0.04, %v3490_v32  ;;  %v10439_v60 = vrot.slane %v3929_v33, %v9101_v18  ;;  %v10460_v42 = vrot.slane %v3930_v50, %v9101_v18 }
 0x45a   : > { %v3594_v34 = vrot.slane %v3513_v39, %v10327_v47  ;;  %v3598_v15 = vrot.slane %v3513_v39, %v10330_v62  ;;  %v3602_v12 = vrot.slane %v3513_v39, %v10333_v8  ;;  %v3606_v46 = vrot.slane %v3513_v39, %v10336_v27 }
 0x45b   : > { %v3506_v38 = vpop.xlane.xlu1 %3505  ;;  %v6619_v32 = vpop.xlane.xlu0 %6618  ;;  %v3610_v43 = vrot.slane %v3513_v39, %v10339_v5  ;;  %v3614_v49 = vrot.slane %v3513_v39, %v10342_v10  ;;  %v3618_v33 = vrot.slane %v3513_v39, %v10345_v20  ;;  %v3622_v48 = vrot.slane %v3513_v39, %v10348_v51 }
 0x45c   : > { %v10454_v58 = vsub.f32 %v10077_v31, %v3594_v34  ;;  %v10457_v16 = vsub.f32 %v10090_v13, %v3598_v15  ;;  %v10465_v14 = vsub.f32 %v12384_v53, %v3602_v12  ;;  %v10467_v35 = vsub.f32 %v2933_v0, %v3606_v46 }
 0x45d   : > { %v10470_v9 = vsub.f32 %v10080_v23, %v3610_v43  ;;  %v10473_v39 = vsub.f32 %v10101_v4, %v3614_v49  ;;  %v10477_v13 = vsub.f32 %v2932_v52, %v3618_v33  ;;  %v10479_v15 = vsub.f32 %v2934_v25, %v3622_v48 }
 0x45e   : > { %12382 = vst [vmem:[#allocation68_spill] sm:$0xff] %v10454_v58  ;;  %12383 = vst [vmem:[#allocation69_spill] sm:$0xff] %v10457_v16  ;;  %v3843_v50 = vmul.f32 %v10454_v58, %v10454_v58  ;;  %v3844_v23 = vmul.f32 %v10457_v16, %v10457_v16  ;;  %v3845_v4 = vmul.f32 %v10465_v14, %v10465_v14  ;;  %v6641_v53 = vmul.f32 0.04, %v6619_v32 }
 0x45f   : > { %12385 = vst [vmem:[#allocation70_spill] sm:$0xff] %v10465_v14  ;;  %12386 = vst [vmem:[#allocation71_spill] sm:$0xff] %v10467_v35  ;;  %v10475_v34 = vpop.xlane.xlu1 %6621  ;;  %v6625_v31 = vpop.xlane.xlu0 %6624  ;;  %v3846_v0 = vmul.f32 %v10467_v35, %v10467_v35  ;;  %v3847_v25 = vmul.f32 %v10470_v9, %v10470_v9  ;;  %v3848_v43 = vmul.f32 %v10473_v39, %v10473_v39 }
 0x460   : > { %12387 = vst [vmem:[#allocation72_spill] sm:$0xff] %v10470_v9  ;;  %12388 = vst [vmem:[#allocation73_spill] sm:$0xff] %v10473_v39  ;;  %v3849_v48 = vmul.f32 %v10477_v13, %v10477_v13  ;;  %v3562_v12 = vrot.slane %v10433_v6, %v10327_v47  ;;  %v3850_v46 = vmul.f32 %v10479_v15, %v10479_v15 }
 0x461   : > { %12389 = vst [vmem:[#allocation74_spill] sm:$0xff] %v10477_v13  ;;  %12390 = vst [vmem:[#allocation75_spill] sm:$0xff] %v10479_v15  ;;  %v4025_v49 = vcombine.low %v3843_v50, %v3844_v23  ;;  %v4026_v33 = vcombine.low %v3845_v4, %v3846_v0  ;;  %v3566_v52 = vrot.slane %v10433_v6, %v10330_v62 }
 0x462   : > { %v4027_v9 = vcombine.low %v3847_v25, %v3848_v43  ;;  %v3570_v39 = vrot.slane %v10433_v6, %v10333_v8  ;;  %v3574_v13 = vrot.slane %v10433_v6, %v10336_v27  ;;  %v4028_v16 = vcombine.low %v3849_v48, %v3850_v46 }
 0x463   : > { %v10505_v35 = vpop.xlane.xlu1 %6627  ;;  %v3497_v14 = vpop.xlane.xlu0 %3496  ;;  %v4035_v58 = vrot.slane %v4025_v49, %v9101_v18  ;;  %v4042_v50 = vrot.slane %v4026_v33, %v9101_v18  ;;  %v3578_v23 = vrot.slane %v10433_v6, %v10339_v5  ;;  %v3582_v4 = vrot.slane %v10433_v6, %v10342_v10 }
 0x464   : > { %12391 = vst [vmem:[#allocation76_spill] sm:$0xff] %v10505_v35  ;;  %v4049_v32 = vrot.slane %v4027_v9, %v9101_v18  ;;  %v3586_v0 = vrot.slane %v10433_v6, %v10345_v20  ;;  %v3590_v25 = vrot.slane %v10433_v6, %v10348_v51  ;;  %v10522_v43 = vmul.f32 0.04, %v3497_v14 }
 0x465   : > { %v4056_v48 = vrot.slane %v4028_v16, %v9101_v18  ;;  %v4057_v46 = vcombine.low %v4035_v58, %v4042_v50  ;;  %v10526_v49 = vsub.f32 %v10122_v56, %v3562_v12  ;;  %v10528_v33 = vmul.f32 0.04, %v3506_v38 }
 0x466   : > { %v10531_v9 = vsub.f32 %v10140_v54, %v3566_v52  ;;  %v12392_v15 = vcombine.high %v10122_v56, %v10122_v56  ;;  %v12393_v14 = vcombine.high %v10140_v54, %v10140_v54  ;;  %v10544_v16 = vsub.f32 %v10051_v7, %v6641_v53 }
 0x467   : > { %v4058_v58 = vcombine.low %v4049_v32, %v4056_v48  ;;  %v4065_v38 = vrot.slane %v4057_v46, %v9101_v18  ;;  %v10548_v12 = vsub.f32 %v10128_v63, %v3578_v23  ;;  %v10550_v52 = vmul.f32 0.04, %v6625_v31  ;;  %v3509_v50 = vpop.xlane.xlu1 %3508 }
 0x468   : > { %v10536_v35 = vsub.f32 %v12392_v15, %v3570_v39  ;;  %v10541_v6 = vsub.f32 %v12393_v14, %v3574_v13  ;;  %v10553_v56 = vsub.f32 %v10143_v17, %v3582_v4  ;;  %v12395_v54 = vcombine.high %v10128_v63, %v10128_v63 }
 0x469   : > { %12394 = vst [vmem:[#allocation77_spill] sm:$0xff] %v10548_v12  ;;  %v12396_v7 = vcombine.high %v10143_v17, %v10143_v17  ;;  %v4072_v53 = vrot.slane %v4058_v58, %v9101_v18  ;;  %v3835_v31 = vmul.f32 %v10526_v49, %v10526_v49  ;;  %v3836_v23 = vmul.f32 %v10531_v9, %v10531_v9 }
 0x46a   : > { %v10558_v39 = vsub.f32 %v12395_v54, %v3586_v0  ;;  %v3837_v63 = vmul.f32 %v10536_v35, %v10536_v35  ;;  %v3838_v32 = vmul.f32 %v10541_v6, %v10541_v6  ;;  %v3839_v17 = vmul.f32 %v10548_v12, %v10548_v12 }
 0x46b   : > { %v10563_v13 = vsub.f32 %v12396_v7, %v3590_v25  ;;  %v3840_v4 = vmul.f32 %v10553_v56, %v10553_v56  ;;  %v10580_v0 = vmul.f32 0.04, %v3509_v50  ;;  %v4073_v25 = vcombine.low %v4065_v38, %v4072_v53 }
 0x46c   : > { %v3841_v48 = vmul.f32 %v10558_v39, %v10558_v39  ;;  %v3976_v14 = vcombine.low %v3835_v31, %v3836_v23  ;;  %v3977_v58 = vcombine.low %v3837_v63, %v3838_v32  ;;  %v3959_v7 = vcombine.low %v10429_v59, %v10436_v28 }
 0x46d   : > { %12397 = vst [vmem:[#allocation78_spill] sm:$0xff] %v10563_v13  ;;  %v3842_v46 = vmul.f32 %v10563_v13, %v10563_v13  ;;  %v3978_v54 = vcombine.low %v3839_v17, %v3840_v4  ;;  %v4263_v15 = vsel %vm3484_vm6, %v4073_v25, 0.0  ;;  %v3960_v50 = vcombine.low %v10439_v60, %v10460_v42 }
 0x46e   : > { %v3682_v38 = vrot.slane %v10402_v29, %v10342_v10  ;;  %4264 = vadd.xlane.f32.xlu0 %v4263_v15  ;;  %v3986_v53 = vrot.slane %v3976_v14, %v9101_v18  ;;  %v3993_v13 = vrot.slane %v3977_v58, %v9101_v18  ;;  %v3967_v23 = vrot.slane %v3959_v7, %v9101_v18 }
 0x46f   : > { %v3979_v12 = vcombine.low %v3841_v48, %v3842_v46  ;;  %v4000_v31 = vrot.slane %v3978_v54, %v9101_v18  ;;  %v3974_v59 = vrot.slane %v3960_v50, %v9101_v18  ;;  %v3686_v63 = vrot.slane %v10402_v29, %v10345_v20 }
 0x470   : > { %v3690_v42 = vrot.slane %v10402_v29, %v10348_v51  ;;  %v4008_v60 = vcombine.low %v3986_v53, %v3993_v13  ;;  %v12398_v15 = vrot.slane %v10402_v29, %v10327_v47  ;;  %v12399_v17 = vrot.slane %v10402_v29, %v10330_v62 }
 0x471   : > { %v4007_v28 = vrot.slane %v3979_v12, %v9101_v18  ;;  %v12400_v4 = vrot.slane %v10402_v29, %v10333_v8  ;;  %v3975_v13 = vcombine.low %v3967_v23, %v3974_v59  ;;  %v12401_v46 = vrot.slane %v10402_v29, %v10336_v27 }
 0x472   : > { %v10607_v32 = vsub.f32 %v10152_v26, %v12398_v15  ;;  %v10613_v12 = vsub.f32 %v10156_v45, %v12399_v17  ;;  %v12402_v14 = vrot.slane %v10402_v29, %v10339_v5  ;;  %v4016_v58 = vrot.slane %v4008_v60, %v9101_v18 }
 0x473   : > { %v10619_v25 = vsub.f32 %v10172_v21, %v12400_v4  ;;  %v4009_v48 = vcombine.low %v4000_v31, %v4007_v28  ;;  %v10625_v26 = vsub.f32 %v10149_v41, %v12401_v46  ;;  %v10635_v54 = vsub.f32 %v10168_v55, %v3682_v38 }
 0x474   : > { %v10631_v45 = vsub.f32 %v10164_v11, %v12402_v14  ;;  %v10638_v21 = vsub.f32 %v10193_v30, %v3686_v63  ;;  %v10641_v7 = vsub.f32 %v10159_v37, %v3690_v42  ;;  %v4257_v50 = vsel %vm3484_vm6, %v3975_v13, 0.0 }
 0x475   : > { %v4023_v41 = vrot.slane %v4009_v48, %v9101_v18  ;;  %v3860_v29 = vmul.f32 %v10607_v32, %v10607_v32  ;;  %v3861_v11 = vmul.f32 %v10613_v12, %v10613_v12  ;;  %4258 = vadd.xlane.f32.xlu0 %v4257_v50  ;;  %v3862_v55 = vmul.f32 %v10619_v25, %v10619_v25 }
 0x476   : > { %v3863_v30 = vmul.f32 %v10625_v26, %v10625_v26  ;;  %v3864_v37 = vmul.f32 %v10631_v45, %v10631_v45  ;;  %v3865_v38 = vmul.f32 %v10635_v54, %v10635_v54  ;;  %v3866_v31 = vmul.f32 %v10638_v21, %v10638_v21 }
 0x477   : > { %v4024_v53 = vcombine.low %v4016_v58, %v4023_v41  ;;  %v3867_v23 = vmul.f32 %v10641_v7, %v10641_v7  ;;  %v4137_v28 = vcombine.low %v3860_v29, %v3861_v11  ;;  %v3642_v42 = vrot.slane %v10394_v40, %v10336_v27 }
 0x478   : > { %v4138_v59 = vcombine.low %v3862_v55, %v3863_v30  ;;  %v4139_v63 = vcombine.low %v3864_v37, %v3865_v38  ;;  %v3646_v60 = vrot.slane %v10394_v40, %v10339_v5  ;;  %v3650_v48 = vrot.slane %v10394_v40, %v10342_v10 }
 0x479   : > { %v4260_v15 = vsel %vm3484_vm6, %v4024_v53, 0.0  ;;  %v4140_v17 = vcombine.low %v3866_v31, %v3867_v23  ;;  %v4147_v4 = vrot.slane %v4137_v28, %v9101_v18  ;;  %v3654_v14 = vrot.slane %v10394_v40, %v10345_v20 }
 0x47a   : > { %4261 = vadd.xlane.f32.xlu1 %v4260_v15  ;;  %v4154_v13 = vrot.slane %v4138_v59, %v9101_v18  ;;  %v4161_v46 = vrot.slane %v4139_v63, %v9101_v18  ;;  %v3658_v58 = vrot.slane %v10394_v40, %v10348_v51  ;;  %v12403_v50 = vrot.slane %v10394_v40, %v10327_v47 }
 0x47b   : > { %v4168_v41 = vrot.slane %v4140_v17, %v9101_v18  ;;  %v12404_v11 = vrot.slane %v10394_v40, %v10330_v62  ;;  %v12405_v30 = vrot.slane %v10394_v40, %v10333_v8  ;;  %v10695_v53 = vsub.f32 %v10069_v1, %v3642_v42 }
 0x47c   : > { %v10680_v29 = vsub.f32 %v10072_v19, %v12403_v50  ;;  %v4169_v38 = vcombine.low %v4147_v4, %v4154_v13  ;;  %v10698_v31 = vsub.f32 %v10093_v61, %v3646_v60  ;;  %v10701_v19 = vsub.f32 %v10114_v3, %v3650_v48 }
 0x47d   : > { %v10686_v55 = vsub.f32 %v10087_v24, %v12404_v11  ;;  %v10692_v37 = vsub.f32 %v10097_v36, %v12405_v30  ;;  %v4170_v23 = vcombine.low %v4161_v46, %v4168_v41  ;;  %v10704_v24 = vsub.f32 %v10132_v44, %v3654_v14 }
 0x47e   : > { %v10707_v28 = vsub.f32 %v10136_v22, %v3658_v58  ;;  %v3852_v36 = vmul.f32 %v10680_v29, %v10680_v29  ;;  %v4177_v40 = vrot.slane %v4169_v38, %v9101_v18  ;;  %v3855_v3 = vmul.f32 %v10695_v53, %v10695_v53 }
 0x47f   : > { %v3853_v1 = vmul.f32 %v10686_v55, %v10686_v55  ;;  %v3854_v61 = vmul.f32 %v10692_v37, %v10692_v37  ;;  %v4184_v44 = vrot.slane %v4170_v23, %v9101_v18  ;;  %v3856_v22 = vmul.f32 %v10698_v31, %v10698_v31 }
 0x480   : > { %v3857_v59 = vmul.f32 %v10701_v19, %v10701_v19  ;;  %v3858_v63 = vmul.f32 %v10704_v24, %v10704_v24  ;;  %v3859_v42 = vmul.f32 %v10707_v28, %v10707_v28  ;;  %v3694_v17 = vrot.slane %v10528_v33, %v10327_v47 }
 0x481   : > { %v4088_v60 = vcombine.low %v3852_v36, %v3853_v1  ;;  %v4089_v15 = vcombine.low %v3854_v61, %v3855_v3  ;;  %v4185_v4 = vcombine.low %v4177_v40, %v4184_v44  ;;  %v3698_v13 = vrot.slane %v10528_v33, %v10330_v62  ;;  %v12407_v44 = vld [vmem:[#allocation27_spill] sm:$0xff] }
 0x482   : > { %v4090_v48 = vcombine.low %v3856_v22, %v3857_v59  ;;  %v3702_v46 = vrot.slane %v10528_v33, %v10333_v8  ;;  %v4091_v14 = vcombine.low %v3858_v63, %v3859_v42  ;;  %v3706_v50 = vrot.slane %v10528_v33, %v10336_v27  ;;  %v12410_v63 = vld [vmem:[#allocation22_spill] sm:$0xff] }
 0x483   : > { %v4098_v58 = vrot.slane %v4088_v60, %v9101_v18  ;;  %v4105_v41 = vrot.slane %v4089_v15, %v9101_v18  ;;  %v4272_v11 = vsel %vm3484_vm6, %v4185_v4, 0.0  ;;  %v3710_v38 = vrot.slane %v10528_v33, %v10339_v5  ;;  %v12412_v4 = vld [vmem:[#allocation17_spill] sm:$0xff] }
 0x484   : > { %v4112_v30 = vrot.slane %v4090_v48, %v9101_v18  ;;  %v3714_v23 = vrot.slane %v10528_v33, %v10342_v10  ;;  %4273 = vadd.xlane.f32.xlu1 %v4272_v11  ;;  %v4119_v36 = vrot.slane %v4091_v14, %v9101_v18  ;;  %v3718_v1 = vrot.slane %v10528_v33, %v10345_v20  ;;  %v12414_v14 = vld [vmem:[#allocation8_spill] sm:$0xff] }
 0x485   : > { %v4120_v40 = vcombine.low %v4098_v58, %v4105_v41  ;;  %v3722_v61 = vrot.slane %v10528_v33, %v10348_v51  ;;  %v10749_v3 = vsub.f32 %v10180_v57, %v3694_v17  ;;  %v10752_v22 = vsub.f32 %v12407_v44, %v3698_v13  ;;  %v12416_v57 = vld [vmem:[#allocation34_spill] sm:$0xff]  ;;  %v12418_v13 = vld [vmem:[#allocation39_spill] sm:$0xff] }
 0x486   : > { %v10755_v59 = vsub.f32 %v10207_v2, %v3702_v46  ;;  %v10758_v42 = vsub.f32 %v12410_v63, %v3706_v50  ;;  %v4121_v60 = vcombine.low %v4112_v30, %v4119_v36  ;;  %v10762_v48 = vsub.f32 %v12412_v4, %v3710_v38 }
 0x487   : > { %12406 = vst [vmem:[#allocation79_spill] sm:$0xff] %v10749_v3  ;;  %12408 = vst [vmem:[#allocation27_spill] sm:$0xff] %v10752_v22  ;;  %v4128_v15 = vrot.slane %v4120_v40, %v9101_v18  ;;  %v10765_v33 = vsub.f32 %v12414_v14, %v3714_v23  ;;  %v10768_v17 = vsub.f32 %v12416_v57, %v3718_v1 }
 0x488   : > { %12409 = vst [vmem:[#allocation80_spill] sm:$0xff] %v10755_v59  ;;  %12411 = vst [vmem:[#allocation22_spill] sm:$0xff] %v10758_v42  ;;  %v10771_v58 = vsub.f32 %v12418_v13, %v3722_v61  ;;  %v3868_v2 = vmul.f32 %v10749_v3, %v10749_v3  ;;  %v3869_v46 = vmul.f32 %v10752_v22, %v10752_v22  ;;  %v12421_v61 = vld [vmem:[#allocation12_spill] sm:$0xff]  ;;  %v12423_v13 = vld [vmem:[#allocation23_spill] sm:$0xff] }
 0x489   : > { %12413 = vst [vmem:[#allocation17_spill] sm:$0xff] %v10762_v48  ;;  %12415 = vst [vmem:[#allocation8_spill] sm:$0xff] %v10765_v33  ;;  %v4135_v41 = vrot.slane %v4121_v60, %v9101_v18  ;;  %v3870_v50 = vmul.f32 %v10755_v59, %v10755_v59  ;;  %v3871_v11 = vmul.f32 %v10758_v42, %v10758_v42  ;;  %v12456_v59 = vld [vmem:[#allocation63_spill] sm:$0xff]  ;;  %v12457_v3 = vld [vmem:[#allocation64_spill] sm:$0xff] }
 0x48a   : > { %12417 = vst [vmem:[#allocation34_spill] sm:$0xff] %v10768_v17  ;;  %12419 = vst [vmem:[#allocation39_spill] sm:$0xff] %v10771_v58  ;;  %v3872_v30 = vmul.f32 %v10762_v48, %v10762_v48  ;;  %v3873_v38 = vmul.f32 %v10765_v33, %v10765_v33  ;;  %v3874_v23 = vmul.f32 %v10768_v17, %v10768_v17 }
 0x48b   : > { %v3875_v36 = vmul.f32 %v10771_v58, %v10771_v58  ;;  %v4186_v40 = vcombine.low %v3868_v2, %v3869_v46  ;;  %v12420_v1 = vrot.slane %v10522_v43, %v10327_v47  ;;  %v4136_v63 = vcombine.low %v4128_v15, %v4135_v41 }
 0x48c   : > { %v4187_v60 = vcombine.low %v3870_v50, %v3871_v11  ;;  %v4188_v4 = vcombine.low %v3872_v30, %v3873_v38  ;;  %v10799_v33 = vsub.f32 %v12423_v13, %v10550_v52  ;;  %v6657_v43 = vmul.f32 %v10544_v16, %v10544_v16  ;;  %v12428_v13 = vld [vmem:[#allocation18_spill] sm:$0xff] }
 0x48d   : > { %v10794_v44 = vsub.f32 %v12421_v61, %v12420_v1  ;;  %v4189_v14 = vcombine.low %v3874_v23, %v3875_v36  ;;  %v4196_v57 = vrot.slane %v4186_v40, %v9101_v18  ;;  %v4269_v17 = vsel %vm3484_vm6, %v4136_v63, 0.0  ;;  %v12425_v40 = vld [vmem:[#allocation76_spill] sm:$0xff]  ;;  %v12426_v61 = vld [vmem:[#allocation2_spill] sm:$0xff] }
 0x48e   : > { %v4203_v2 = vrot.slane %v4187_v60, %v9101_v18  ;;  %v6642_v46 = vmul.f32 0.04, %v10475_v34  ;;  %v3726_v15 = vrot.slane %v10580_v0, %v10327_v47  ;;  %4270 = vadd.xlane.f32.xlu0 %v4269_v17  ;;  %v4210_v41 = vrot.slane %v4188_v4, %v9101_v18  ;;  %v12424_v0 = vld [vmem:[#allocation28_spill] sm:$0xff] }
 0x48f   : > { %12422 = vst [vmem:[#allocation12_spill] sm:$0xff] %v10794_v44  ;;  %v4217_v50 = vrot.slane %v4189_v14, %v9101_v18  ;;  %v3851_v52 = vmul.f32 %v10794_v44, %v10794_v44  ;;  %v6665_v23 = vsel %vm3484_vm6, %v6657_v43, 0.0  ;;  %v6659_v34 = vmul.f32 %v10799_v33, %v10799_v33  ;;  %v12444_v44 = vld [vmem:[#allocation74_spill] sm:$0xff] }
 0x490   : > { %v4218_v11 = vcombine.low %v4196_v57, %v4203_v2  ;;  %v10818_v17 = vsub.f32 %v12424_v0, %v6642_v46  ;;  %v6644_v1 = vmul.f32 0.04, %v12425_v40  ;;  %v10822_v63 = vsub.f32 %v12426_v61, %v3726_v15  ;;  %v12429_v0 = vld [vmem:[#allocation33_spill] sm:$0xff] }
 0x491   : > { %v4219_v30 = vcombine.low %v4210_v41, %v4217_v50  ;;  %v4080_v36 = vrot.slane %v3851_v52, %v9101_v18  ;;  %v6671_v14 = vsel %vm3484_vm6, %v6659_v34, 0.0 }
 0x492   : > { %v4226_v38 = vrot.slane %v4218_v11, %v9101_v18  ;;  %12427 = vst [vmem:[#allocation23_spill] sm:$0xff] %v10822_v63  ;;  %6666 = vadd.xlane.f32.xlu0 %v6665_v23  ;;  %v10828_v2 = vsub.f32 %v12428_v13, %v6644_v1  ;;  %v6658_v46 = vmul.f32 %v10818_v17, %v10818_v17 }
 0x493   : > { %v4233_v60 = vrot.slane %v4219_v30, %v9101_v18  ;;  %v4087_v57 = vrot.slane %v4080_v36, %v9101_v18  ;;  %v3876_v15 = vmul.f32 %v10822_v63, %v10822_v63 }
 0x494   : > { %v6668_v50 = vsel %vm3484_vm6, %v6658_v46, 0.0  ;;  %v6660_v11 = vmul.f32 %v10828_v2, %v10828_v2 }
 0x495   : > { %v4234_v4 = vcombine.low %v4226_v38, %v4233_v60  ;;  %v4266_v41 = vsel %vm3494_vm7, %v4087_v57, 0.0  ;;  %v4241_v52 = vrot.slane %v3876_v15, %v9101_v18  ;;  %v12431_v57 = vld [vmem:[#allocation38_spill] sm:$0xff] }
 0x496   : > { %6672 = vadd.xlane.f32.xlu0 %v6671_v14  ;;  %v6674_v30 = vsel %vm3494_vm7, %v6660_v11, 0.0 }
 0x497   : > { %v4275_v43 = vsel %vm3484_vm6, %v4234_v4, 0.0  ;;  %v4248_v38 = vrot.slane %v4241_v52, %v9101_v18 }
 0x498   : > { %4276 = vadd.xlane.f32.xlu1 %v4275_v43  ;;  %v12433_v43 = vld [vmem:[#allocation7_spill] sm:$0xff] }
 0x499   : > { %v4278_v23 = vsel %vm3494_vm7, %v4248_v38, 0.0 }
 0x49a   : > { %4267 = vadd.xlane.f32.xlu0 %v4266_v41 }
 0x49c   : > { %6669 = vadd.xlane.f32.xlu1 %v6668_v50 }
 0x4a0   : > { %6675 = vadd.xlane.f32.xlu1 %v6674_v30  ;;  %v6631_v34 = vpop.xlane.xlu0 %6630  ;;  %v12435_v30 = vld [vmem:[#allocation43_spill] sm:$0xff] }
 0x4a1   : > { %v6645_v36 = vmul.f32 0.04, %v6631_v34 }
 0x4a3   : > { %v10844_v40 = vsub.f32 %v12429_v0, %v6645_v36  ;;  %v6634_v1 = vpop.xlane.xlu1 %6633 }
 0x4a4   : > { %4279 = vadd.xlane.f32.xlu1 %v4278_v23  ;;  %v6646_v61 = vmul.f32 0.04, %v6634_v1  ;;  %v6637_v60 = vpop.xlane.xlu0 %6636 }
 0x4a5   : > { %12430 = vst [vmem:[#allocation28_spill] sm:$0xff] %v10844_v40  ;;  %v6647_v4 = vmul.f32 0.04, %v6637_v60  ;;  %v6661_v14 = vmul.f32 %v10844_v40, %v10844_v40 }
 0x4a6   : > { %v10849_v13 = vsub.f32 %v12431_v57, %v6646_v61 }
 0x4a7   : > { %v10852_v46 = vsub.f32 %v12433_v43, %v6647_v4  ;;  %v6640_v15 = vpop.xlane.xlu1 %6639  ;;  %v6677_v41 = vsel %vm3484_vm6, %v6661_v14, 0.0 }
 0x4a8   : > { %12432 = vst [vmem:[#allocation76_spill] sm:$0xff] %v10849_v13  ;;  %v6648_v50 = vmul.f32 0.04, %v6640_v15  ;;  %6678 = vadd.xlane.f32.xlu0 %v6677_v41  ;;  %v6662_v11 = vmul.f32 %v10849_v13, %v10849_v13 }
 0x4a9   : > { %12434 = vst [vmem:[#allocation2_spill] sm:$0xff] %v10852_v46  ;;  %v6663_v52 = vmul.f32 %v10852_v46, %v10852_v46  ;;  %v12442_v46 = vld [vmem:[#allocation73_spill] sm:$0xff] }
 0x4aa   : > { %v10860_v38 = vsub.f32 %v12435_v30, %v6648_v50  ;;  %v6680_v23 = vsel %vm3484_vm6, %v6662_v11, 0.0 }
 0x4ab   : > { %6681 = vadd.xlane.f32.xlu1 %v6680_v23  ;;  %v6683_v34 = vsel %vm3484_vm6, %v6663_v52, 0.0 }
 0x4ac   : > { %12436 = vst [vmem:[#allocation18_spill] sm:$0xff] %v10860_v38  ;;  %6684 = vadd.xlane.f32.xlu0 %v6683_v34  ;;  %v6664_v36 = vmul.f32 %v10860_v38, %v10860_v38  ;;  %v12441_v38 = vld [vmem:[#allocation72_spill] sm:$0xff] }
 0x4ae   : > { %v6686_v0 = vsel %vm3494_vm7, %v6664_v36, 0.0 }
 0x4af   : > { %6687 = vadd.xlane.f32.xlu1 %v6686_v0 }
 0x4fb   : > { %v4265_v1 = vpop.xlane.xlu0 %4264 }
 0x4fc   : > { %v4283_v61 = vmul.f32 0.041666668, %v4265_v1 }
 0x4fe   : > { %v4291_v60 = vadd.f32 1e-05, %v4283_v61  ;;  %v12437_v61 = vld [vmem:[#allocation68_spill] sm:$0xff] }
 0x500   : > { %8323 = vrsqrt.f32 %v4291_v60 }
 0x502   : > { %v4259_v4 = vpop.xlane.xlu0 %4258 }
 0x503   : > { %v4281_v14 = vmul.f32 0.041666668, %v4259_v4  ;;  %v12438_v4 = vld [vmem:[#allocation69_spill] sm:$0xff] }
 0x505   : > { %v4289_v57 = vadd.f32 1e-05, %v4281_v14 }
 0x507   : > { %v4262_v43 = vpop.xlane.xlu1 %4261  ;;  %8325 = vrsqrt.f32 %v4289_v57  ;;  %v12439_v57 = vld [vmem:[#allocation70_spill] sm:$0xff] }
 0x508   : > { %v4282_v15 = vmul.f32 0.041666668, %v4262_v43 }
 0x50a   : > { %v4290_v41 = vadd.f32 1e-05, %v4282_v15  ;;  %v8324_v50 = vpop.eup %8323  ;;  %v12440_v15 = vld [vmem:[#allocation71_spill] sm:$0xff] }
 0x50b   : > { %v4380_v11 = vrot.slane %v8324_v50, %v10327_v47  ;;  %v4384_v52 = vrot.slane %v8324_v50, %v10330_v62  ;;  %v4388_v30 = vrot.slane %v8324_v50, %v10333_v8  ;;  %v4392_v23 = vrot.slane %v8324_v50, %v10336_v27 }
 0x50c   : > { %8327 = vrsqrt.f32 %v4290_v41  ;;  %v4396_v34 = vrot.slane %v8324_v50, %v10339_v5  ;;  %v4400_v36 = vrot.slane %v8324_v50, %v10342_v10  ;;  %v4404_v0 = vrot.slane %v8324_v50, %v10345_v20 }
 0x50d   : > { %v4408_v1 = vrot.slane %v8324_v50, %v10348_v51  ;;  %v4579_v60 = vmul.f32 %v4380_v11, %v12437_v61  ;;  %v4580_v14 = vmul.f32 %v4384_v52, %v12438_v4  ;;  %v4581_v43 = vmul.f32 %v4388_v30, %v12439_v57  ;;  %v12449_v30 = vld [vmem:[#allocation75_spill] sm:$0xff] }
 0x50e   : > { %v4582_v41 = vmul.f32 %v4392_v23, %v12440_v15  ;;  %v4583_v40 = vmul.f32 %v4396_v34, %v12441_v38  ;;  %v10881_v13 = vmul.f32 %v4400_v36, %v12442_v46  ;;  %v10884_v58 = vmul.f32 %v4404_v0, %v12444_v44  ;;  %v12453_v57 = vld [vmem:[#allocation15_spill] sm:$0xff] }
 0x50f   : > { %v10886_v48 = vmul.f32 0.2, %v4579_v60  ;;  %v10888_v50 = vmul.f32 0.2, %v4580_v14  ;;  %v10890_v11 = vmul.f32 0.2, %v4581_v43  ;;  %v10893_v4 = vmul.f32 %v4408_v1, %v12449_v30 }
 0x510   : > { %12443 = vst [vmem:[#allocation33_spill] sm:$0xff] %v10881_v13  ;;  %12445 = vst [vmem:[#allocation38_spill] sm:$0xff] %v10884_v58  ;;  %v10895_v23 = vmul.f32 0.2, %v4582_v41  ;;  %v10897_v38 = vmul.f32 0.2, %v4583_v40 }
 0x511   : > { %v4274_v63 = vpop.xlane.xlu1 %4273  ;;  %12446 = vst [vmem:[#allocation7_spill] sm:$0xff] %v10886_v48  ;;  %12447 = vst [vmem:[#allocation43_spill] sm:$0xff] %v10888_v50  ;;  %v8326_v52 = vpop.eup %8325  ;;  %v12454_v43 = vld [vmem:[#allocation25_spill] sm:$0xff]  ;;  %v12455_v41 = vld [vmem:[#allocation6_spill] sm:$0xff] }
 0x512   : > { %12448 = vst [vmem:[#allocation68_spill] sm:$0xff] %v10890_v11  ;;  %v4286_v61 = vmul.f32 0.041666668, %v4274_v63  ;;  %12450 = vst [vmem:[#allocation69_spill] sm:$0xff] %v10893_v4  ;;  %v4316_v46 = vrot.slane %v8326_v52, %v10327_v47  ;;  %v4320_v44 = vrot.slane %v8326_v52, %v10330_v62  ;;  %v4324_v34 = vrot.slane %v8326_v52, %v10333_v8  ;;  %v12460_v58 = vld [vmem:[#allocation67_spill] sm:$0xff] }
 0x513   : > { %12451 = vst [vmem:[#allocation70_spill] sm:$0xff] %v10895_v23  ;;  %12452 = vst [vmem:[#allocation71_spill] sm:$0xff] %v10897_v38  ;;  %v4328_v36 = vrot.slane %v8326_v52, %v10336_v27  ;;  %v4332_v60 = vrot.slane %v8326_v52, %v10339_v5  ;;  %v4336_v63 = vrot.slane %v8326_v52, %v10342_v10  ;;  %v12458_v38 = vld [vmem:[#allocation65_spill] sm:$0xff]  ;;  %v12459_v23 = vld [vmem:[#allocation66_spill] sm:$0xff] }
 0x514   : > { %v4294_v0 = vadd.f32 1e-05, %v4286_v61  ;;  %v4340_v1 = vrot.slane %v8326_v52, %v10345_v20  ;;  %v4344_v14 = vrot.slane %v8326_v52, %v10348_v51  ;;  %v4563_v40 = vmul.f32 %v4316_v46, %v12453_v57 }
 0x515   : > { %v4564_v15 = vmul.f32 %v4320_v44, %v12454_v43  ;;  %v4565_v30 = vmul.f32 %v4324_v34, %v12455_v41  ;;  %v4566_v22 = vmul.f32 %v4328_v36, %v12456_v59  ;;  %v4567_v61 = vmul.f32 %v4332_v60, %v12457_v3 }
 0x516   : > { %v8328_v42 = vpop.eup %8327  ;;  %8329 = vrsqrt.f32 %v4294_v0  ;;  %v4568_v11 = vmul.f32 %v4336_v63, %v12458_v38  ;;  %v4569_v4 = vmul.f32 %v4340_v1, %v12459_v23  ;;  %v4570_v13 = vmul.f32 %v4344_v14, %v12460_v58 }
 0x517   : > { %v10915_v48 = vmul.f32 0.2, %v4563_v40  ;;  %v10917_v52 = vmul.f32 0.2, %v4564_v15  ;;  %v10919_v46 = vmul.f32 0.2, %v4565_v30  ;;  %v4348_v59 = vrot.slane %v8328_v42, %v10327_v47 }
 0x518   : > { %v10921_v44 = vmul.f32 0.2, %v4566_v22  ;;  %v10923_v34 = vmul.f32 0.2, %v4567_v61  ;;  %v10926_v36 = vmul.f32 0.2, %v4568_v11  ;;  %v4352_v22 = vrot.slane %v8328_v42, %v10330_v62 }
 0x519   : > { %12461 = vst [vmem:[#allocation72_spill] sm:$0xff] %v10919_v46  ;;  %v10928_v3 = vmul.f32 0.2, %v4569_v4  ;;  %v10930_v38 = vmul.f32 0.2, %v4570_v13  ;;  %v4713_v58 = vcombine.low %v10915_v48, %v10917_v52  ;;  %v4356_v60 = vrot.slane %v8328_v42, %v10333_v8 }
 0x51a   : > { %12462 = vst [vmem:[#allocation73_spill] sm:$0xff] %v10921_v44  ;;  %12463 = vst [vmem:[#allocation74_spill] sm:$0xff] %v10923_v34  ;;  %v4714_v0 = vcombine.low %v10919_v46, %v10921_v44  ;;  %v4360_v63 = vrot.slane %v8328_v42, %v10336_v27  ;;  %v4715_v11 = vcombine.low %v10923_v34, %v10926_v36 }
 0x51b   : > { %12464 = vst [vmem:[#allocation75_spill] sm:$0xff] %v10926_v36  ;;  %12465 = vst [vmem:[#allocation15_spill] sm:$0xff] %v10928_v3  ;;  %v4271_v23 = vpop.xlane.xlu0 %4270  ;;  %v4716_v13 = vcombine.low %v10928_v3, %v10930_v38  ;;  %v4723_v4 = vrot.slane %v4713_v58, %v9101_v18  ;;  %v4364_v57 = vrot.slane %v8328_v42, %v10339_v5 }
 0x51c   : > { %12466 = vst [vmem:[#allocation25_spill] sm:$0xff] %v10930_v38  ;;  %v4285_v1 = vmul.f32 0.041666668, %v4271_v23  ;;  %v4730_v14 = vrot.slane %v4714_v0, %v9101_v18  ;;  %v4368_v40 = vrot.slane %v8328_v42, %v10342_v10  ;;  %v4372_v43 = vrot.slane %v8328_v42, %v10345_v20 }
 0x51d   : > { %v4737_v41 = vrot.slane %v4715_v11, %v9101_v18  ;;  %v4744_v30 = vrot.slane %v4716_v13, %v9101_v18  ;;  %v4376_v61 = vrot.slane %v8328_v42, %v10348_v51  ;;  %v4571_v38 = vmul.f32 %v4348_v59, %v10526_v49  ;;  %v12467_v13 = vld [vmem:[#allocation77_spill] sm:$0xff]  ;;  %v12468_v59 = vld [vmem:[#allocation78_spill] sm:$0xff] }
 0x51e   : > { %v4293_v15 = vadd.f32 1e-05, %v4285_v1  ;;  %v4745_v36 = vcombine.low %v4723_v4, %v4730_v14  ;;  %v4572_v58 = vmul.f32 %v4352_v22, %v10531_v9  ;;  %v4573_v0 = vmul.f32 %v4356_v60, %v10536_v35 }
 0x51f   : > { %v6667_v23 = vpop.xlane.xlu0 %6666  ;;  %v4746_v34 = vcombine.low %v4737_v41, %v4744_v30  ;;  %v4574_v44 = vmul.f32 %v4360_v63, %v10541_v6  ;;  %v4575_v46 = vmul.f32 %v4364_v57, %v12467_v13  ;;  %v4576_v42 = vmul.f32 %v4368_v40, %v10553_v56 }
 0x520   : > { %8331 = vrsqrt.f32 %v4293_v15  ;;  %v6689_v3 = vmul.f32 0.041666668, %v6667_v23  ;;  %v10955_v1 = vpop.eup %8329  ;;  %v4753_v11 = vrot.slane %v4745_v36, %v9101_v18  ;;  %v4577_v4 = vmul.f32 %v4372_v43, %v10558_v39 }
 0x521   : > { %v4760_v9 = vrot.slane %v4746_v34, %v9101_v18  ;;  %v4578_v35 = vmul.f32 %v4376_v61, %v12468_v59  ;;  %v10963_v22 = vmul.f32 0.2, %v4571_v38  ;;  %v10965_v14 = vmul.f32 0.2, %v4572_v58 }
 0x522   : > { %v6697_v49 = vadd.f32 1e-05, %v6689_v3  ;;  %v10967_v6 = vmul.f32 0.2, %v4573_v0  ;;  %v10969_v63 = vmul.f32 0.2, %v4574_v44 }
 0x523   : > { %v6673_v60 = vpop.xlane.xlu0 %6672  ;;  %v4761_v3 = vcombine.low %v4753_v11, %v4760_v9  ;;  %v10973_v57 = vmul.f32 0.2, %v4575_v46  ;;  %v10975_v40 = vmul.f32 0.2, %v4576_v42  ;;  %v10977_v38 = vmul.f32 0.2, %v4577_v4 }
 0x524   : > { %8333 = vrsqrt.f32 %v6697_v49  ;;  %v6691_v39 = vmul.f32 0.041666668, %v6673_v60  ;;  %v4762_v43 = vcombine.low %v10963_v22, %v10965_v14  ;;  %v10984_v41 = vmul.f32 0.2, %v4578_v35 }
 0x525   : > { %v4277_v56 = vpop.xlane.xlu1 %4276  ;;  %12469 = vst [vmem:[#allocation6_spill] sm:$0xff] %v10977_v38  ;;  %v10982_v44 = vsel %vm3484_vm6, %v4761_v3, -inf  ;;  %v4763_v30 = vcombine.low %v10967_v6, %v10969_v63  ;;  %v4764_v23 = vcombine.low %v10973_v57, %v10975_v40 }
 0x526   : > { %v4287_v34 = vmul.f32 0.041666668, %v4277_v56  ;;  %v6699_v15 = vadd.f32 1e-05, %v6691_v39  ;;  %12470 = vst [vmem:[#allocation63_spill] sm:$0xff] %v10984_v41  ;;  %v4772_v58 = vrot.slane %v4762_v43, %v9101_v18  ;;  %v4765_v42 = vcombine.low %v10977_v38, %v10984_v41 }
 0x527   : > { %v4268_v46 = vpop.xlane.xlu0 %4267  ;;  %v4779_v4 = vrot.slane %v4763_v30, %v9101_v18  ;;  %v4786_v9 = vrot.slane %v4764_v23, %v9101_v18 }
 0x528   : > { %v4295_v61 = vadd.f32 1e-05, %v4287_v34  ;;  %8335 = vrsqrt.f32 %v6699_v15  ;;  %v4284_v13 = vmul.f32 0.041666668, %v4268_v46  ;;  %v4793_v56 = vrot.slane %v4765_v42, %v9101_v18 }
 0x529   : > { %v6670_v11 = vpop.xlane.xlu1 %6669  ;;  %v4794_v39 = vcombine.low %v4772_v58, %v4779_v4 }
 0x52a   : > { %8337 = vrsqrt.f32 %v4295_v61  ;;  %v6690_v49 = vmul.f32 0.041666668, %v6670_v11  ;;  %v8332_v35 = vpop.eup %8331  ;;  %v4292_v60 = vadd.f32 1e-05, %v4284_v13  ;;  %v4795_v46 = vcombine.low %v4786_v9, %v4793_v56 }
 0x52b   : > { %v4416_v43 = vrot.slane %v8332_v35, %v10327_v47  ;;  %v4420_v15 = vrot.slane %v8332_v35, %v10330_v62  ;;  %v4424_v30 = vrot.slane %v8332_v35, %v10333_v8  ;;  %v4802_v23 = vrot.slane %v4794_v39, %v9101_v18 }
 0x52c   : > { %v6698_v34 = vadd.f32 1e-05, %v6690_v49  ;;  %8339 = vrsqrt.f32 %v4292_v60  ;;  %v4428_v11 = vrot.slane %v8332_v35, %v10336_v27  ;;  %v4432_v58 = vrot.slane %v8332_v35, %v10339_v5 }
 0x52d   : > { %v6676_v61 = vpop.xlane.xlu1 %6675  ;;  %v4436_v42 = vrot.slane %v8332_v35, %v10342_v10  ;;  %v4809_v49 = vrot.slane %v4795_v46, %v9101_v18  ;;  %v4440_v3 = vrot.slane %v8332_v35, %v10345_v20  ;;  %v4444_v59 = vrot.slane %v8332_v35, %v10348_v51 }
 0x52e   : > { %8341 = vrsqrt.f32 %v6698_v34  ;;  %v6692_v13 = vmul.f32 0.041666668, %v6676_v61  ;;  %v8334_v4 = vpop.eup %8333  ;;  %v4588_v60 = vmul.f32 %v4416_v43, %v10680_v29  ;;  %v4589_v39 = vmul.f32 %v4420_v15, %v10686_v55 }
 0x52f   : > { %v6713_v56 = vmul.f32 %v8334_v4, %v10544_v16  ;;  %v4590_v34 = vmul.f32 %v4424_v30, %v10692_v37  ;;  %v4810_v0 = vcombine.low %v4802_v23, %v4809_v49  ;;  %v4591_v36 = vmul.f32 %v4428_v11, %v10695_v53 }
 0x530   : > { %v6700_v9 = vadd.f32 1e-05, %v6692_v13  ;;  %v4592_v41 = vmul.f32 %v4432_v58, %v10698_v31  ;;  %v4593_v46 = vmul.f32 %v4436_v42, %v10701_v19  ;;  %v4594_v29 = vmul.f32 %v4440_v3, %v10704_v24 }
 0x531   : > { %v4280_v61 = vpop.xlane.xlu1 %4279  ;;  %v11019_v35 = vmul.f32 0.2, %v6713_v56  ;;  %v11023_v16 = vsel %vm3484_vm6, %v4810_v0, -inf  ;;  %v4595_v55 = vmul.f32 %v4444_v59, %v10707_v28  ;;  %v11026_v37 = vmul.f32 0.2, %v4588_v60 }
 0x532   : > { %8343 = vrsqrt.f32 %v6700_v9  ;;  %v4288_v38 = vmul.f32 0.041666668, %v4280_v61  ;;  %v8336_v43 = vpop.eup %8335  ;;  %v11028_v15 = vmul.f32 0.2, %v4589_v39  ;;  %v11035_v23 = vmul.f32 0.2, %v4590_v34 }
 0x533   : > { %12471 = vst [vmem:[#allocation64_spill] sm:$0xff] %v11026_v37  ;;  %v6715_v19 = vmul.f32 %v8336_v43, %v10799_v33  ;;  %v6729_v30 = vsel %vm3484_vm6, %v11019_v35, -inf  ;;  %v11037_v24 = vmul.f32 0.2, %v4591_v36  ;;  %v11039_v0 = vmul.f32 0.2, %v4592_v41 }
 0x534   : > { %12472 = vst [vmem:[#allocation65_spill] sm:$0xff] %v11028_v15  ;;  %v11030_v53 = vpop.eup %8337  ;;  %v4296_v31 = vadd.f32 1e-05, %v4288_v38  ;;  %12473 = vst [vmem:[#allocation66_spill] sm:$0xff] %v11035_v23  ;;  %v11041_v3 = vmul.f32 0.2, %v4593_v46  ;;  %v4874_v28 = vcombine.low %v11026_v37, %v11028_v15  ;;  %v4464_v58 = vrot.slane %v10955_v1, %v10339_v5 }
 0x535   : > { %12474 = vst [vmem:[#allocation67_spill] sm:$0xff] %v11037_v24  ;;  %12475 = vst [vmem:[#allocation77_spill] sm:$0xff] %v11039_v0  ;;  %v11045_v59 = vmul.f32 0.2, %v6715_v19  ;;  %v11047_v38 = vmul.f32 0.2, %v4594_v29  ;;  %v4875_v36 = vcombine.low %v11035_v23, %v11037_v24  ;;  %v4468_v60 = vrot.slane %v10955_v1, %v10342_v10 }
 0x536   : > { %12476 = vst [vmem:[#allocation78_spill] sm:$0xff] %v11041_v3  ;;  %8345 = vrsqrt.f32 %v4296_v31  ;;  %v11049_v33 = vmul.f32 0.2, %v4595_v55  ;;  %v11051_v11 = vpop.eup %8339  ;;  %v4876_v41 = vcombine.low %v11039_v0, %v11041_v3  ;;  %v4884_v13 = vrot.slane %v4874_v28, %v9101_v18  ;;  %v12495_v37 = vld [vmem:[#allocation80_spill] sm:$0xff] }
 0x537   : > { %12477 = vst [vmem:[#allocation81_spill] sm:$0xff] %v11047_v38  ;;  %v6735_v4 = vsel %vm3484_vm6, %v11045_v59, -inf  ;;  %v4472_v9 = vrot.slane %v10955_v1, %v10345_v20  ;;  %v4891_v39 = vrot.slane %v4875_v36, %v9101_v18  ;;  %v4476_v61 = vrot.slane %v10955_v1, %v10348_v51 }
 0x538   : > { %12478 = vst [vmem:[#allocation82_spill] sm:$0xff] %v11049_v33  ;;  %v8342_v42 = vpop.eup %8341  ;;  %v4877_v49 = vcombine.low %v11047_v38, %v11049_v33  ;;  %6736 = vmax.xlane.f32.xlu0 %v6735_v4  ;;  %v4898_v34 = vrot.slane %v4876_v41, %v9101_v18  ;;  %v12479_v29 = vrot.slane %v10955_v1, %v10327_v47  ;;  %v6682_v15 = vpop.xlane.xlu1 %6681 }
 0x539   : > { %v6714_v56 = vmul.f32 %v8342_v42, %v10818_v17  ;;  %v12480_v55 = vrot.slane %v10955_v1, %v10330_v62  ;;  %v12481_v17 = vrot.slane %v10955_v1, %v10333_v8  ;;  %v4906_v36 = vcombine.low %v4884_v13, %v4891_v39 }
 0x53a   : > { %v4905_v46 = vrot.slane %v4877_v49, %v9101_v18  ;;  %v4596_v43 = vmul.f32 %v12479_v29, %v10607_v32  ;;  %v12482_v41 = vrot.slane %v10955_v1, %v10336_v27  ;;  %v4600_v32 = vmul.f32 %v4464_v58, %v10631_v45 }
 0x53b   : > { %v4597_v31 = vmul.f32 %v12480_v55, %v10613_v12  ;;  %v4598_v19 = vmul.f32 %v12481_v17, %v10619_v25  ;;  %v11086_v28 = vmul.f32 0.2, %v6714_v56  ;;  %v4601_v29 = vmul.f32 %v4468_v60, %v10635_v54 }
 0x53c   : > { %v4599_v42 = vmul.f32 %v12482_v41, %v10625_v26  ;;  %v8344_v4 = vpop.eup %8343  ;;  %v4907_v49 = vcombine.low %v4898_v34, %v4905_v46  ;;  %v4602_v12 = vmul.f32 %v4472_v9, %v10638_v21  ;;  %v4603_v55 = vmul.f32 %v4476_v61, %v10641_v7  ;;  %6730 = vmax.xlane.f32.xlu0 %v6729_v30  ;;  %v12483_v30 = vld [vmem:[#allocation7_spill] sm:$0xff] }
 0x53d   : > { %v6716_v25 = vmul.f32 %v8344_v4, %v10828_v2  ;;  %v6732_v13 = vsel %vm3484_vm6, %v11086_v28, -inf  ;;  %v4914_v56 = vrot.slane %v4906_v36, %v9101_v18  ;;  %v11100_v1 = vmul.f32 0.2, %v4596_v43  ;;  %v12486_v4 = vld [vmem:[#allocation38_spill] sm:$0xff] }
 0x53e   : > { %v4921_v26 = vrot.slane %v4907_v49, %v9101_v18  ;;  %v11103_v45 = vmul.f32 0.2, %v4597_v31  ;;  %v11105_v58 = vmul.f32 0.2, %v4598_v19  ;;  %v11107_v54 = vmul.f32 0.2, %v4599_v42 }
 0x53f   : > { %v11109_v21 = vmul.f32 0.2, %v6716_v25  ;;  %v11111_v7 = vmul.f32 0.2, %v4600_v32  ;;  %v11113_v2 = vmul.f32 0.2, %v4601_v29  ;;  %v4811_v60 = vcombine.low %v12483_v30, %v10888_v50 }
 0x540   : > { %v11117_v9 = vpop.eup %8345  ;;  %v4922_v39 = vcombine.low %v4914_v56, %v4921_v26  ;;  %v11119_v34 = vmul.f32 0.2, %v4602_v12  ;;  %v11121_v61 = vmul.f32 0.2, %v4603_v55  ;;  %v4923_v46 = vcombine.low %v11100_v1, %v11103_v45  ;;  %5044 = vmax.xlane.f32.xlu0 %v10982_v44  ;;  %v12484_v19 = vld [vmem:[#allocation33_spill] sm:$0xff]  ;;  %v12490_v25 = vld [vmem:[#allocation70_spill] sm:$0xff] }
 0x541   : > { %v6738_v43 = vsel %vm3494_vm7, %v11109_v21, -inf  ;;  %v4924_v31 = vcombine.low %v11105_v58, %v11107_v54  ;;  %v4925_v17 = vcombine.low %v11111_v7, %v11113_v2  ;;  %v11133_v36 = vmul.f32 0.2, %v12484_v19  ;;  %v12488_v12 = vld [vmem:[#allocation69_spill] sm:$0xff]  ;;  %v12491_v56 = vld [vmem:[#allocation68_spill] sm:$0xff]  ;;  %v12500_v50 = vld [vmem:[#allocation39_spill] sm:$0xff] }
 0x542   : > { %6739 = vmax.xlane.f32.xlu1 %v6738_v43  ;;  %v5055_v41 = vsel %vm3484_vm6, %v4922_v39, -inf  ;;  %v4926_v42 = vcombine.low %v11119_v34, %v11121_v61  ;;  %v4933_v32 = vrot.slane %v4923_v46, %v9101_v18  ;;  %v11140_v49 = vmul.f32 0.2, %v12486_v4  ;;  %v12492_v43 = vld [vmem:[#allocation71_spill] sm:$0xff] }
 0x543   : > { %12485 = vst [vmem:[#allocation7_spill] sm:$0xff] %v11133_v36  ;;  %v4940_v44 = vrot.slane %v4924_v31, %v9101_v18  ;;  %v4947_v29 = vrot.slane %v4925_v17, %v9101_v18  ;;  %v11145_v55 = vmul.f32 0.2, %v12488_v12  ;;  %v4812_v26 = vcombine.low %v12491_v56, %v12490_v25  ;;  %v12498_v56 = vld [vmem:[#allocation8_spill] sm:$0xff] }
 0x544   : > { %12487 = vst [vmem:[#allocation33_spill] sm:$0xff] %v11140_v49  ;;  %v4954_v39 = vrot.slane %v4926_v42, %v9101_v18  ;;  %v4813_v19 = vcombine.low %v12492_v43, %v11133_v36  ;;  %v4821_v46 = vrot.slane %v4811_v60, %v9101_v18  ;;  %v4480_v4 = vrot.slane %v11030_v53, %v10327_v47  ;;  %v12497_v43 = vld [vmem:[#allocation17_spill] sm:$0xff] }
 0x545   : > { %12489 = vst [vmem:[#allocation38_spill] sm:$0xff] %v11145_v55  ;;  %5056 = vmax.xlane.f32.xlu0 %v5055_v41  ;;  %v4955_v31 = vcombine.low %v4933_v32, %v4940_v44  ;;  %v4814_v17 = vcombine.low %v11140_v49, %v11145_v55  ;;  %v4828_v12 = vrot.slane %v4812_v26, %v9101_v18  ;;  %v12496_v49 = vld [vmem:[#allocation22_spill] sm:$0xff] }
 0x546   : > { %v4484_v33 = vrot.slane %v11030_v53, %v10330_v62  ;;  %6733 = vmax.xlane.f32.xlu1 %v6732_v13  ;;  %v4956_v42 = vcombine.low %v4947_v29, %v4954_v39  ;;  %v4835_v38 = vrot.slane %v4813_v19, %v9101_v18  ;;  %v4488_v60 = vrot.slane %v11030_v53, %v10333_v8  ;;  %v6679_v19 = vpop.xlane.xlu0 %6678 }
 0x547   : > { %v4492_v3 = vrot.slane %v11030_v53, %v10336_v27  ;;  %v4963_v41 = vrot.slane %v4955_v31, %v9101_v18  ;;  %v4842_v32 = vrot.slane %v4814_v17, %v9101_v18  ;;  %v4843_v44 = vcombine.low %v4821_v46, %v4828_v12  ;;  %v12493_v17 = vld [vmem:[#allocation79_spill] sm:$0xff] }
 0x548   : > { %v4496_v26 = vrot.slane %v11030_v53, %v10339_v5  ;;  %v4970_v0 = vrot.slane %v4956_v42, %v9101_v18  ;;  %v4500_v13 = vrot.slane %v11030_v53, %v10342_v10  ;;  %v4504_v29 = vrot.slane %v11030_v53, %v10345_v20  ;;  %v12494_v12 = vld [vmem:[#allocation27_spill] sm:$0xff] }
 0x549   : > { %v4508_v39 = vrot.slane %v11030_v53, %v10348_v51  ;;  %v4844_v24 = vcombine.low %v4835_v38, %v4842_v32  ;;  %v4851_v31 = vrot.slane %v4843_v44, %v9101_v18  ;;  %v4604_v46 = vmul.f32 %v4480_v4, %v12493_v17  ;;  %v12499_v32 = vld [vmem:[#allocation34_spill] sm:$0xff] }
 0x54a   : > { %v4605_v23 = vmul.f32 %v4484_v33, %v12494_v12  ;;  %5047 = vmax.xlane.f32.xlu1 %v11023_v16  ;;  %v4971_v42 = vcombine.low %v4963_v41, %v4970_v0  ;;  %v4606_v55 = vmul.f32 %v4488_v60, %v12495_v37  ;;  %v4607_v36 = vmul.f32 %v4492_v3, %v12496_v49  ;;  %v6685_v60 = vpop.xlane.xlu0 %6684 }
 0x54b   : > { %v4608_v25 = vmul.f32 %v4496_v26, %v12497_v43  ;;  %v4858_v53 = vrot.slane %v4844_v24, %v9101_v18  ;;  %v4609_v38 = vmul.f32 %v4500_v13, %v12498_v56  ;;  %v4610_v44 = vmul.f32 %v4504_v29, %v12499_v32  ;;  %v6688_v26 = vpop.xlane.xlu1 %6687 }
 0x54c   : > { %v4611_v4 = vmul.f32 %v4508_v39, %v12500_v50  ;;  %v5058_v33 = vsel %vm3484_vm6, %v4971_v42, -inf  ;;  %v11188_v17 = vmul.f32 0.2, %v4604_v46  ;;  %v11190_v16 = vmul.f32 0.2, %v4605_v23 }
 0x54d   : > { %v4412_v37 = vrot.slane %v11051_v11, %v10327_v47  ;;  %v4859_v0 = vcombine.low %v4851_v31, %v4858_v53  ;;  %v11194_v3 = vmul.f32 0.2, %v4606_v55  ;;  %v11196_v49 = vmul.f32 0.2, %v4607_v36  ;;  %v12501_v36 = vld [vmem:[#allocation12_spill] sm:$0xff] }
 0x54e   : > { %v11198_v24 = vmul.f32 0.2, %v4608_v25  ;;  %5059 = vmax.xlane.f32.xlu1 %v5058_v33  ;;  %v11200_v56 = vmul.f32 0.2, %v4609_v38  ;;  %v11202_v50 = vmul.f32 0.2, %v4610_v44  ;;  %v4972_v23 = vcombine.low %v11188_v17, %v11190_v16 }
 0x54f   : > { %v11204_v43 = vmul.f32 0.2, %v4611_v4  ;;  %v5049_v11 = vsel %vm3484_vm6, %v4859_v0, -inf  ;;  %v4973_v55 = vcombine.low %v11194_v3, %v11196_v49  ;;  %v4587_v41 = vmul.f32 %v4412_v37, %v12501_v36 }
 0x550   : > { %v6693_v25 = vmul.f32 0.041666668, %v6679_v19  ;;  %5050 = vmax.xlane.f32.xlu0 %v5049_v11  ;;  %v4974_v13 = vcombine.low %v11198_v24, %v11200_v56  ;;  %v4982_v39 = vrot.slane %v4972_v23, %v9101_v18  ;;  %v6694_v31 = vmul.f32 0.041666668, %v6682_v15 }
 0x551   : > { %v4975_v29 = vcombine.low %v11202_v50, %v11204_v43  ;;  %v4989_v46 = vrot.slane %v4973_v55, %v9101_v18  ;;  %v11218_v12 = vmul.f32 0.2, %v4587_v41  ;;  %v6695_v53 = vmul.f32 0.041666668, %v6685_v60 }
 0x552   : > { %v6701_v42 = vadd.f32 1e-05, %v6693_v25  ;;  %v4996_v38 = vrot.slane %v4974_v13, %v9101_v18  ;;  %v6702_v32 = vadd.f32 1e-05, %v6694_v31  ;;  %v6696_v44 = vmul.f32 0.041666668, %v6688_v26 }
 0x553   : > { %12502 = vst [vmem:[#allocation69_spill] sm:$0xff] %v11218_v12  ;;  %v5003_v19 = vrot.slane %v4975_v29, %v9101_v18  ;;  %v5004_v4 = vcombine.low %v4982_v39, %v4989_v46  ;;  %v6703_v33 = vadd.f32 1e-05, %v6695_v53  ;;  %v4866_v60 = vrot.slane %v11218_v12, %v9101_v18  ;;  %v12503_v25 = vld [vmem:[#allocation23_spill] sm:$0xff]  ;;  %v12504_v46 = vld [vmem:[#allocation76_spill] sm:$0xff] }
 0x554   : > { %8347 = vrsqrt.f32 %v6701_v42  ;;  %v6704_v0 = vadd.f32 1e-05, %v6696_v44  ;;  %v4512_v55 = vrot.slane %v11117_v9, %v10327_v47 }
 0x555   : > { %v5005_v37 = vcombine.low %v4996_v38, %v5003_v19  ;;  %8349 = vrsqrt.f32 %v6702_v32  ;;  %v5012_v15 = vrot.slane %v5004_v4, %v9101_v18  ;;  %v4873_v41 = vrot.slane %v4866_v60, %v9101_v18  ;;  %v12505_v38 = vld [vmem:[#allocation2_spill] sm:$0xff]  ;;  %v12506_v32 = vld [vmem:[#allocation28_spill] sm:$0xff] }
 0x556   : > { %8351 = vrsqrt.f32 %v6703_v33  ;;  %v4612_v26 = vmul.f32 %v4512_v55, %v12503_v25  ;;  %v12508_v33 = vld [vmem:[#allocation18_spill] sm:$0xff] }
 0x557   : > { %v5019_v23 = vrot.slane %v5005_v37, %v9101_v18  ;;  %8353 = vrsqrt.f32 %v6704_v0  ;;  %v5052_v39 = vsel %vm3494_vm7, %v4873_v41, -inf }
 0x558   : > { %v11235_v44 = vmul.f32 0.2, %v4612_v26 }
 0x559   : > { %v5020_v11 = vcombine.low %v5012_v15, %v5019_v23 }
 0x55a   : > { %12507 = vst [vmem:[#allocation79_spill] sm:$0xff] %v11235_v44  ;;  %v5027_v55 = vrot.slane %v11235_v44, %v9101_v18 }
 0x55b   : > { %v5061_v36 = vsel %vm3484_vm6, %v5020_v11, -inf }
 0x55c   : > { %5062 = vmax.xlane.f32.xlu1 %v5061_v36  ;;  %v5034_v25 = vrot.slane %v5027_v55, %v9101_v18 }
 0x55e   : > { %v8348_v13 = vpop.eup %8347  ;;  %v5064_v26 = vsel %vm3494_vm7, %v5034_v25, -inf }
 0x55f   : > { %v8350_v29 = vpop.eup %8349  ;;  %v6717_v9 = vmul.f32 %v8348_v13, %v12506_v32 }
 0x560   : > { %v8352_v31 = vpop.eup %8351  ;;  %5053 = vmax.xlane.f32.xlu1 %v5052_v39  ;;  %v6718_v42 = vmul.f32 %v8350_v29, %v12504_v46 }
 0x561   : > { %v8354_v53 = vpop.eup %8353  ;;  %v6719_v19 = vmul.f32 %v8352_v31, %v12505_v38  ;;  %v11248_v11 = vmul.f32 0.2, %v6717_v9 }
 0x562   : > { %v11237_v4 = vmul.f32 0.2, %v6718_v42  ;;  %v6720_v37 = vmul.f32 %v8354_v53, %v12508_v33 }
 0x563   : > { %v11240_v0 = vmul.f32 0.2, %v6719_v19  ;;  %12510 = vst [vmem:[#allocation80_spill] sm:$0xff] %v11248_v11  ;;  %v6741_v41 = vsel %vm3484_vm6, %v11248_v11, -inf  ;;  %v12518_v11 = vld [vmem:[#allocation25_spill] sm:$0xff] }
 0x564   : > { %v6744_v15 = vsel %vm3484_vm6, %v11237_v4, -inf  ;;  %v11244_v23 = vmul.f32 0.2, %v6720_v37 }
 0x565   : > { %12509 = vst [vmem:[#allocation27_spill] sm:$0xff] %v11240_v0  ;;  %6745 = vmax.xlane.f32.xlu1 %v6744_v15  ;;  %v6747_v60 = vsel %vm3484_vm6, %v11240_v0, -inf  ;;  %v12517_v0 = vld [vmem:[#allocation15_spill] sm:$0xff] }
 0x566   : > { %6748 = vmax.xlane.f32.xlu0 %v6747_v60  ;;  %v6750_v36 = vsel %vm3494_vm7, %v11244_v23, -inf }
 0x569   : > { %6751 = vmax.xlane.f32.xlu1 %v6750_v36 }
 0x56a   : > { %6742 = vmax.xlane.f32.xlu0 %v6741_v41 }
 0x56e   : > { %5065 = vmax.xlane.f32.xlu0 %v5064_v26 }
 0x5c5   : > { %v6737_v13 = vpop.xlane.xlu0 %6736 }
 0x5c6   : > { %v6755_v46 = vsub.f32 %v11045_v59, %v6737_v13 }
 0x5c8   : > { %v6765_v9 = vmul.f32 1.442695, %v6755_v46 }
 0x5c9   : > { %v6731_v29 = vpop.xlane.xlu0 %6730 }
 0x5ca   : > { %v6753_v31 = vsub.f32 %v11019_v35, %v6731_v29 }
 0x5cc   : > { %v6761_v42 = vmul.f32 1.442695, %v6753_v31 }
 0x5cd   : > { %v5045_v37 = vpop.xlane.xlu0 %5044 }
 0x5ce   : > { %8355 = vpow2.f32 %v6761_v42  ;;  %v5078_v60 = vrot.slane %v5045_v37, %v10327_v47  ;;  %v5082_v35 = vrot.slane %v5045_v37, %v10330_v62  ;;  %v5086_v59 = vrot.slane %v5045_v37, %v10333_v8  ;;  %v12512_v42 = vld [vmem:[#allocation72_spill] sm:$0xff] }
 0x5cf   : > { %v6740_v39 = vpop.xlane.xlu1 %6739  ;;  %v5098_v41 = vrot.slane %v5045_v37, %v10342_v10  ;;  %v5102_v25 = vrot.slane %v5045_v37, %v10345_v20  ;;  %v5106_v26 = vrot.slane %v5045_v37, %v10348_v51 }
 0x5d0   : > { %v6756_v38 = vsub.f32 %v11109_v21, %v6740_v39  ;;  %v5090_v21 = vrot.slane %v5045_v37, %v10336_v27  ;;  %v11273_v13 = vsub.f32 %v10915_v48, %v5078_v60  ;;  %v11276_v29 = vsub.f32 %v10917_v52, %v5082_v35 }
 0x5d1   : > { %v11303_v12 = vsub.f32 %v12517_v0, %v5102_v25 }
 0x5d2   : > { %v6767_v33 = vmul.f32 1.442695, %v6756_v38  ;;  %v11279_v31 = vpop.xlane.xlu0 %5056 }
 0x5d3   : > { %v6734_v53 = vpop.xlane.xlu1 %6733 }
 0x5d4   : > { %v6754_v19 = vsub.f32 %v11086_v28, %v6734_v53  ;;  %v5094_v28 = vrot.slane %v5045_v37, %v10339_v5  ;;  %v11284_v53 = vsub.f32 %v12512_v42, %v5086_v59  ;;  %v12516_v59 = vld [vmem:[#allocation75_spill] sm:$0xff] }
 0x5d5   : > { %v11300_v42 = vsub.f32 %v12516_v59, %v5098_v41 }
 0x5d6   : > { %v6763_v32 = vmul.f32 1.442695, %v6754_v19 }
 0x5d7   : > { %v5048_v15 = vpop.xlane.xlu1 %5047 }
 0x5d8   : > { %8357 = vpow2.f32 %v6763_v32  ;;  %v5110_v55 = vrot.slane %v5048_v15, %v10327_v47  ;;  %v5114_v36 = vrot.slane %v5048_v15, %v10330_v62  ;;  %v5118_v39 = vrot.slane %v5048_v15, %v10333_v8  ;;  %v11281_v46 = vpop.eup %8355 }
 0x5d9   : > { %8359 = vpow2.f32 %v6765_v9  ;;  %12511 = vst [vmem:[#allocation22_spill] sm:$0xff] %v11281_v46  ;;  %v5122_v38 = vrot.slane %v5048_v15, %v10336_v27  ;;  %v5126_v19 = vrot.slane %v5048_v15, %v10339_v5  ;;  %v12514_v9 = vld [vmem:[#allocation73_spill] sm:$0xff]  ;;  %v5130_v60 = vrot.slane %v5048_v15, %v10342_v10 }
 0x5da   : > { %8361 = vpow2.f32 %v6767_v33  ;;  %v5333_v32 = vsub.f32 %v10963_v22, %v5110_v55  ;;  %v11292_v52 = vsub.f32 %v12514_v9, %v5090_v21  ;;  %v12515_v33 = vld [vmem:[#allocation74_spill] sm:$0xff]  ;;  %v5334_v35 = vsub.f32 %v10965_v14, %v5114_v36 }
 0x5db   : > { %v11295_v37 = vsub.f32 %v12515_v33, %v5094_v28  ;;  %v11306_v22 = vsub.f32 %v12518_v11, %v5106_v26  ;;  %v5060_v21 = vpop.xlane.xlu1 %5059  ;;  %v5134_v28 = vrot.slane %v5048_v15, %v10345_v20  ;;  %v5138_v9 = vrot.slane %v5048_v15, %v10348_v51 }
 0x5dc   : > { %v5335_v33 = vsub.f32 %v10967_v6, %v5118_v39  ;;  %v6777_v14 = vsel %vm3484_vm6, %v11281_v46, 0.0  ;;  %v5336_v0 = vsub.f32 %v10969_v63, %v5122_v38  ;;  %v5337_v11 = vsub.f32 %v10973_v57, %v5126_v19 }
 0x5dd   : > { %12519 = vst [vmem:[#allocation8_spill] sm:$0xff] %v11306_v22  ;;  %6778 = vadd.xlane.f32.xlu0 %v6777_v14  ;;  %v5391_v25 = vmul.f32 1.442695, %v5333_v32  ;;  %v5338_v15 = vsub.f32 %v10975_v40, %v5130_v60  ;;  %v5210_v6 = vrot.slane %v5060_v21, %v10327_v47  ;;  %v5214_v39 = vrot.slane %v5060_v21, %v10330_v62  ;;  %v12521_v32 = vld [vmem:[#allocation6_spill] sm:$0xff]  ;;  %v5051_v22 = vpop.xlane.xlu0 %5050 }
 0x5de   : > { %v5393_v59 = vmul.f32 1.442695, %v5334_v35  ;;  %v5218_v55 = vrot.slane %v5060_v21, %v10333_v8  ;;  %v5222_v63 = vrot.slane %v5060_v21, %v10336_v27  ;;  %v5226_v57 = vrot.slane %v5060_v21, %v10339_v5 }
 0x5df   : > { %8363 = vpow2.f32 %v5391_v25  ;;  %v5230_v38 = vrot.slane %v5060_v21, %v10342_v10  ;;  %v5234_v19 = vrot.slane %v5060_v21, %v10345_v20  ;;  %v5339_v60 = vsub.f32 %v12521_v32, %v5134_v28 }
 0x5e0   : > { %8365 = vpow2.f32 %v5393_v59  ;;  %v5238_v46 = vrot.slane %v5060_v21, %v10348_v51  ;;  %v5358_v44 = vsub.f32 %v11100_v1, %v5210_v6  ;;  %v5359_v59 = vsub.f32 %v11103_v45, %v5214_v39 }
 0x5e1   : > { %v5360_v28 = vsub.f32 %v11105_v58, %v5218_v55  ;;  %v5361_v32 = vsub.f32 %v11107_v54, %v5222_v63  ;;  %v5362_v35 = vsub.f32 %v11111_v7, %v5226_v57  ;;  %v5142_v21 = vrot.slane %v5051_v22, %v10327_v47  ;;  %v12523_v63 = vld [vmem:[#allocation43_spill] sm:$0xff] }
 0x5e2   : > { %v11289_v48 = vpop.eup %8357  ;;  %v5146_v1 = vrot.slane %v5051_v22, %v10330_v62  ;;  %v5150_v45 = vrot.slane %v5051_v22, %v10333_v8  ;;  %v5154_v58 = vrot.slane %v5051_v22, %v10336_v27  ;;  %v5158_v55 = vrot.slane %v5051_v22, %v10339_v5 }
 0x5e3   : > { %12513 = vst [vmem:[#allocation17_spill] sm:$0xff] %v11289_v48  ;;  %v11315_v36 = vpop.eup %8359  ;;  %v6780_v41 = vsel %vm3484_vm6, %v11289_v48, 0.0  ;;  %v12522_v48 = vld [vmem:[#allocation63_spill] sm:$0xff]  ;;  %v5162_v7 = vrot.slane %v5051_v22, %v10342_v10  ;;  %v5341_v39 = vsub.f32 %v12483_v30, %v5142_v21  ;;  %v5447_v21 = vmul.f32 1.442695, %v5361_v32 }
 0x5e4   : > { %12520 = vst [vmem:[#allocation34_spill] sm:$0xff] %v11315_v36  ;;  %v11321_v26 = vpop.eup %8361  ;;  %6781 = vadd.xlane.f32.xlu1 %v6780_v41  ;;  %v6783_v40 = vsel %vm3484_vm6, %v11315_v36, 0.0  ;;  %v5395_v41 = vmul.f32 1.442695, %v5335_v33  ;;  %v5340_v25 = vsub.f32 %v12522_v48, %v5138_v9  ;;  %v5397_v36 = vmul.f32 1.442695, %v5336_v0 }
 0x5e5   : > { %6784 = vadd.xlane.f32.xlu0 %v6783_v40  ;;  %v6786_v14 = vsel %vm3494_vm7, %v11321_v26, 0.0  ;;  %v5399_v40 = vmul.f32 1.442695, %v5337_v11  ;;  %v5363_v33 = vsub.f32 %v11113_v2, %v5230_v38  ;;  %v5364_v48 = vsub.f32 %v11119_v34, %v5234_v19 }
 0x5e6   : > { %v5401_v9 = vmul.f32 1.442695, %v5338_v15  ;;  %8367 = vpow2.f32 %v5395_v41  ;;  %v5403_v0 = vmul.f32 1.442695, %v5339_v60  ;;  %v5405_v54 = vmul.f32 1.442695, %v5340_v25 }
 0x5e7   : > { %8369 = vpow2.f32 %v5397_v36  ;;  %v5166_v2 = vrot.slane %v5051_v22, %v10345_v20  ;;  %v5365_v34 = vsub.f32 %v11121_v61, %v5238_v46  ;;  %v5170_v11 = vrot.slane %v5051_v22, %v10348_v51  ;;  %v12524_v60 = vld [vmem:[#allocation68_spill] sm:$0xff]  ;;  %v12525_v41 = vld [vmem:[#allocation70_spill] sm:$0xff]  ;;  %v12526_v22 = vld [vmem:[#allocation71_spill] sm:$0xff] }
 0x5e8   : > { %6787 = vadd.xlane.f32.xlu1 %v6786_v14  ;;  %8371 = vpow2.f32 %v5399_v40  ;;  %v5441_v15 = vmul.f32 1.442695, %v5358_v44  ;;  %v5342_v36 = vsub.f32 %v12523_v63, %v5146_v1  ;;  %v5443_v38 = vmul.f32 1.442695, %v5359_v59  ;;  %v12527_v25 = vld [vmem:[#allocation7_spill] sm:$0xff]  ;;  %v12529_v1 = vld [vmem:[#allocation38_spill] sm:$0xff] }
 0x5e9   : > { %8373 = vpow2.f32 %v5401_v9  ;;  %v11356_v6 = vpop.eup %8363  ;;  %v11360_v57 = vpop.xlane.xlu1 %5062  ;;  %v5343_v14 = vsub.f32 %v12524_v60, %v5150_v45  ;;  %v5344_v61 = vsub.f32 %v12525_v41, %v5154_v58  ;;  %v5445_v46 = vmul.f32 1.442695, %v5360_v28  ;;  %v12528_v9 = vld [vmem:[#allocation33_spill] sm:$0xff] }
 0x5ea   : > { %8375 = vpow2.f32 %v5403_v0  ;;  %v11362_v19 = vpop.eup %8365  ;;  %v5345_v44 = vsub.f32 %v12526_v22, %v5158_v55  ;;  %v5346_v40 = vsub.f32 %v12527_v25, %v5162_v7  ;;  %v5347_v30 = vsub.f32 %v12528_v9, %v5166_v2 }
 0x5eb   : > { %8377 = vpow2.f32 %v5405_v54  ;;  %v5348_v63 = vsub.f32 %v12529_v1, %v5170_v11  ;;  %v5242_v59 = vrot.slane %v11360_v57, %v10327_v47  ;;  %v5449_v0 = vmul.f32 1.442695, %v5362_v35 }
 0x5ec   : > { %8379 = vpow2.f32 %v5441_v15  ;;  %v5246_v45 = vrot.slane %v11360_v57, %v10330_v62  ;;  %v5574_v28 = vcombine.low %v11356_v6, %v11362_v19  ;;  %v5451_v58 = vmul.f32 1.442695, %v5363_v33 }
 0x5ed   : > { %8381 = vpow2.f32 %v5443_v38  ;;  %v5250_v54 = vrot.slane %v11360_v57, %v10333_v8  ;;  %v5254_v32 = vrot.slane %v11360_v57, %v10336_v27  ;;  %v5453_v55 = vmul.f32 1.442695, %v5364_v48 }
 0x5ee   : > { %8383 = vpow2.f32 %v5445_v46  ;;  %v5258_v35 = vrot.slane %v11360_v57, %v10339_v5  ;;  %v5262_v2 = vrot.slane %v11360_v57, %v10342_v10  ;;  %v5455_v11 = vmul.f32 1.442695, %v5365_v34 }
 0x5ef   : > { %8385 = vpow2.f32 %v5447_v21  ;;  %v5266_v33 = vrot.slane %v11360_v57, %v10345_v20  ;;  %v5270_v38 = vrot.slane %v11360_v57, %v10348_v51  ;;  %v5407_v48 = vmul.f32 1.442695, %v5341_v39 }
 0x5f0   : > { %v11380_v7 = vpop.eup %8367  ;;  %8387 = vpow2.f32 %v5449_v0  ;;  %v5584_v46 = vrot.slane %v5574_v28, %v9101_v18  ;;  %v5409_v22 = vmul.f32 1.442695, %v5342_v36  ;;  %v5366_v25 = vsub.f32 %v11188_v17, %v5242_v59 }
 0x5f1   : > { %v11386_v15 = vpop.eup %8369  ;;  %8389 = vpow2.f32 %v5451_v58  ;;  %v5367_v9 = vsub.f32 %v11190_v16, %v5246_v45  ;;  %v5411_v21 = vmul.f32 1.442695, %v5343_v14  ;;  %v5413_v0 = vmul.f32 1.442695, %v5344_v61 }
 0x5f2   : > { %v11392_v60 = vpop.eup %8371  ;;  %v5575_v41 = vcombine.low %v11380_v7, %v11386_v15  ;;  %8391 = vpow2.f32 %v5453_v55  ;;  %v5368_v36 = vsub.f32 %v11194_v3, %v5250_v54  ;;  %v5415_v58 = vmul.f32 1.442695, %v5345_v44 }
 0x5f3   : > { %v11397_v34 = vpop.eup %8373  ;;  %8393 = vpow2.f32 %v5455_v11  ;;  %v5417_v17 = vmul.f32 1.442695, %v5346_v40  ;;  %v5369_v55 = vsub.f32 %v11196_v49, %v5254_v32  ;;  %v5370_v61 = vsub.f32 %v11198_v24, %v5258_v35 }
 0x5f4   : > { %v11401_v57 = vpop.eup %8375  ;;  %v5576_v39 = vcombine.low %v11392_v60, %v11397_v34  ;;  %v5591_v1 = vrot.slane %v5575_v41, %v9101_v18  ;;  %8395 = vpow2.f32 %v5407_v48  ;;  %v5419_v11 = vmul.f32 1.442695, %v5347_v30  ;;  %v11427_v30 = vpop.xlane.xlu1 %5053 }
 0x5f5   : > { %v11406_v28 = vpop.eup %8377  ;;  %8397 = vpow2.f32 %v5409_v22  ;;  %v5371_v3 = vsub.f32 %v11200_v56, %v5262_v2  ;;  %v5421_v40 = vmul.f32 1.442695, %v5348_v63  ;;  %v5372_v48 = vsub.f32 %v11202_v50, %v5266_v33 }
 0x5f6   : > { %v5577_v16 = vcombine.low %v11401_v57, %v11406_v28  ;;  %v5598_v14 = vrot.slane %v5576_v39, %v9101_v18  ;;  %v5606_v59 = vcombine.low %v5584_v46, %v5591_v1  ;;  %v11412_v45 = vpop.eup %8379  ;;  %8399 = vpow2.f32 %v5411_v21 }
 0x5f7   : > { %v11416_v41 = vpop.eup %8381  ;;  %8401 = vpow2.f32 %v5413_v0  ;;  %v5457_v49 = vmul.f32 1.442695, %v5366_v25  ;;  %v5459_v35 = vmul.f32 1.442695, %v5367_v9  ;;  %v5461_v33 = vmul.f32 1.442695, %v5368_v36 }
 0x5f8   : > { %v5605_v44 = vrot.slane %v5577_v16, %v9101_v18  ;;  %v11420_v54 = vpop.eup %8383  ;;  %v5735_v46 = vcombine.low %v11412_v45, %v11416_v41  ;;  %8403 = vpow2.f32 %v5415_v58  ;;  %v5614_v56 = vrot.slane %v5606_v59, %v9101_v18 }
 0x5f9   : > { %v11425_v24 = vpop.eup %8385  ;;  %8405 = vpow2.f32 %v5417_v17  ;;  %v5373_v25 = vsub.f32 %v11204_v43, %v5270_v38  ;;  %v5463_v39 = vmul.f32 1.442695, %v5369_v55  ;;  %v5465_v58 = vmul.f32 1.442695, %v5370_v61  ;;  %v6746_v43 = vpop.xlane.xlu1 %6745 }
 0x5fa   : > { %v5607_v32 = vcombine.low %v5598_v14, %v5605_v44  ;;  %v11430_v2 = vpop.eup %8387  ;;  %v5736_v63 = vcombine.low %v11420_v54, %v11425_v24  ;;  %v5745_v50 = vrot.slane %v5735_v46, %v9101_v18  ;;  %8407 = vpow2.f32 %v5419_v11 }
 0x5fb   : > { %v11435_v22 = vpop.eup %8389  ;;  %8409 = vpow2.f32 %v5421_v40  ;;  %v5467_v16 = vmul.f32 1.442695, %v5371_v3  ;;  %v5469_v14 = vmul.f32 1.442695, %v5372_v48  ;;  %v5471_v3 = vmul.f32 1.442695, %v5373_v25 }
 0x5fc   : > { %v5621_v21 = vrot.slane %v5607_v32, %v9101_v18  ;;  %v11439_v1 = vpop.eup %8391  ;;  %v5737_v9 = vcombine.low %v11430_v2, %v11435_v22  ;;  %v5752_v0 = vrot.slane %v5736_v63, %v9101_v18  ;;  %8411 = vpow2.f32 %v5457_v49 }
 0x5fd   : > { %v11444_v17 = vpop.eup %8393  ;;  %8413 = vpow2.f32 %v5459_v35  ;;  %v6758_v32 = vsub.f32 %v11237_v4, %v6746_v43  ;;  %v6752_v61 = vpop.xlane.xlu1 %6751 }
 0x5fe   : > { %v5622_v36 = vcombine.low %v5614_v56, %v5621_v21  ;;  %v11446_v38 = vpop.eup %8395  ;;  %v5738_v59 = vcombine.low %v11439_v1, %v11444_v17  ;;  %v5759_v55 = vrot.slane %v5737_v9, %v9101_v18  ;;  %v5767_v11 = vcombine.low %v5745_v50, %v5752_v0  ;;  %v11462_v56 = vpop.xlane.xlu0 %6748 }
 0x5ff   : > { %8415 = vpow2.f32 %v5461_v33  ;;  %v11451_v44 = vpop.eup %8397  ;;  %v5198_v0 = vrot.slane %v11279_v31, %v10342_v10 }
 0x600   : > { %v5858_v40 = vsel %vm3484_vm6, %v5622_v36, 0.0  ;;  %8417 = vpow2.f32 %v5463_v39  ;;  %v11456_v48 = vpop.eup %8399  ;;  %v5766_v46 = vrot.slane %v5738_v59, %v9101_v18  ;;  %v5623_v49 = vcombine.low %v11446_v38, %v11451_v44 }
 0x601   : > { %5859 = vadd.xlane.f32.xlu1 %v5858_v40  ;;  %8419 = vpow2.f32 %v5465_v58  ;;  %v11464_v35 = vpop.eup %8401  ;;  %v5775_v33 = vrot.slane %v5767_v11, %v9101_v18  ;;  %v5375_v36 = vmul.f32 1.442695, %v11273_v13 }
 0x602   : > { %12530 = vst [vmem:[#allocation39_spill] sm:$0xff] %v11464_v35  ;;  %8421 = vpow2.f32 %v5467_v16  ;;  %v11471_v25 = vpop.eup %8403  ;;  %v5768_v21 = vcombine.low %v5759_v55, %v5766_v46  ;;  %v5624_v39 = vcombine.low %v11456_v48, %v11464_v35  ;;  %v5633_v4 = vrot.slane %v5623_v49, %v9101_v18  ;;  %v12536_v46 = vld [vmem:[#allocation64_spill] sm:$0xff]  ;;  %v11504_v40 = vpop.xlane.xlu0 %6742 }
 0x603   : > { %12531 = vst [vmem:[#allocation12_spill] sm:$0xff] %v11471_v25  ;;  %8423 = vpow2.f32 %v5469_v14  ;;  %v11476_v9 = vpop.eup %8405  ;;  %v6771_v55 = vmul.f32 1.442695, %v6758_v32  ;;  %v5377_v49 = vmul.f32 1.442695, %v11276_v29  ;;  %v12540_v29 = vld [vmem:[#allocation65_spill] sm:$0xff] }
 0x604   : > { %12532 = vst [vmem:[#allocation23_spill] sm:$0xff] %v11476_v9  ;;  %8425 = vpow2.f32 %v5471_v3  ;;  %v11483_v16 = vpop.eup %8407  ;;  %v5782_v43 = vrot.slane %v5768_v21, %v9101_v18  ;;  %v5625_v59 = vcombine.low %v11471_v25, %v11476_v9  ;;  %v5640_v14 = vrot.slane %v5624_v39, %v9101_v18 }
 0x605   : > { %12533 = vst [vmem:[#allocation76_spill] sm:$0xff] %v11483_v16  ;;  %v11489_v11 = vpop.eup %8409  ;;  %v12535_v3 = vrot.slane %v11279_v31, %v10327_v47  ;;  %v5379_v21 = vmul.f32 1.442695, %v11284_v53  ;;  %8427 = vpow2.f32 %v5375_v36  ;;  %v5381_v53 = vmul.f32 1.442695, %v11292_v52 }
 0x606   : > { %12534 = vst [vmem:[#allocation2_spill] sm:$0xff] %v11489_v11  ;;  %v11499_v58 = vpop.eup %8411  ;;  %v5783_v50 = vcombine.low %v5775_v33, %v5782_v43  ;;  %v5626_v32 = vcombine.low %v11483_v16, %v11489_v11  ;;  %v5647_v39 = vrot.slane %v5625_v59, %v9101_v18  ;;  %v5655_v63 = vcombine.low %v5633_v4, %v5640_v14 }
 0x607   : > { %v5350_v13 = vsub.f32 %v12536_v46, %v12535_v3  ;;  %12537 = vst [vmem:[#allocation28_spill] sm:$0xff] %v11499_v58  ;;  %v11506_v9 = vpop.eup %8413  ;;  %v12539_v3 = vrot.slane %v11279_v31, %v10330_v62  ;;  %v5383_v33 = vmul.f32 1.442695, %v11295_v37  ;;  %8429 = vpow2.f32 %v6771_v55 }
 0x608   : > { %12538 = vst [vmem:[#allocation18_spill] sm:$0xff] %v11506_v9  ;;  %v5870_v59 = vsel %vm3484_vm6, %v5783_v50, 0.0  ;;  %v5654_v4 = vrot.slane %v5626_v32, %v9101_v18  ;;  %v5784_v14 = vcombine.low %v11499_v58, %v11506_v9  ;;  %8431 = vpow2.f32 %v5377_v49 }
 0x609   : > { %v5351_v46 = vsub.f32 %v12540_v29, %v12539_v3  ;;  %v11514_v43 = vpop.eup %8415  ;;  %5871 = vadd.xlane.f32.xlu1 %v5870_v59  ;;  %v5663_v3 = vrot.slane %v5655_v63, %v9101_v18  ;;  %v5385_v52 = vmul.f32 1.442695, %v11300_v42  ;;  %v6760_v37 = vsub.f32 %v11244_v23, %v6752_v61  ;;  %v12546_v63 = vld [vmem:[#allocation66_spill] sm:$0xff]  ;;  %v12547_v23 = vld [vmem:[#allocation8_spill] sm:$0xff] }
 0x60a   : > { %12541 = vst [vmem:[#allocation72_spill] sm:$0xff] %v11514_v43  ;;  %v11520_v11 = vpop.eup %8417  ;;  %v5656_v29 = vcombine.low %v5647_v39, %v5654_v4  ;;  %v5794_v32 = vrot.slane %v5784_v14, %v9101_v18  ;;  %8433 = vpow2.f32 %v5379_v21  ;;  %v12545_v59 = vrot.slane %v11279_v31, %v10333_v8  ;;  %v5066_v14 = vpop.xlane.xlu0 %5065 }
 0x60b   : > { %12542 = vst [vmem:[#allocation73_spill] sm:$0xff] %v11520_v11  ;;  %v11525_v36 = vpop.eup %8419  ;;  %v5785_v50 = vcombine.low %v11514_v43, %v11520_v11  ;;  %8435 = vpow2.f32 %v5381_v53  ;;  %v5387_v42 = vmul.f32 1.442695, %v11303_v12  ;;  %v5389_v61 = vmul.f32 1.442695, %v12547_v23  ;;  %v12551_v23 = vld [vmem:[#allocation77_spill] sm:$0xff] }
 0x60c   : > { %12543 = vst [vmem:[#allocation74_spill] sm:$0xff] %v11525_v36  ;;  %v11530_v55 = vpop.eup %8421  ;;  %v5352_v49 = vsub.f32 %v12546_v63, %v12545_v59  ;;  %v5670_v39 = vrot.slane %v5656_v29, %v9101_v18  ;;  %8437 = vpow2.f32 %v5383_v33  ;;  %v12548_v53 = vrot.slane %v11279_v31, %v10336_v27  ;;  %v12549_v59 = vld [vmem:[#allocation67_spill] sm:$0xff] }
 0x60d   : > { %12544 = vst [vmem:[#allocation75_spill] sm:$0xff] %v11530_v55  ;;  %v11538_v9 = vpop.eup %8423  ;;  %v5786_v4 = vcombine.low %v11525_v36, %v11530_v55  ;;  %v5801_v21 = vrot.slane %v5785_v50, %v9101_v18  ;;  %v12550_v63 = vrot.slane %v11279_v31, %v10339_v5  ;;  %8439 = vpow2.f32 %v5385_v52  ;;  %v12552_v36 = vld [vmem:[#allocation78_spill] sm:$0xff] }
 0x60e   : > { %v11544_v11 = vpop.eup %8425  ;;  %v5353_v12 = vsub.f32 %v12549_v59, %v12548_v53  ;;  %v6775_v29 = vmul.f32 1.442695, %v6760_v37  ;;  %v5671_v58 = vcombine.low %v5663_v3, %v5670_v39  ;;  %v5355_v16 = vsub.f32 %v12552_v36, %v5198_v0  ;;  %v12554_v39 = vld [vmem:[#allocation81_spill] sm:$0xff] }
 0x60f   : > { %v5354_v43 = vsub.f32 %v12551_v23, %v12550_v63  ;;  %v5787_v50 = vcombine.low %v11538_v9, %v11544_v11  ;;  %v5808_v33 = vrot.slane %v5786_v4, %v9101_v18  ;;  %v5816_v55 = vcombine.low %v5794_v32, %v5801_v21  ;;  %v11561_v37 = vpop.eup %8427  ;;  %v12557_v63 = vld [vmem:[#allocation79_spill] sm:$0xff] }
 0x610   : > { %8441 = vpow2.f32 %v5387_v42  ;;  %v5425_v25 = vmul.f32 1.442695, %v5350_v13  ;;  %v5274_v53 = vrot.slane %v5066_v14, %v10327_v47  ;;  %v5861_v59 = vsel %vm3484_vm6, %v5671_v58, 0.0  ;;  %v12556_v58 = vld [vmem:[#allocation82_spill] sm:$0xff] }
 0x611   : > { %v5815_v35 = vrot.slane %v5787_v50, %v9101_v18  ;;  %8443 = vpow2.f32 %v5389_v61  ;;  %v5427_v52 = vmul.f32 1.442695, %v5351_v46  ;;  %v12553_v3 = vrot.slane %v11279_v31, %v10345_v20  ;;  %5862 = vadd.xlane.f32.xlu0 %v5861_v59  ;;  %v11567_v36 = vpop.eup %8429 }
 0x612   : > { %8445 = vpow2.f32 %v6775_v29  ;;  %v5429_v0 = vmul.f32 1.442695, %v5352_v49  ;;  %v12555_v13 = vrot.slane %v11279_v31, %v10348_v51  ;;  %v5824_v46 = vrot.slane %v5816_v55, %v9101_v18  ;;  %v11574_v21 = vpop.eup %8431 }
 0x613   : > { %v5356_v4 = vsub.f32 %v12554_v39, %v12553_v3  ;;  %v5817_v42 = vcombine.low %v5808_v33, %v5815_v35  ;;  %v5431_v61 = vmul.f32 1.442695, %v5353_v12  ;;  %8447 = vpow2.f32 %v5425_v25 }
 0x614   : > { %v5357_v32 = vsub.f32 %v12556_v58, %v12555_v13  ;;  %v5433_v14 = vmul.f32 1.442695, %v5354_v43  ;;  %v5374_v23 = vsub.f32 %v12557_v63, %v5274_v53  ;;  %v11577_v50 = vpop.eup %8433  ;;  %v5525_v29 = vcombine.low %v11561_v37, %v11574_v21 }
 0x615   : > { %v5831_v49 = vrot.slane %v5817_v42, %v9101_v18  ;;  %8449 = vpow2.f32 %v5427_v52  ;;  %v5435_v31 = vmul.f32 1.442695, %v5355_v16  ;;  %v11582_v59 = vpop.eup %8435  ;;  %v5437_v35 = vmul.f32 1.442695, %v5356_v4 }
 0x616   : > { %8451 = vpow2.f32 %v5429_v0  ;;  %v11584_v55 = vpop.eup %8437  ;;  %v5526_v25 = vcombine.low %v11577_v50, %v11582_v59  ;;  %v5439_v43 = vmul.f32 1.442695, %v5357_v32  ;;  %v5535_v53 = vrot.slane %v5525_v29, %v9101_v18  ;;  %v12560_v29 = vld [vmem:[#allocation69_spill] sm:$0xff] }
 0x617   : > { %v5832_v12 = vcombine.low %v5824_v46, %v5831_v49  ;;  %8453 = vpow2.f32 %v5431_v61  ;;  %v11588_v33 = vpop.eup %8439  ;;  %v5473_v3 = vmul.f32 1.442695, %v5374_v23  ;;  %v5174_v13 = vrot.slane %v11427_v30, %v10327_v47 }
 0x618   : > { %8455 = vpow2.f32 %v5433_v14  ;;  %v5527_v52 = vcombine.low %v11584_v55, %v11588_v33  ;;  %v5542_v39 = vrot.slane %v5526_v25, %v9101_v18  ;;  %v6792_v58 = vsel %vm3484_vm6, %v11567_v36, 0.0  ;;  %v12559_v14 = vld [vmem:[#allocation80_spill] sm:$0xff] }
 0x619   : > { %v5873_v16 = vsel %vm3484_vm6, %v5832_v12, 0.0  ;;  %8457 = vpow2.f32 %v5435_v31  ;;  %v6757_v63 = vsub.f32 %v12559_v14, %v11504_v40  ;;  %v5349_v31 = vsub.f32 %v12560_v29, %v5174_v13 }
 0x61a   : > { %v11595_v4 = vpop.eup %8441  ;;  %5874 = vadd.xlane.f32.xlu1 %v5873_v16  ;;  %8459 = vpow2.f32 %v5437_v35  ;;  %v5549_v46 = vrot.slane %v5527_v52, %v9101_v18  ;;  %v5557_v61 = vcombine.low %v5535_v53, %v5542_v39 }
 0x61b   : > { %v11597_v0 = vpop.eup %8443  ;;  %8461 = vpow2.f32 %v5439_v43 }
 0x61c   : > { %v11603_v32 = vpop.eup %8445  ;;  %v5528_v42 = vcombine.low %v11595_v4, %v11597_v0  ;;  %8463 = vpow2.f32 %v5473_v3  ;;  %v5565_v43 = vrot.slane %v5557_v61, %v9101_v18  ;;  %v6769_v3 = vmul.f32 1.442695, %v6757_v63 }
 0x61d   : > { %12558 = vst [vmem:[#allocation15_spill] sm:$0xff] %v11603_v32  ;;  %v11610_v23 = vpop.eup %8447  ;;  %v6798_v35 = vsel %vm3494_vm7, %v11603_v32, 0.0 }
 0x61e   : > { %v5556_v30 = vrot.slane %v5528_v42, %v9101_v18  ;;  %6793 = vadd.xlane.f32.xlu1 %v6792_v58  ;;  %v5423_v42 = vmul.f32 1.442695, %v5349_v31  ;;  %8465 = vpow2.f32 %v6769_v3 }
 0x61f   : > { %v11613_v49 = vpop.eup %8449 }
 0x620   : > { %v11618_v12 = vpop.eup %8451  ;;  %v5558_v25 = vcombine.low %v5549_v46, %v5556_v30  ;;  %v5686_v40 = vcombine.low %v11610_v23, %v11613_v49  ;;  %v12564_v46 = vld [vmem:[#allocation27_spill] sm:$0xff]  ;;  %8467 = vpow2.f32 %v5423_v42 }
 0x621   : > { %v11623_v53 = vpop.eup %8453  ;;  %v6759_v61 = vsub.f32 %v12564_v46, %v11462_v56 }
 0x622   : > { %12561 = vst [vmem:[#allocation25_spill] sm:$0xff] %v11623_v53  ;;  %v11625_v16 = vpop.eup %8455  ;;  %v5572_v52 = vrot.slane %v5558_v25, %v9101_v18  ;;  %v5687_v39 = vcombine.low %v11618_v12, %v11623_v53  ;;  %v5696_v13 = vrot.slane %v5686_v40, %v9101_v18  ;;  %6799 = vadd.xlane.f32.xlu1 %v6798_v35 }
 0x623   : > { %12562 = vst [vmem:[#allocation6_spill] sm:$0xff] %v11625_v16  ;;  %v11631_v58 = vpop.eup %8457 }
 0x624   : > { %12563 = vst [vmem:[#allocation63_spill] sm:$0xff] %v11631_v58  ;;  %v11635_v14 = vpop.eup %8459  ;;  %v5573_v30 = vcombine.low %v5565_v43, %v5572_v52  ;;  %v5688_v63 = vcombine.low %v11625_v16, %v11631_v58  ;;  %v5703_v29 = vrot.slane %v5687_v39, %v9101_v18  ;;  %v6773_v43 = vmul.f32 1.442695, %v6759_v61  ;;  %v12574_v16 = vld [vmem:[#allocation14_spill] sm:$0xff] }
 0x625   : > { %12565 = vst [vmem:[#allocation43_spill] sm:$0xff] %v11635_v14  ;;  %v11640_v25 = vpop.eup %8461 }
 0x626   : > { %12566 = vst [vmem:[#allocation68_spill] sm:$0xff] %v11640_v25  ;;  %v11642_v32 = vpop.eup %8463  ;;  %v5855_v35 = vsel %vm3484_vm6, %v5573_v30, 0.0  ;;  %v5689_v31 = vcombine.low %v11635_v14, %v11640_v25  ;;  %v5710_v56 = vrot.slane %v5688_v63, %v9101_v18  ;;  %v5718_v40 = vcombine.low %v5696_v13, %v5703_v29 }
 0x627   : > { %12567 = vst [vmem:[#allocation70_spill] sm:$0xff] %v11642_v32  ;;  %5856 = vadd.xlane.f32.xlu0 %v5855_v35  ;;  %v5839_v52 = vrot.slane %v11642_v32, %v9101_v18  ;;  %8469 = vpow2.f32 %v6773_v43  ;;  %v12227_v43 = vmov 0.0|0.0  }
 0x628   : > { %v5717_v39 = vrot.slane %v5689_v31, %v9101_v18  ;;  %v5726_v58 = vrot.slane %v5718_v40, %v9101_v18  ;;  %v11655_v42 = vpop.eup %8465  ;;  %v12225_v40 = vmov 0.0   ;;  %8254 = vmatprep.subr.bf16.mxu0 %v12227_v43 }
 0x629   : > { %v5846_v3 = vrot.slane %v5839_v52, %v9101_v18  ;;  %12568 = vst [vmem:[#allocation71_spill] sm:$0xff] %v11655_v42  ;;  %v6789_v29 = vsel %vm3484_vm6, %v11655_v42, 0.0  ;;  %6920 = vmatprep.mubr.f32.mxu1 %v12225_v40  ;;  %7145 = vmatprep.mubr.f32.mxu0 %v12225_v40 }
 0x62a   : > { %v5719_v46 = vcombine.low %v5710_v56, %v5717_v39  ;;  %v11658_v63 = vpop.eup %8467 }
 0x62b   : > { %v5876_v30 = vsel %vm3494_vm7, %v5846_v3, 0.0  ;;  %12569 = vst [vmem:[#allocation7_spill] sm:$0xff] %v11658_v63  ;;  %v5678_v35 = vrot.slane %v11658_v63, %v9101_v18  ;;  %v12573_v63 = vld [vmem:[#allocation34_spill] sm:$0xff] }
 0x62c   : > { %v5733_v25 = vrot.slane %v5719_v46, %v9101_v18  ;;  %5877 = vadd.xlane.f32.xlu1 %v5876_v30 }
 0x62e   : > { %v5734_v13 = vcombine.low %v5726_v58, %v5733_v25  ;;  %v5685_v58 = vrot.slane %v5678_v35, %v9101_v18  ;;  %v12572_v35 = vld [vmem:[#allocation17_spill] sm:$0xff] }
 0x630   : > { %v5867_v61 = vsel %vm3484_vm6, %v5734_v13, 0.0  ;;  %v5864_v25 = vsel %vm3494_vm7, %v5685_v58, 0.0 }
 0x631   : > { %5868 = vadd.xlane.f32.xlu0 %v5867_v61  ;;  %v11664_v31 = vpop.eup %8469  ;;  %v12571_v61 = vld [vmem:[#allocation22_spill] sm:$0xff] }
 0x632   : > { %12570 = vst [vmem:[#allocation33_spill] sm:$0xff] %v11664_v31  ;;  %v6795_v56 = vsel %vm3484_vm6, %v11664_v31, 0.0 }
 0x635   : > { %6790 = vadd.xlane.f32.xlu0 %v6789_v29 }
 0x639   : > { %6796 = vadd.xlane.f32.xlu0 %v6795_v56 }
 0x63d   : > { %5865 = vadd.xlane.f32.xlu0 %v5864_v25 }
 0x66a   : > { %v6779_v52 = vpop.xlane.xlu0 %6778 }
 0x66b   : > { %8471 = vrcp.f32 %v6779_v52 }
 0x671   : > { %v6782_v39 = vpop.xlane.xlu1 %6781 }
 0x672   : > { %8473 = vrcp.f32 %v6782_v39  ;;  %v6785_v3 = vpop.xlane.xlu0 %6784 }
 0x673   : > { %8475 = vrcp.f32 %v6785_v3 }
 0x675   : > { %v6788_v46 = vpop.xlane.xlu1 %6787  ;;  %v8472_v30 = vpop.eup %8471 }
 0x676   : > { %8477 = vrcp.f32 %v6788_v46  ;;  %v6809_v29 = vmul.f32 %v8472_v30, %v12571_v61 }
 0x678   : > { %v6817_v58 = vsel %vm3484_vm6, %v6809_v29, 0.0 }
 0x67c   : > { %v8474_v13 = vpop.eup %8473 }
 0x67d   : > { %v6810_v56 = vmul.f32 %v8474_v13, %v12572_v35  ;;  %v8476_v25 = vpop.eup %8475 }
 0x67e   : > { %v6811_v52 = vmul.f32 %v8476_v25, %v12573_v63  ;;  %v12576_v63 = vld [vmem:[#allocation10_spill] sm:$0xff] }
 0x67f   : > { %v6818_v40 = vsel %vm3484_vm6, %v6810_v56, 0.0  ;;  %v12575_v56 = vld [vmem:[#allocation24_spill] sm:$0xff] }
 0x680   : > { %v8478_v43 = vpop.eup %8477  ;;  %v6819_v31 = vadd.f32 %v6818_v40, %v6817_v58  ;;  %v6820_v3 = vsel %vm3484_vm6, %v6811_v52, 0.0  ;;  %v8219_v53 = vpack.c.bf16 %v12575_v56, %v12574_v16  ;;  %v12577_v40 = vld [vmem:[#allocation36_spill] sm:$0xff]  ;;  %v12582_v16 = vmov 0.0|0.0  }
 0x681   : > { %v6812_v39 = vmul.f32 %v8478_v43, %v11321_v26  ;;  %v8221_v26 = vpack.c.bf16 %v12577_v40, %v12576_v63  ;;  %v12578_v43 = vmov 0.0   ;;  %v12583_v52 = vld [vmem:[#allocation16_spill] sm:$0xff]  ;;  %v12589_v63 = vld [vmem:[#allocation19_spill] sm:$0xff]  ;;  %v12590_v40 = vld [vmem:[#allocation29_spill] sm:$0xff] }
 0x682   : > { %v6821_v46 = vadd.f32 %v6820_v3, %v6819_v31 }
 0x683   : > { %v6822_v32 = vsel %vm3494_vm7, %v6812_v39, 0.0  ;;  %v12584_v39 = vld [vmem:[#allocation26_spill] sm:$0xff] }
 0x684   : > { %v6823_v14 = vadd.f32 %v6822_v32, %v6821_v46  ;;  %v12580_v32 = vld [vmem:[#allocation9_spill] sm:$0xff]  ;;  %v8228_v3 = vpack.c.bf16 %v12584_v39, %v12583_v52  ;;  %v12585_v46 = vld [vmem:[#allocation11_spill] sm:$0xff]  ;;  %v12593_v52 = vld [vmem:[#allocation40_spill] sm:$0xff] }
 0x685   : > { %v12594_v39 = vld [vmem:[#allocation3_spill] sm:$0xff] }
 0x686   : > { %v6824_v30 = vrot.slane %v6823_v14, 4 }
 0x688   : > { %v6825_v61 = vadd.f32 %v6824_v30, %v6823_v14  ;;  %v12581_v14 = vld [vmem:[#allocation35_spill] sm:$0xff]  ;;  %v12586_v30 = vld [vmem:[#allocation37_spill] sm:$0xff] }
 0x689   : > { %v8224_v25 = vpack.c.bf16 %v12581_v14, %v12580_v32  ;;  %v12592_v32 = vld [vmem:[#allocation4_spill] sm:$0xff] }
 0x68a   : > { %v6826_v13 = vrot.slane %v6825_v61, 2 }
 0x68c   : > { %v6827_v35 = vadd.f32 %v6826_v13, %v6825_v61  ;;  %v8231_v61 = vpack.c.bf16 %v12586_v30, %v12585_v46  ;;  %v12587_v13 = vld [vmem:[#allocation20_spill] sm:$0xff] }
 0x68e   : > { %v6828_v29 = vrot.slane %v6827_v35, 1  ;;  %v5860_v31 = vpop.xlane.xlu1 %5859 }
 0x68f   : > { %8479 = vrcp.f32 %v5860_v31  ;;  %v12591_v31 = vld [vmem:[#allocation41_spill] sm:$0xff] }
 0x690   : > { %v6829_v42 = vadd.f32 %v6828_v29, %v6827_v35  ;;  %v12588_v35 = vld [vmem:[#allocation30_spill] sm:$0xff]  ;;  %v8248_v14 = vpack.c.bf16 %v12592_v32, %v12591_v31 }
 0x691   : > { %v8244_v29 = vpack.c.bf16 %v12588_v35, %v12587_v13 }
 0x692   : > { %7806 = vmatmul.mubr.msk.f32.vlgmr.msra.gmra.mrb[28].mxu1 %vm3484_vm6, %v6829_v42 }
 0x693   : > { %8220 = vmatpush1.bf16.msra.mxu1 %v8219_v53  ;;  %6991 = vmatprep.mubr.f32.mxu1 %v12578_v43 }
 0x694   : > { %8223 = vmatprep.subr.msk.bf16.mxu1 %vm10024_vm5, %v8221_v26  ;;  %v8246_v26 = vpack.c.bf16 %v12590_v40, %v12589_v63  ;;  %v12595_v63 = vld [vmem:[#allocation48_spill] sm:$0xff] }
 0x695   : > { %v12596_v40 = vld [vmem:[#allocation44_spill] sm:$0xff] }
 0x696   : > { %v5872_v53 = vpop.xlane.xlu1 %5871 }
 0x697   : > { %8226 = vmatpush1.bf16.msk.msra.mxu1 %vm10024_vm5, %v8224_v25  ;;  %8481 = vrcp.f32 %v5872_v53 }
 0x698   : > { %8227 = vmatprep.subr.bf16.mxu1 %v12582_v16 }
 0x699   : > { %v8480_v56 = vpop.eup %8479 }
 0x69a   : > { %7809 = vmatmul.mubr.msk.f32.vlgmr.msra.gmra.mrb[30].mxu1 %vm3484_vm6, %v6829_v42  ;;  %v5930_v53 = vrot.slane %v8480_v56, %v10327_v47  ;;  %v5934_v46 = vrot.slane %v8480_v56, %v10330_v62  ;;  %v5938_v30 = vrot.slane %v8480_v56, %v10333_v8  ;;  %v5950_v13 = vrot.slane %v8480_v56, %v10342_v10 }
 0x69b   : > { %8229 = vmatpush3.bf16.msra.mxu1 %v8228_v3  ;;  %8086 = vmatprep.mubr.msk.f32.mxu1 %vm8542_vm8, %v12578_v43  ;;  %v8251_v3 = vpack.c.bf16 %v12594_v39, %v12593_v52  ;;  %v5954_v35 = vrot.slane %v8480_v56, %v10345_v20 }
 0x69c   : > { %8230 = vmatprep.subr.bf16.mxu1 %v12582_v16  ;;  %v6153_v31 = vmul.f32 %v11356_v6, %v5930_v53  ;;  %v6154_v32 = vmul.f32 %v11362_v19, %v5934_v46  ;;  %v6158_v39 = vmul.f32 %v11397_v34, %v5950_v13 }
 0x69e   : > { %v5863_v25 = vpop.xlane.xlu0 %5862 }
 0x69f   : > { %8233 = vmatpush3.bf16.msk.msra.mxu1 %vm10024_vm5, %v8231_v61  ;;  %v5946_v61 = vrot.slane %v8480_v56, %v10339_v5  ;;  %8483 = vrcp.f32 %v5863_v25 }
 0x6a0   : > { %8245 = vmatprep.subr.bf16.mxu1 %v8244_v29  ;;  %v5958_v29 = vrot.slane %v8480_v56, %v10348_v51 }
 0x6a1   : > { %v6157_v25 = vmul.f32 %v11392_v60, %v5946_v61 }
 0x6a2   : > { %8087 = vmatmul.mubr.msk.f32.vlgmr.msra.gmra.mrb[32].mxu1 %vm3484_vm6, %v6829_v42  ;;  %v5942_v42 = vrot.slane %v8480_v56, %v10336_v27  ;;  %v6159_v56 = vmul.f32 %v11401_v57, %v5954_v35  ;;  %v6160_v16 = vmul.f32 %v11406_v28, %v5958_v29 }
 0x6a3   : > { %8247 = vmatpush1.bf16.msra.mxu1 %v8246_v26  ;;  %7216 = vmatprep.mubr.f32.mxu1 %v12578_v43  ;;  %v12597_v26 = vpack.c.bf16 %v12595_v63, %v12596_v40  ;;  %v6294_v63 = vcombine.low %v6153_v31, %v6154_v32 }
 0x6a4   : > { %8250 = vmatprep.subr.msk.bf16.mxu1 %vm10024_vm5, %v8248_v14  ;;  %v6155_v14 = vmul.f32 %v11380_v7, %v5938_v30  ;;  %v6156_v52 = vmul.f32 %v11386_v15, %v5942_v42  ;;  %v6296_v7 = vcombine.low %v6157_v25, %v6158_v39 }
 0x6a5   : > { %v11746_v42 = vrot.slane %v6294_v63, %v9101_v18 }
 0x6a6   : > { %v6295_v53 = vcombine.low %v6155_v14, %v6156_v52  ;;  %v11754_v29 = vrot.slane %v6296_v7, %v9101_v18 }
 0x6a7   : > { %8253 = vmatpush1.bf16.msk.msra.mxu1 %vm10024_vm5, %v8251_v3  ;;  %v8482_v3 = vpop.eup %8481  ;;  %v5875_v43 = vpop.xlane.xlu1 %5874 }
 0x6a8   : > { %8262 = vmatprep.subr.bf16.mxu1 %v12597_v26  ;;  %8485 = vrcp.f32 %v5875_v43  ;;  %v6030_v6 = vrot.slane %v8482_v3, %v10327_v47  ;;  %v6034_v19 = vrot.slane %v8482_v3, %v10330_v62  ;;  %v6038_v15 = vrot.slane %v8482_v3, %v10333_v8 }
 0x6a9   : > { %v6042_v60 = vrot.slane %v8482_v3, %v10336_v27  ;;  %v6046_v34 = vrot.slane %v8482_v3, %v10339_v5  ;;  %v6050_v46 = vrot.slane %v8482_v3, %v10342_v10  ;;  %v6054_v57 = vrot.slane %v8482_v3, %v10345_v20  ;;  %v8484_v30 = vpop.eup %8483 }
 0x6aa   : > { %v6058_v28 = vrot.slane %v8482_v3, %v10348_v51  ;;  %v6297_v43 = vcombine.low %v6159_v56, %v6160_v16  ;;  %v6178_v61 = vmul.f32 %v11412_v45, %v6030_v6  ;;  %v6179_v13 = vmul.f32 %v11416_v41, %v6034_v19 }
 0x6ab   : > { %v11751_v35 = vrot.slane %v6295_v53, %v9101_v18  ;;  %v6794_v40 = vpop.xlane.xlu1 %6793  ;;  %v6180_v26 = vmul.f32 %v11420_v54, %v6038_v15  ;;  %v6181_v31 = vmul.f32 %v11425_v24, %v6042_v60  ;;  %v6182_v16 = vmul.f32 %v11430_v2, %v6046_v34 }
 0x6ac   : > { %v6183_v32 = vmul.f32 %v11435_v22, %v6050_v46  ;;  %v5962_v14 = vrot.slane %v8484_v30, %v10327_v47  ;;  %v6184_v45 = vmul.f32 %v11439_v1, %v6054_v57  ;;  %v6185_v41 = vmul.f32 %v11444_v17, %v6058_v28  ;;  %v12598_v57 = vld [vmem:[#allocation39_spill] sm:$0xff] }
 0x6ad   : > { %v6325_v52 = vrot.slane %v6297_v43, %v9101_v18  ;;  %v5966_v25 = vrot.slane %v8484_v30, %v10330_v62  ;;  %v5970_v39 = vrot.slane %v8484_v30, %v10333_v8  ;;  %v5974_v54 = vrot.slane %v8484_v30, %v10336_v27  ;;  %v12599_v43 = vld [vmem:[#allocation12_spill] sm:$0xff] }
 0x6ae   : > { %v5978_v24 = vrot.slane %v8484_v30, %v10339_v5  ;;  %8487 = vrcp.f32 %v6794_v40  ;;  %v5982_v2 = vrot.slane %v8484_v30, %v10342_v10  ;;  %v5986_v22 = vrot.slane %v8484_v30, %v10345_v20 }
 0x6af   : > { %v5990_v3 = vrot.slane %v8484_v30, %v10348_v51  ;;  %v6326_v17 = vcombine.low %v11746_v42, %v11751_v35  ;;  %v6455_v56 = vcombine.low %v6178_v61, %v6179_v13  ;;  %v6456_v63 = vcombine.low %v6180_v26, %v6181_v31  ;;  %v11780_v42 = vpop.xlane.xlu1 %6799  ;;  %v12600_v61 = vld [vmem:[#allocation23_spill] sm:$0xff]  ;;  %v12601_v35 = vld [vmem:[#allocation76_spill] sm:$0xff]  ;;  %v12602_v26 = vld [vmem:[#allocation2_spill] sm:$0xff] }
 0x6b0   : > { %v6457_v6 = vcombine.low %v6182_v16, %v6183_v32  ;;  %v6161_v7 = vmul.f32 %v11446_v38, %v5962_v14  ;;  %v6458_v15 = vcombine.low %v6184_v45, %v6185_v41  ;;  %v6162_v34 = vmul.f32 %v11451_v44, %v5966_v25  ;;  %v12603_v45 = vld [vmem:[#allocation28_spill] sm:$0xff]  ;;  %v12604_v25 = vld [vmem:[#allocation18_spill] sm:$0xff] }
 0x6b1   : > { %v6163_v46 = vmul.f32 %v11456_v48, %v5970_v39  ;;  %v6164_v28 = vmul.f32 %v12598_v57, %v5974_v54  ;;  %v6165_v30 = vmul.f32 %v12599_v43, %v5978_v24  ;;  %v6166_v13 = vmul.f32 %v12600_v61, %v5982_v2 }
 0x6b2   : > { %v8486_v1 = vpop.eup %8485  ;;  %v6167_v40 = vmul.f32 %v12601_v35, %v5986_v22  ;;  %v6168_v31 = vmul.f32 %v12602_v26, %v5990_v3  ;;  %v6327_v54 = vcombine.low %v11754_v29, %v6325_v52  ;;  %v11795_v24 = vrot.slane %v6455_v56, %v9101_v18  ;;  %v12607_v29 = vld [vmem:[#allocation74_spill] sm:$0xff] }
 0x6b3   : > { %v6062_v19 = vrot.slane %v8486_v1, %v10327_v47  ;;  %v6066_v53 = vrot.slane %v8486_v1, %v10330_v62  ;;  %v6070_v38 = vrot.slane %v8486_v1, %v10333_v8  ;;  %v6074_v16 = vrot.slane %v8486_v1, %v10336_v27 }
 0x6b4   : > { %v5857_v60 = vpop.xlane.xlu0 %5856  ;;  %v6078_v44 = vrot.slane %v8486_v1, %v10339_v5  ;;  %v6082_v48 = vrot.slane %v8486_v1, %v10342_v10  ;;  %v6086_v32 = vrot.slane %v8486_v1, %v10345_v20  ;;  %v6090_v14 = vrot.slane %v8486_v1, %v10348_v51 }
 0x6b5   : > { %8489 = vrcp.f32 %v5857_v60  ;;  %v6186_v41 = vmul.f32 %v12603_v45, %v6062_v19  ;;  %v6187_v39 = vmul.f32 %v12604_v25, %v6066_v53  ;;  %v11798_v2 = vrot.slane %v6456_v63, %v9101_v18  ;;  %v12605_v19 = vld [vmem:[#allocation72_spill] sm:$0xff]  ;;  %v12606_v53 = vld [vmem:[#allocation73_spill] sm:$0xff]  ;;  %v12608_v45 = vld [vmem:[#allocation75_spill] sm:$0xff] }
 0x6b6   : > { %v11801_v22 = vrot.slane %v6457_v6, %v9101_v18  ;;  %v6343_v60 = vcombine.low %v6161_v7, %v6162_v34  ;;  %v6344_v57 = vcombine.low %v6163_v46, %v6164_v28  ;;  %v6345_v43 = vcombine.low %v6165_v30, %v6166_v13 }
 0x6b7   : > { %v6486_v1 = vrot.slane %v6458_v15, %v9101_v18  ;;  %v6188_v61 = vmul.f32 %v12605_v19, %v6070_v38  ;;  %v6189_v35 = vmul.f32 %v12606_v53, %v6074_v16  ;;  %v6190_v52 = vmul.f32 %v12607_v29, %v6078_v44 }
 0x6b8   : > { %v6346_v56 = vcombine.low %v6167_v40, %v6168_v31  ;;  %v8488_v26 = vpop.eup %8487  ;;  %v6191_v63 = vmul.f32 %v12608_v45, %v6082_v48  ;;  %v6192_v25 = vmul.f32 %v11538_v9, %v6086_v32  ;;  %v6193_v6 = vmul.f32 %v11544_v11, %v6090_v14 }
 0x6b9   : > { %v5878_v3 = vpop.xlane.xlu1 %5877  ;;  %v6504_v58 = vcombine.low %v6186_v41, %v6187_v39  ;;  %v11811_v7 = vrot.slane %v6326_v17, %v9101_v18  ;;  %v11814_v15 = vrot.slane %v6327_v54, %v9101_v18  ;;  %v11817_v34 = vrot.slane %v6343_v60, %v9101_v18 }
 0x6ba   : > { %8491 = vrcp.f32 %v5878_v3  ;;  %v11820_v46 = vrot.slane %v6344_v57, %v9101_v18  ;;  %v6487_v28 = vcombine.low %v11795_v24, %v11798_v2  ;;  %v6488_v9 = vcombine.low %v11801_v22, %v6486_v1 }
 0x6bb   : > { %v6814_v30 = vmul.f32 %v8488_v26, %v11567_v36  ;;  %v11827_v17 = vrot.slane %v6345_v43, %v9101_v18  ;;  %v11830_v13 = vrot.slane %v6346_v56, %v9101_v18  ;;  %v6505_v40 = vcombine.low %v6188_v61, %v6189_v35 }
 0x6bc   : > { %v6506_v38 = vcombine.low %v6190_v52, %v6191_v63  ;;  %v6507_v16 = vcombine.low %v6192_v25, %v6193_v6  ;;  %v11833_v44 = vrot.slane %v6504_v58, %v9101_v18  ;;  %v11869_v52 = vrot.slane %v6488_v9, %v9101_v18 }
 0x6bd   : > { %v11852_v35 = vrot.slane %v6505_v40, %v9101_v18  ;;  %v6831_v56 = vsel %vm3484_vm6, %v6814_v30, 0.0  ;;  %v6375_v26 = vcombine.low %v11817_v34, %v11820_v46  ;;  %v6376_v45 = vcombine.low %v11827_v17, %v11830_v13 }
 0x6be   : > { %v5869_v11 = vpop.xlane.xlu0 %5868 }
 0x6bf   : > { %v8490_v31 = vpop.eup %8489  ;;  %8493 = vrcp.f32 %v5869_v11  ;;  %v6536_v63 = vcombine.low %v11833_v44, %v11852_v35 }
 0x6c0   : > { %v5898_v48 = vrot.slane %v8490_v31, %v10327_v47  ;;  %v5902_v32 = vrot.slane %v8490_v31, %v10330_v62  ;;  %v5906_v36 = vrot.slane %v8490_v31, %v10333_v8  ;;  %v5910_v14 = vrot.slane %v8490_v31, %v10336_v27 }
 0x6c1   : > { %v5914_v41 = vrot.slane %v8490_v31, %v10339_v5  ;;  %v5918_v39 = vrot.slane %v8490_v31, %v10342_v10  ;;  %v5922_v54 = vrot.slane %v8490_v31, %v10345_v20  ;;  %v5926_v24 = vrot.slane %v8490_v31, %v10348_v51 }
 0x6c2   : > { %v6791_v2 = vpop.xlane.xlu0 %6790  ;;  %v6145_v58 = vmul.f32 %v11561_v37, %v5898_v48  ;;  %v6146_v22 = vmul.f32 %v11574_v21, %v5902_v32  ;;  %v6147_v3 = vmul.f32 %v11577_v50, %v5906_v36  ;;  %v6148_v60 = vmul.f32 %v11582_v59, %v5910_v14 }
 0x6c3   : > { %8495 = vrcp.f32 %v6791_v2  ;;  %v6149_v57 = vmul.f32 %v11584_v55, %v5914_v41  ;;  %v6150_v43 = vmul.f32 %v11588_v33, %v5918_v39  ;;  %v6151_v1 = vmul.f32 %v11595_v4, %v5922_v54  ;;  %v12611_v39 = vld [vmem:[#allocation63_spill] sm:$0xff] }
 0x6c4   : > { %v6152_v19 = vmul.f32 %v11597_v0, %v5926_v24  ;;  %v6245_v61 = vcombine.low %v6145_v58, %v6146_v22  ;;  %v6246_v53 = vcombine.low %v6147_v3, %v6148_v60  ;;  %8497 = vrcp.f32 %v11780_v42  ;;  %v8492_v59 = vpop.eup %8491  ;;  %v12612_v54 = vld [vmem:[#allocation71_spill] sm:$0xff] }
 0x6c5   : > { %v6247_v37 = vcombine.low %v6149_v57, %v6150_v43  ;;  %v11856_v21 = vrot.slane %v6506_v38, %v9101_v18  ;;  %v11859_v50 = vrot.slane %v6507_v16, %v9101_v18  ;;  %v6342_v4 = vcombine.low %v11811_v7, %v11814_v15  ;;  %v12613_v24 = vld [vmem:[#allocation43_spill] sm:$0xff]  ;;  %v12615_v57 = vld [vmem:[#allocation70_spill] sm:$0xff] }
 0x6c6   : > { %v6797_v55 = vpop.xlane.xlu0 %6796  ;;  %v6248_v33 = vcombine.low %v6151_v1, %v6152_v19  ;;  %v11864_v0 = vrot.slane %v6487_v28, %v9101_v18  ;;  %v6255_v29 = vrot.slane %v6245_v61, %v9101_v18  ;;  %v6262_v42 = vrot.slane %v6246_v53, %v9101_v18 }
 0x6c7   : > { %8499 = vrcp.f32 %v6797_v55  ;;  %v6094_v6 = vrot.slane %v8492_v59, %v10327_v47  ;;  %v6269_v28 = vrot.slane %v6247_v37, %v9101_v18  ;;  %v6537_v9 = vcombine.low %v11856_v21, %v11859_v50  ;;  %v12616_v50 = vld [vmem:[#allocation15_spill] sm:$0xff]  ;;  %v12617_v55 = vld [vmem:[#allocation33_spill] sm:$0xff] }
 0x6c8   : > { %v6276_v11 = vrot.slane %v6248_v33, %v9101_v18  ;;  %v6277_v38 = vcombine.low %v6255_v29, %v6262_v42  ;;  %v6383_v53 = vrot.slane %v6375_v26, %v9101_v18 }
 0x6c9   : > { %v8494_v25 = vpop.eup %8493  ;;  %v6194_v43 = vmul.f32 %v12615_v57, %v6094_v6  ;;  %v6390_v6 = vrot.slane %v6376_v45, %v9101_v18  ;;  %v12620_v57 = vld [vmem:[#allocation31_spill] sm:$0xff] }
 0x6ca   : > { %v5866_v30 = vpop.xlane.xlu0 %5865  ;;  %v5998_v40 = vrot.slane %v8494_v25, %v10327_v47  ;;  %v6002_v34 = vrot.slane %v8494_v25, %v10330_v62  ;;  %v6006_v46 = vrot.slane %v8494_v25, %v10333_v8  ;;  %v6010_v17 = vrot.slane %v8494_v25, %v10336_v27  ;;  %v12609_v8 = vld [vmem:[#allocation25_spill] sm:$0xff]  ;;  %v12610_v27 = vld [vmem:[#allocation6_spill] sm:$0xff] }
 0x6cb   : > { %8501 = vrcp.f32 %v5866_v30  ;;  %v6014_v13 = vrot.slane %v8494_v25, %v10339_v5  ;;  %v6018_v31 = vrot.slane %v8494_v25, %v10342_v10  ;;  %v6022_v16 = vrot.slane %v8494_v25, %v10345_v20  ;;  %v12614_v20 = vld [vmem:[#allocation68_spill] sm:$0xff] }
 0x6cc   : > { %v6026_v44 = vrot.slane %v8494_v25, %v10348_v51  ;;  %v6170_v48 = vmul.f32 %v11610_v23, %v5998_v40  ;;  %v6171_v32 = vmul.f32 %v11613_v49, %v6002_v34  ;;  %v6172_v62 = vmul.f32 %v11618_v12, %v6006_v46 }
 0x6cd   : > { %v8496_v36 = vpop.eup %8495  ;;  %v6173_v14 = vmul.f32 %v12609_v8, %v6010_v17  ;;  %v6174_v41 = vmul.f32 %v12610_v27, %v6014_v13  ;;  %v6175_v5 = vmul.f32 %v12611_v39, %v6018_v31  ;;  %v6176_v2 = vmul.f32 %v12613_v24, %v6022_v16 }
 0x6ce   : > { %v6813_v10 = vmul.f32 %v8496_v36, %v12612_v54  ;;  %v6177_v58 = vmul.f32 %v12614_v20, %v6026_v44  ;;  %v6278_v51 = vcombine.low %v6269_v28, %v6276_v11  ;;  %v8498_v22 = vpop.eup %8497  ;;  %v6285_v23 = vrot.slane %v6277_v38, %v9101_v18 }
 0x6cf   : > { %v6406_v49 = vcombine.low %v6170_v48, %v6171_v32  ;;  %v6407_v3 = vcombine.low %v6172_v62, %v6173_v14  ;;  %v6408_v60 = vcombine.low %v6174_v41, %v6175_v5  ;;  %v6816_v59 = vmul.f32 %v8498_v22, %v12616_v50  ;;  %v12618_v48 = vld [vmem:[#allocation7_spill] sm:$0xff] }
 0x6d0   : > { %v6830_v12 = vsel %vm3484_vm6, %v6813_v10, 0.0  ;;  %v6292_v1 = vrot.slane %v6278_v51, %v9101_v18  ;;  %v6409_v19 = vcombine.low %v6176_v2, %v6177_v58  ;;  %v6544_v11 = vrot.slane %v6536_v63, %v9101_v18 }
 0x6d1   : > { %v8500_v61 = vpop.eup %8499  ;;  %v6416_v35 = vrot.slane %v6406_v49, %v9101_v18  ;;  %v6423_v37 = vrot.slane %v6407_v3, %v9101_v18  ;;  %v6430_v21 = vrot.slane %v6408_v60, %v9101_v18  ;;  %v6832_v25 = vadd.f32 %v6831_v56, %v6830_v12  ;;  %v12619_v12 = vld [vmem:[#allocation21_spill] sm:$0xff] }
 0x6d2   : > { %v6815_v33 = vmul.f32 %v8500_v61, %v12617_v55  ;;  %v6293_v29 = vcombine.low %v6285_v23, %v6292_v1  ;;  %v6437_v42 = vrot.slane %v6409_v19, %v9101_v18  ;;  %v6559_v30 = vrot.slane %v6194_v43, %v9101_v18  ;;  %v12621_v61 = vld [vmem:[#allocation50_spill] sm:$0xff] }
 0x6d3   : > { %v6438_v28 = vcombine.low %v6416_v35, %v6423_v37  ;;  %v6551_v34 = vrot.slane %v6537_v9, %v9101_v18  ;;  %v6503_v31 = vcombine.low %v11864_v0, %v11869_v52  ;;  %v6835_v56 = vsel %vm3494_vm7, %v6816_v59, 0.0  ;;  %v12624_v37 = vld [vmem:[#allocation56_spill] sm:$0xff] }
 0x6d4   : > { %v6833_v26 = vsel %vm3484_vm6, %v6815_v33, 0.0  ;;  %v6439_v40 = vcombine.low %v6430_v21, %v6437_v42  ;;  %v6575_v38 = vsel %vm3484_vm6, %v6293_v29, 0.0  ;;  %v6391_v44 = vcombine.low %v6383_v53, %v6390_v6  ;;  %v12622_v53 = vld [vmem:[#allocation46_spill] sm:$0xff]  ;;  %v12625_v21 = vld [vmem:[#allocation52_spill] sm:$0xff] }
 0x6d5   : > { %v8502_v46 = vpop.eup %8501  ;;  %v6834_v17 = vadd.f32 %v6833_v26, %v6832_v25  ;;  %v6446_v13 = vrot.slane %v6438_v28, %v9101_v18  ;;  %v6576_v9 = vsel %vm3484_vm6, %v6342_v4, 0.0  ;;  %v6566_v36 = vrot.slane %v6559_v30, %v9101_v18  ;;  %v12629_v42 = vld [vmem:[#allocation42_spill] sm:$0xff]  ;;  %v12630_v25 = vld [vmem:[#allocation5_spill] sm:$0xff] }
 0x6d6   : > { %v5994_v45 = vrot.slane %v8502_v46, %v10327_v47  ;;  %v6453_v63 = vrot.slane %v6439_v40, %v9101_v18  ;;  %v6552_v52 = vcombine.low %v6544_v11, %v6551_v34  ;;  %v6577_v8 = vadd.f32 %v6576_v9, %v6575_v38  ;;  %v12632_v30 = vld [vmem:[#allocation58_spill] sm:$0xff]  ;;  %v12635_v46 = vld [vmem:[#allocation49_spill] sm:$0xff]  ;;  %v12639_v38 = vld [vmem:[#allocation47_spill] sm:$0xff] }
 0x6d7   : > { %v6836_v16 = vadd.f32 %v6835_v56, %v6834_v17  ;;  %v6589_v27 = vsel %vm3484_vm6, %v6503_v31, 0.0  ;;  %v6578_v15 = vsel %vm3484_vm6, %v6391_v44, 0.0  ;;  %v6593_v5 = vsel %vm3494_vm7, %v6566_v36, 0.0  ;;  %v12633_v40 = vld [vmem:[#allocation54_spill] sm:$0xff]  ;;  %v12636_v17 = vld [vmem:[#allocation45_spill] sm:$0xff]  ;;  %v12645_v36 = vld [vmem:[#allocation32_spill] sm:$0xff] }
 0x6d8   : > { %v6169_v32 = vmul.f32 %v12618_v48, %v5994_v45  ;;  %v6454_v0 = vcombine.low %v6446_v13, %v6453_v63  ;;  %v6591_v4 = vsel %vm3484_vm6, %v6552_v52, 0.0  ;;  %v6579_v10 = vadd.f32 %v6578_v15, %v6577_v8  ;;  %v12638_v63 = vld [vmem:[#allocation51_spill] sm:$0xff]  ;;  %v12641_v44 = vld [vmem:[#allocation57_spill] sm:$0xff] }
 0x6d9   : > { %v6837_v62 = vrot.slane %v6836_v16, 4  ;;  %v8255_v43 = vpack.c.bf16 %v12620_v57, %v12619_v12  ;;  %v12623_v35 = vpack.c.bf16 %v12621_v61, %v12622_v53  ;;  %v12626_v50 = vpack.c.bf16 %v12624_v37, %v12625_v21  ;;  %v12642_v9 = vld [vmem:[#allocation53_spill] sm:$0xff]  ;;  %v12647_v52 = vld [vmem:[#allocation59_spill] sm:$0xff] }
 0x6da   : > { %v6398_v47 = vrot.slane %v6169_v32, %v9101_v18  ;;  %v6588_v14 = vsel %vm3484_vm6, %v6454_v0, 0.0  ;;  %v12628_v55 = vmov 0.0|0.0   ;;  %v8258_v6 = vpack.c.bf16 %v12630_v25, %v12629_v42  ;;  %v12644_v32 = vld [vmem:[#allocation62_spill] sm:$0xff] }
 0x6db   : > { %v6838_v41 = vadd.f32 %v6837_v62, %v6836_v16  ;;  %v6590_v39 = vadd.f32 %v6589_v27, %v6588_v14  ;;  %v12631_v28 = vmov 0.0   ;;  %v12634_v34 = vpack.c.bf16 %v12632_v30, %v12633_v40  ;;  %v12648_v62 = vld [vmem:[#allocation55_spill] sm:$0xff]  ;;  %v12651_v14 = vld [vmem:[#allocation60_spill] sm:$0xff] }
 0x6dc   : > { %v6405_v7 = vrot.slane %v6398_v47, %v9101_v18  ;;  %v12637_v13 = vpack.c.bf16 %v12635_v46, %v12636_v17  ;;  %v12640_v16 = vpack.c.bf16 %v12638_v63, %v12639_v38  ;;  %v12643_v48 = vpack.c.bf16 %v12641_v44, %v12642_v9  ;;  %v12650_v47 = vld [vmem:[#allocation61_spill] sm:$0xff] }
 0x6dd   : > { %v6839_v54 = vrot.slane %v6838_v41, 2  ;;  %v6592_v24 = vadd.f32 %v6591_v4, %v6590_v39  ;;  %v12646_v0 = vpack.c.bf16 %v12644_v32, %v12645_v36  ;;  %v12649_v8 = vpack.c.bf16 %v12647_v52, %v12648_v62 }
 0x6de   : > { %v6580_v2 = vsel %vm3494_vm7, %v6405_v7, 0.0  ;;  %v12652_v27 = vpack.c.bf16 %v12650_v47, %v12651_v14 }
 0x6df   : > { %v6840_v20 = vadd.f32 %v6839_v54, %v6838_v41  ;;  %v6581_v58 = vadd.f32 %v6580_v2, %v6579_v10  ;;  %v6594_v51 = vadd.f32 %v6593_v5, %v6592_v24 }
 0x6e1   : > { %v6841_v22 = vrot.slane %v6840_v20, 1  ;;  %v6582_v23 = vrot.slane %v6581_v58, 4  ;;  %v6595_v49 = vrot.slane %v6594_v51, 4 }
 0x6e3   : > { %v6842_v3 = vadd.f32 %v6841_v22, %v6840_v20  ;;  %v6583_v60 = vadd.f32 %v6582_v23, %v6581_v58  ;;  %v6596_v18 = vadd.f32 %v6595_v49, %v6594_v51 }
 0x6e5   : > { %7814 = vmatmul.mubr.msk.f32.vlgmr.msra.gmra.mrb[30].mxu0 %vm3484_vm6, %v6842_v3  ;;  %7817 = vmatmul.mubr.msk.f32.vlgmr.msra.gmra.mrb[34].mxu1 %vm3484_vm6, %v6842_v3  ;;  %v6584_v1 = vrot.slane %v6583_v60, 2  ;;  %v6597_v19 = vrot.slane %v6596_v18, 2 }
 0x6e6   : > { %8256 = vmatpush3.bf16.msra.mxu0 %v8255_v43  ;;  %8264 = vmatpush1.bf16.msra.mxu1 %v12623_v35 }
 0x6e7   : > { %8267 = vmatprep.subr.msk.bf16.mxu1 %vm10024_vm5, %v12626_v50  ;;  %8257 = vmatprep.subr.bf16.mxu0 %v12628_v55  ;;  %v6585_v33 = vadd.f32 %v6584_v1, %v6583_v60  ;;  %v6598_v29 = vadd.f32 %v6597_v19, %v6596_v18 }
 0x6e8   : > { %8097 = vmatprep.mubr.msk.f32.mxu0 %vm8542_vm8, %v12631_v28  ;;  %7383 = vmatprep.mubr.f32.mxu1 %v12631_v28 }
 0x6e9   : > { %v6586_v11 = vrot.slane %v6585_v33, 1  ;;  %v6599_v26 = vrot.slane %v6598_v29, 1 }
 0x6ea   : > { %8260 = vmatpush3.bf16.msk.msra.mxu0 %vm10024_vm5, %v8258_v6  ;;  %8270 = vmatpush1.bf16.msk.msra.mxu1 %vm10024_vm5, %v12634_v34 }
 0x6eb   : > { %8272 = vmatprep.subr.bf16.mxu0 %v12637_v13  ;;  %8281 = vmatprep.subr.bf16.mxu1 %v12628_v55  ;;  %v6587_v31 = vadd.f32 %v6586_v11, %v6585_v33  ;;  %v6600_v56 = vadd.f32 %v6599_v26, %v6598_v29 }
 0x6ed   : > { %8098 = vmatmul.mubr.msk.f32.vlgmr.msra.gmra.mrb[36].mxu0 %vm3484_vm6, %v6842_v3  ;;  %v7306_v45 = vsel %vm7305_vm9, %v6600_v56, %v6587_v31 }
 0x6ee   : > { %8274 = vmatpush1.bf16.msra.mxu0 %v12640_v16  ;;  %7822 = vmatmul.mubr.msk.f32.vlgmr.msra.gmra.mrb[36].mxu1 %vm3484_vm6, %v7306_v45 }
 0x6ef   : > { %8277 = vmatprep.subr.msk.bf16.mxu0 %vm10024_vm5, %v12643_v48  ;;  %8283 = vmatpush3.bf16.msra.mxu1 %v12646_v0 }
 0x6f0   : > { %7454 = vmatprep.mubr.f32.mxu0 %v12631_v28  ;;  %8284 = vmatprep.subr.bf16.mxu1 %v12628_v55 }
 0x6f1   : > { %8108 = vmatprep.mubr.msk.f32.mxu1 %vm8542_vm8, %v12631_v28 }
 0x6f2   : > { %8280 = vmatpush1.bf16.msk.msra.mxu0 %vm10024_vm5, %v12649_v8 }
 0x6f3   : > { %8287 = vmatpush3.bf16.msk.msra.mxu1 %vm10024_vm5, %v12652_v27 }
 0x6f5   : > { %7825 = vmatmul.mubr.msk.f32.vlgmr.msra.gmra.mrb[38].mxu0 %vm3484_vm6, %v7306_v45 }
 0x6f6   : > { %8109 = vmatmul.mubr.msk.f32.vlgmr.msra.gmra.mrb[38].mxu1 %vm3484_vm6, %v7306_v45 }
 0x765   : > { %v6922_v41 = vpop.f32.mrb[28].mxu1 }
 0x766   : > { %v6924_v39 = vpop.f32.mrb[29].mxu1  ;;  %v7293_v54 = vmul.f32 0.04, %v6922_v41 }
 0x767   : > { %v7294_v10 = vmul.f32 0.04, %v6924_v39 }
 0x768   : > { %v7602_v57 = vmul.f32 %v7293_v54, %v7293_v54 }
 0x769   : > { %v7603_v19 = vmul.f32 %v7294_v10, %v7294_v10 }
 0x76d   : > { %v6993_v7 = vpop.f32.mrb[30].mxu1 }
 0x76e   : > { %v6995_v15 = vpop.f32.mrb[31].mxu1  ;;  %v11996_v24 = vmul.f32 0.04, %v6993_v7 }
 0x76f   : > { %v12000_v49 = vmul.f32 0.04, %v6995_v15 }
 0x770   : > { %v7604_v61 = vmul.f32 %v11996_v24, %v11996_v24 }
 0x771   : > { %v7605_v37 = vmul.f32 %v12000_v49, %v12000_v49 }
 0x775   : > { %v7064_v4 = vpop.f32.mrb[32].mxu1 }
 0x776   : > { %v8088_v5 = vpop.f32.mrb[33].mxu1  ;;  %v7297_v21 = vmul.f32 0.04, %v7064_v4 }
 0x778   : > { %v7606_v40 = vmul.f32 %v7297_v21, %v7297_v21 }
 0x7b8   : > { %v7147_v2 = vpop.f32.mrb[30].mxu0  ;;  %v7218_v20 = vpop.f32.mrb[34].mxu1 }
 0x7b9   : > { %v7298_v58 = vmul.f32 0.04, %v7147_v2  ;;  %v11998_v51 = vmul.f32 0.04, %v7218_v20  ;;  %v7149_v22 = vpop.f32.mrb[31].mxu0  ;;  %v7220_v23 = vpop.f32.mrb[35].mxu1 }
 0x7ba   : > { %v7299_v3 = vmul.f32 0.04, %v7149_v22  ;;  %v12002_v60 = vmul.f32 0.04, %v7220_v23 }
 0x7bb   : > { %v7607_v18 = vmul.f32 %v7298_v58, %v7298_v58  ;;  %v7609_v12 = vmul.f32 %v11998_v51, %v11998_v51 }
 0x7bc   : > { %v7608_v43 = vmul.f32 %v7299_v3, %v7299_v3  ;;  %v7610_v1 = vmul.f32 %v12002_v60, %v12002_v60 }
 0x7bd   : > { %v7622_v53 = vrot.slane %v7607_v18, 7  ;;  %v7626_v35 = vrot.slane %v7609_v12, 7 }
 0x7be   : > { %v7624_v50 = vrot.slane %v7608_v43, 7  ;;  %v7628_v59 = vrot.slane %v7610_v1, 7 }
 0x7bf   : > { %v7623_v55 = vsel %vm7305_vm9, %v7622_v53, %v7602_v57  ;;  %v7627_v33 = vsel %vm7305_vm9, %v7626_v35, %v7604_v61 }
 0x7c0   : > { %v7625_v29 = vsel %vm7305_vm9, %v7624_v50, %v7603_v19  ;;  %v7289_v42 = vpop.f32.mrb[36].mxu0  ;;  %v7629_v25 = vsel %vm7305_vm9, %v7628_v59, %v7605_v37  ;;  %v7637_v6 = vsel %vm2062_vm1, %v7623_v55, 0.0  ;;  %v7640_v56 = vsel %vm2062_vm1, %v7627_v33, 0.0 }
 0x7c1   : > { %v7302_v28 = vmul.f32 0.04, %v7289_v42  ;;  %v8099_v11 = vpop.f32.mrb[37].mxu0  ;;  %v7385_v26 = vpop.f32.mrb[36].mxu1  ;;  %v7638_v30 = vsel %vm2062_vm1, %v7625_v29, 0.0  ;;  %v7642_v45 = vsel %vm2062_vm1, %v7629_v25, 0.0 }
 0x7c2   : > { %v7531_v34 = vmul.f32 0.04, %v7385_v26  ;;  %v7387_v46 = vpop.f32.mrb[37].mxu1  ;;  %v7639_v17 = vadd.f32 %v7638_v30, %v7637_v6 }
 0x7c3   : > { %v7611_v13 = vmul.f32 %v7302_v28, %v7302_v28  ;;  %v7532_v31 = vmul.f32 0.04, %v7387_v46 }
 0x7c4   : > { %v7541_v63 = vrot.slane %v7531_v34, 1  ;;  %v7556_v38 = vmul.f32 %v7531_v34, %v7293_v54  ;;  %v7655_v16 = vmul.f32 %v7531_v34, %v7531_v34  ;;  %v7641_v44 = vadd.f32 %v7640_v56, %v7639_v17 }
 0x7c5   : > { %v7630_v9 = vrot.slane %v7611_v13, 7  ;;  %v7542_v48 = vrot.slane %v7532_v31, 1  ;;  %v7557_v32 = vmul.f32 %v7532_v31, %v7294_v10  ;;  %v7656_v36 = vmul.f32 %v7532_v31, %v7532_v31 }
 0x7c6   : > { %v7561_v0 = vmul.f32 %v7541_v63, %v7298_v58  ;;  %v7660_v52 = vsel %vm2062_vm1, %v7655_v16, 0.0  ;;  %v7643_v62 = vadd.f32 %v7642_v45, %v7641_v44 }
 0x7c7   : > { %v7562_v8 = vmul.f32 %v7542_v48, %v7299_v3  ;;  %v7661_v47 = vsel %vm2062_vm1, %v7656_v36, 0.0  ;;  %v7631_v14 = vsel %vm7305_vm9, %v7630_v9, %v7606_v40 }
 0x7c8   : > { %v7576_v27 = vrot.slane %v7561_v0, 7  ;;  %v7456_v41 = vpop.f32.mrb[38].mxu0  ;;  %v7644_v39 = vsel %vm2062_vm1, %v7631_v14, 0.0  ;;  %v7662_v7 = vadd.f32 %v7661_v47, %v7660_v52 }
 0x7c9   : > { %v7578_v15 = vrot.slane %v7562_v8, 7  ;;  %v7533_v4 = vmul.f32 0.04, %v7456_v41  ;;  %v7458_v5 = vpop.f32.mrb[39].mxu0  ;;  %v7645_v54 = vadd.f32 %v7644_v39, %v7643_v62  ;;  %v7527_v10 = vpop.f32.mrb[38].mxu1 }
 0x7ca   : > { %v7534_v2 = vmul.f32 0.04, %v7458_v5  ;;  %v7535_v20 = vmul.f32 0.04, %v7527_v10  ;;  %v8110_v58 = vpop.f32.mrb[39].mxu1  ;;  %v7577_v22 = vsel %vm7305_vm9, %v7576_v27, %v7556_v38 }
 0x7cb   : > { %v7543_v23 = vrot.slane %v7533_v4, 1  ;;  %v7558_v3 = vmul.f32 %v7533_v4, %v11996_v24  ;;  %v7657_v18 = vmul.f32 %v7533_v4, %v7533_v4  ;;  %7646 = vadd.xlane.f32.xlu0 %v7645_v54  ;;  %v7579_v12 = vsel %vm7305_vm9, %v7578_v15, %v7557_v32 }
 0x7cc   : > { %v7544_v57 = vrot.slane %v7534_v2, 1  ;;  %v7559_v43 = vmul.f32 %v7534_v2, %v12000_v49  ;;  %v7658_v1 = vmul.f32 %v7534_v2, %v7534_v2  ;;  %v7545_v19 = vrot.slane %v7535_v20, 1 }
 0x7cd   : > { %v7563_v61 = vmul.f32 %v7543_v23, %v11998_v51  ;;  %v7560_v53 = vmul.f32 %v7535_v20, %v7297_v21  ;;  %v7659_v35 = vmul.f32 %v7535_v20, %v7535_v20  ;;  %v7663_v37 = vsel %vm2062_vm1, %v7657_v18, 0.0 }
 0x7ce   : > { %v7564_v50 = vmul.f32 %v7544_v57, %v12002_v60  ;;  %v7565_v59 = vmul.f32 %v7545_v19, %v7302_v28  ;;  %v7664_v55 = vadd.f32 %v7663_v37, %v7662_v7  ;;  %v7665_v24 = vsel %vm2062_vm1, %v7658_v1, 0.0 }
 0x7cf   : > { %v7580_v33 = vrot.slane %v7563_v61, 7  ;;  %v7667_v29 = vsel %vm2062_vm1, %v7659_v35, 0.0  ;;  %v7591_v42 = vsel %vm2062_vm1, %v7577_v22, 0.0  ;;  %v7592_v49 = vsel %vm2062_vm1, %v7579_v12, 0.0 }
 0x7d0   : > { %v7582_v25 = vrot.slane %v7564_v50, 7  ;;  %v7584_v6 = vrot.slane %v7565_v59, 7  ;;  %v7666_v51 = vadd.f32 %v7665_v24, %v7664_v55  ;;  %v7593_v21 = vadd.f32 %v7592_v49, %v7591_v42 }
 0x7d1   : > { %v7581_v11 = vsel %vm7305_vm9, %v7580_v33, %v7558_v3 }
 0x7d2   : > { %v7668_v26 = vadd.f32 %v7667_v29, %v7666_v51  ;;  %v7583_v60 = vsel %vm7305_vm9, %v7582_v25, %v7559_v43  ;;  %v7585_v28 = vsel %vm7305_vm9, %v7584_v6, %v7560_v53  ;;  %v7594_v30 = vsel %vm2062_vm1, %v7581_v11, 0.0 }
 0x7d3   : > { %v7595_v40 = vadd.f32 %v7594_v30, %v7593_v21  ;;  %v7596_v34 = vsel %vm2062_vm1, %v7583_v60, 0.0  ;;  %v7598_v46 = vsel %vm2062_vm1, %v7585_v28, 0.0 }
 0x7d4   : > { %7669 = vadd.xlane.f32.xlu1 %v7668_v26 }
 0x7d5   : > { %v7597_v17 = vadd.f32 %v7596_v34, %v7595_v40 }
 0x7d7   : > { %v7599_v13 = vadd.f32 %v7598_v46, %v7597_v17 }
 0x7d9   : > { %7600 = vadd.xlane.f32.xlu0 %v7599_v13 }
 0x858   : > { %v7647_v31 = vpop.xlane.xlu0 %7646 }
 0x859   : > { %8503 = vrsqrt.f32 %v7647_v31  ;;  %vm7650_vm10 = vcmp.eq.f32.partialorder %v7647_v31, inf  ;;  %v7653_v44 = vand.u32 2147483648, %v7647_v31  ;;  %vm7652_vm11 = vcmp.eq.f32.partialorder %v7647_v31, 0.0 }
 0x861   : > { %v7670_v56 = vpop.xlane.xlu1 %7669 }
 0x862   : > { %8505 = vrsqrt.f32 %v7670_v56  ;;  %vm7673_vm12 = vcmp.eq.f32.partialorder %v7670_v56, inf  ;;  %v7676_v32 = vand.u32 2147483648, %v7670_v56  ;;  %vm7675_vm13 = vcmp.eq.f32.partialorder %v7670_v56, 0.0 }
 0x863   : > { %v8504_v45 = vpop.eup %8503 }
 0x864   : > { %v7649_v63 = vmul.f32 %v8504_v45, %v7647_v31 }
 0x866   : > { %v7651_v38 = vsel %vm7650_vm10, %v7647_v31, %v7649_v63  ;;  %v7601_v14 = vpop.xlane.xlu0 %7600 }
 0x867   : > { %v7654_v48 = vsel %vm7652_vm11, %v7653_v44, %v7651_v38 }
 0x868   : > { %v7678_v62 = vmax.f32 %v7654_v48, 1e-08 }
 0x86c   : > { %v8506_v16 = vpop.eup %8505 }
 0x86d   : > { %v7672_v9 = vmul.f32 %v8506_v16, %v7670_v56 }
 0x86f   : > { %v7674_v36 = vsel %vm7673_vm12, %v7670_v56, %v7672_v9 }
 0x870   : > { %v7677_v0 = vsel %vm7675_vm13, %v7676_v32, %v7674_v36 }
 0x871   : > { %v7679_v52 = vmax.f32 %v7677_v0, 1e-08 }
 0x873   : > { %v7680_v8 = vmul.f32 %v7679_v52, %v7678_v62 }
 0x875   : > { %8507 = vrcp.f32 %v7680_v8 }
 0x87f   : > { %v8508_v47 = vpop.eup %8507 }
 0x880   : > { %v7682_v27 = vmul.f32 %v8508_v47, %v7601_v14 }
 0x882   : > { %v7683_v41 = vmul.f32 5.0, %v7682_v27 }
 0x884   : > { %7685 = vst.msk [vmem:[%s222_s27] sm:$0x3] %vm7684_vm14, %v7683_v41 }
 0x885 PF: > { %s15_s18 = sadd.s32 1, %s8535_s18  }
 0x886   : > { %p12_p4 = scmp.ge.s32.totalorder %s15_s18, 5  }
 0x888   :  { %14 = sbr.rel (!%p12_p4) target bundleno = 1 (0x1), region = 70 }

</bundles_post_ra>
